<compile_context>
chip_gen: v6e
topology: v6e:2x2x1
jax: 0.10.0
libtpu: 0.0.40
codegen_flags: <defaults>
</compile_context>

<pallas_src>
import functools

import jax
import jax.numpy as jnp
import numpy as np
from jax.experimental import pallas as pl
from jax.experimental.pallas import tpu as pltpu


def _sigmoid(x):
    return 1.0 / (1.0 + jnp.exp(-x))


def _convlstm_kernel(x_ref, h_ref, c_ref, wx_ref, wh_ref, b_ref, m_ref,
                     hid_ref, cell_ref, *, hgt, wid, hidden_size):
    """Fused ConvLSTM2d cell update for one batch element.

    x_ref   : [1, Cx, H*W]    input_ (flattened NCHW slab)
    h_ref   : [1, Ch, H*W]    prev_hidden
    c_ref   : [1, Ch, H*W]    prev_cell
    wx_ref  : [9, 4*Ch, Cx]   conv weights (input channels), per 3x3 tap
    wh_ref  : [4*Ch, 9*Ch]    conv weights (hidden channels), taps flattened
    b_ref   : [4*Ch, 1]       conv bias
    m_ref   : [9, 1, H*W]     per-tap boundary masks (1.0 = source in-bounds)
    hid_ref : [1, Ch, H*W]    output hidden
    cell_ref: [1, Ch, H*W]    output cell
    """
    f32 = jnp.float32
    hw = hgt * wid
    ch = hidden_size

    xf = x_ref[0].astype(f32)          # [Cx, HW]
    hf = h_ref[0].astype(f32)          # [Ch, HW]
    cf = c_ref[0].astype(f32)          # [Ch, HW]

    x_pieces = []
    h_pieces = []
    k = 0
    for dh in (-1, 0, 1):
        for dw in (-1, 0, 1):
            off = dh * wid + dw        # flattened source offset of this tap
            if off == 0:
                xs, hs = xf, hf        # centre tap: no shift, mask is all-ones
            else:
                shift = (-off) % hw    # out[p] = in[p + off] (jnp.roll semantics)
                xs = pltpu.roll(xf, shift=shift, axis=1)
                hs = pltpu.roll(hf, shift=shift, axis=1)
                mk = m_ref[k]          # [1, HW]; zeroes out-of-bounds sources
                xs = xs * mk
                hs = hs * mk
            x_pieces.append(xs)
            h_pieces.append(hs)
            k += 1

    # Dominant contraction: one MXU matmul with K = 9*Ch (sublane-aligned
    # concat of the 9 hidden-state taps).
    hcol = jnp.concatenate(h_pieces, axis=0)                      # [9*Ch, HW]
    gates = jnp.dot(wh_ref[...], hcol, preferred_element_type=f32)

    # Tiny input-channel contribution (Cx is small / not sublane aligned):
    # 9 small accumulated MXU dots.
    for k in range(9):
        gates = gates + jnp.dot(wx_ref[k], x_pieces[k],
                                preferred_element_type=f32)

    gates = gates + b_ref[...]                                    # [4*Ch, HW]

    in_g   = _sigmoid(gates[0 * ch:1 * ch])
    rem_g  = _sigmoid(gates[1 * ch:2 * ch])
    out_g  = _sigmoid(gates[2 * ch:3 * ch])
    cell_g = jnp.tanh(gates[3 * ch:4 * ch])

    cell = rem_g * cf + in_g * cell_g
    hidden = out_g * jnp.tanh(cell)

    hid_ref[0] = hidden.astype(hid_ref.dtype)
    cell_ref[0] = cell.astype(cell_ref.dtype)


def _tap_masks(hgt, wid):
    """[9, 1, H*W] float32 masks: 1.0 where the tap's source pixel is in-bounds."""
    rows = np.arange(hgt)[:, None]
    cols = np.arange(wid)[None, :]
    mlist = []
    for dh in (-1, 0, 1):
        for dw in (-1, 0, 1):
            valid = ((rows + dh >= 0) & (rows + dh <= hgt - 1)
                     & (cols + dw >= 0) & (cols + dw <= wid - 1))
            mlist.append(valid.astype(np.float32).reshape(1, hgt * wid))
    return jnp.asarray(np.stack(mlist, axis=0))


@jax.jit
def _convlstm2d_impl(weight, bias, x, prev_h, prev_c):
    b, cx, hgt, wid = x.shape
    oc = weight.shape[0]
    ch = oc // 4
    hw = hgt * wid
    out_dtype = x.dtype

    # Free row-major views (no HBM transpose / concat of the stacked input).
    x2 = x.reshape(b, cx, hw)
    h2 = prev_h.reshape(b, ch, hw)
    c2 = prev_c.reshape(b, ch, hw)

    # One-time (tiny) weight repack:
    #   wx3[k] = W[:, :cx, kh, kw]                      -> [9, 4*Ch, Cx]
    #   wh2    = W[:, cx:, :, :] laid out (kh, kw, ic)  -> [4*Ch, 9*Ch]
    wf = weight.astype(jnp.float32)
    wx3 = jnp.transpose(wf[:, :cx], (2, 3, 0, 1)).reshape(9, oc, cx)
    wh2 = jnp.transpose(wf[:, cx:], (0, 2, 3, 1)).reshape(oc, 9 * ch)
    b2 = bias.astype(jnp.float32).reshape(oc, 1)
    masks = _tap_masks(hgt, wid)                                  # [9, 1, HW]

    kernel = functools.partial(_convlstm_kernel, hgt=hgt, wid=wid,
                               hidden_size=ch)

    hid, cell = pl.pallas_call(
        kernel,
        grid=(b,),
        in_specs=[
            pl.BlockSpec((1, cx, hw), lambda i: (i, 0, 0)),
            pl.BlockSpec((1, ch, hw), lambda i: (i, 0, 0)),
            pl.BlockSpec((1, ch, hw), lambda i: (i, 0, 0)),
            pl.BlockSpec((9, oc, cx), lambda i: (0, 0, 0)),
            pl.BlockSpec((oc, 9 * ch), lambda i: (0, 0)),
            pl.BlockSpec((oc, 1), lambda i: (0, 0)),
            pl.BlockSpec((9, 1, hw), lambda i: (0, 0, 0)),
        ],
        out_specs=[
            pl.BlockSpec((1, ch, hw), lambda i: (i, 0, 0)),
            pl.BlockSpec((1, ch, hw), lambda i: (i, 0, 0)),
        ],
        out_shape=[
            jax.ShapeDtypeStruct((b, ch, hw), out_dtype),
            jax.ShapeDtypeStruct((b, ch, hw), out_dtype),
        ],
        compiler_params=pltpu.CompilerParams(
            dimension_semantics=("parallel",)),
    )(x2, h2, c2, wx3, wh2, b2, masks)

    return (hid.reshape(b, ch, hgt, wid), cell.reshape(b, ch, hgt, wid))


def convlstm2d_forward(weight, bias, input_, prev_state=None):
    """ConvLSTM2d.forward(input_, prev_state) -> (hidden, cell), all NCHW."""
    b, _, hgt, wid = input_.shape
    ch = weight.shape[0] // 4
    if prev_state is None:   # matches the PyTorch zero-state initialisation
        prev_h = jnp.zeros((b, ch, hgt, wid), input_.dtype)
        prev_c = jnp.zeros((b, ch, hgt, wid), input_.dtype)
    else:
        prev_h, prev_c = prev_state
    return _convlstm2d_impl(weight, bias, input_, prev_h, prev_c)


# ----------------------------------------------------------------------------
# Pure-JAX reference (sanity check)
# ----------------------------------------------------------------------------
def _ref_forward(weight, bias, x, prev_state):
    b, _, hgt, wid = x.shape
    ch = weight.shape[0] // 4
    if prev_state is None:
        prev_h = jnp.zeros((b, ch, hgt, wid), x.dtype)
        prev_c = jnp.zeros((b, ch, hgt, wid), x.dtype)
    else:
        prev_h, prev_c = prev_state
    stacked = jnp.concatenate([x, prev_h], axis=1)
    gates = jax.lax.conv_general_dilated(
        stacked, weight, window_strides=(1, 1), padding=((1, 1), (1, 1)),
        dimension_numbers=("NCHW", "OIHW", "NCHW"),
        precision=jax.lax.Precision.HIGHEST)
    gates = gates + bias[None, :, None, None]
    in_g = jax.nn.sigmoid(gates[:, 0 * ch:1 * ch])
    rem_g = jax.nn.sigmoid(gates[:, 1 * ch:2 * ch])
    out_g = jax.nn.sigmoid(gates[:, 2 * ch:3 * ch])
    cell_g = jnp.tanh(gates[:, 3 * ch:4 * ch])
    cell = rem_g * prev_c + in_g * cell_g
    hidden = out_g * jnp.tanh(cell)
    return hidden, cell


# ----------------------------------------------------------------------------
if __name__ == "__main__":
    key = jax.random.PRNGKey(0)
    kw_, kb_, kx_, kh_, kc_ = jax.random.split(key, 5)

    B, Cin, Chid, Hs, Ws = 2, 4, 32, 16, 16
    fan_in = (Cin + Chid) * 3 * 3
    bound = 1.0 / np.sqrt(fan_in)

    weight = jax.random.uniform(kw_, (4 * Chid, Cin + Chid, 3, 3),
                                jnp.float32, -bound, bound)
    bias = jax.random.uniform(kb_, (4 * Chid,), jnp.float32, -bound, bound)
    x = jax.random.normal(kx_, (B, Cin, Hs, Ws), dtype=jnp.float32)
    prev_h = jax.random.normal(kh_, (B, Chid, Hs, Ws), dtype=jnp.float32)
    prev_c = jax.random.normal(kc_, (B, Chid, Hs, Ws), dtype=jnp.float32)

    # With an explicit previous state.
    hid, cell = convlstm2d_forward(weight, bias, x, (prev_h, prev_c))
    hid = jax.block_until_ready(hid)
    cell = jax.block_until_ready(cell)
    rh, rc = _ref_forward(weight, bias, x, (prev_h, prev_c))
    np.testing.assert_allclose(np.asarray(hid), np.asarray(rh),
                               rtol=2e-2, atol=2e-2)
    np.testing.assert_allclose(np.asarray(cell), np.asarray(rc),
                               rtol=2e-2, atol=2e-2)

    # prev_state=None path (zero initial state), as in the PyTorch module.
    hid0, cell0 = convlstm2d_forward(weight, bias, x, None)
    hid0 = jax.block_until_ready(hid0)
    rh0, rc0 = _ref_forward(weight, bias, x, None)
    np.testing.assert_allclose(np.asarray(hid0), np.asarray(rh0),
                               rtol=2e-2, atol=2e-2)
    np.testing.assert_allclose(np.asarray(cell0), np.asarray(rc0),
                               rtol=2e-2, atol=2e-2)

    print("KERNEL_OK")
</pallas_src>

<mosaic_0001>
module attributes {stable_mosaic.version = 11 : i64} {
  func.func @_convlstm_kernel(%arg0: i32, %arg1: memref<1x4x256xf32, #tpu.memory_space<vmem>>, %arg2: memref<1x32x256xf32, #tpu.memory_space<vmem>>, %arg3: memref<1x32x256xf32, #tpu.memory_space<vmem>>, %arg4: memref<9x128x4xf32, #tpu.memory_space<vmem>>, %arg5: memref<128x288xf32, #tpu.memory_space<vmem>>, %arg6: memref<128x1xf32, #tpu.memory_space<vmem>>, %arg7: memref<9x1x256xf32, #tpu.memory_space<vmem>>, %arg8: memref<1x32x256xf32, #tpu.memory_space<vmem>>, %arg9: memref<1x32x256xf32, #tpu.memory_space<vmem>>) attributes {dimension_semantics = [#tpu.dimension_semantics<parallel>], iteration_bounds = array<i64: 2>, scalar_prefetch = 0 : i64, scratch_operands = 0 : i64, tpu.core_type = #tpu.core_type<tc>, window_params = [{transform_indices = @transform_0, window_bounds = array<i64: 1, 4, 256>}, {transform_indices = @transform_1, window_bounds = array<i64: 1, 32, 256>}, {transform_indices = @transform_2, window_bounds = array<i64: 1, 32, 256>}, {pipeline_mode = #tpu.pipeline_mode<synchronous>, transform_indices = @transform_3, window_bounds = array<i64: 9, 128, 4>}, {pipeline_mode = #tpu.pipeline_mode<synchronous>, transform_indices = @transform_4, window_bounds = array<i64: 128, 288>}, {pipeline_mode = #tpu.pipeline_mode<synchronous>, transform_indices = @transform_5, window_bounds = array<i64: 128, 1>}, {pipeline_mode = #tpu.pipeline_mode<synchronous>, transform_indices = @transform_6, window_bounds = array<i64: 9, 1, 256>}, {transform_indices = @transform_7, window_bounds = array<i64: 1, 32, 256>}, {transform_indices = @transform_8, window_bounds = array<i64: 1, 32, 256>}]} {
    %c0 = arith.constant 0 : index
    %c0_0 = arith.constant 0 : index
    %c0_1 = arith.constant 0 : index
    %0 = vector.load %arg1[%c0, %c0_0, %c0_1] : memref<1x4x256xf32, #tpu.memory_space<vmem>>, vector<1x4x256xf32>
    %1 = vector.shape_cast %0 : vector<1x4x256xf32> to vector<4x256xf32>
    %c0_2 = arith.constant 0 : index
    %c0_3 = arith.constant 0 : index
    %c0_4 = arith.constant 0 : index
    %2 = vector.load %arg2[%c0_2, %c0_3, %c0_4] : memref<1x32x256xf32, #tpu.memory_space<vmem>>, vector<1x32x256xf32>
    %3 = vector.shape_cast %2 : vector<1x32x256xf32> to vector<32x256xf32>
    %c0_5 = arith.constant 0 : index
    %c0_6 = arith.constant 0 : index
    %c0_7 = arith.constant 0 : index
    %4 = vector.load %arg3[%c0_5, %c0_6, %c0_7] : memref<1x32x256xf32, #tpu.memory_space<vmem>>, vector<1x32x256xf32>
    %5 = vector.shape_cast %4 : vector<1x32x256xf32> to vector<32x256xf32>
    %c17_i32 = arith.constant 17 : i32
    %6 = tpu.dynamic_rotate %1 by %c17_i32 dim 1 : vector<4x256xf32>, i32 -> vector<4x256xf32>
    %c17_i32_8 = arith.constant 17 : i32
    %7 = tpu.dynamic_rotate %3 by %c17_i32_8 dim 1 : vector<32x256xf32>, i32 -> vector<32x256xf32>
    %c0_9 = arith.constant 0 : index
    %c0_10 = arith.constant 0 : index
    %c0_11 = arith.constant 0 : index
    %8 = vector.load %arg7[%c0_9, %c0_10, %c0_11] : memref<9x1x256xf32, #tpu.memory_space<vmem>>, vector<1x1x256xf32>
    %9 = vector.shape_cast %8 : vector<1x1x256xf32> to vector<1x256xf32>
    %10 = vector.broadcast %9 : vector<1x256xf32> to vector<4x256xf32>
    %11 = arith.mulf %6, %10 : vector<4x256xf32>
    %12 = vector.broadcast %9 : vector<1x256xf32> to vector<32x256xf32>
    %13 = arith.mulf %7, %12 : vector<32x256xf32>
    %c16_i32 = arith.constant 16 : i32
    %14 = tpu.dynamic_rotate %1 by %c16_i32 dim 1 : vector<4x256xf32>, i32 -> vector<4x256xf32>
    %c16_i32_12 = arith.constant 16 : i32
    %15 = tpu.dynamic_rotate %3 by %c16_i32_12 dim 1 : vector<32x256xf32>, i32 -> vector<32x256xf32>
    %c1 = arith.constant 1 : index
    %c0_13 = arith.constant 0 : index
    %c0_14 = arith.constant 0 : index
    %16 = vector.load %arg7[%c1, %c0_13, %c0_14] : memref<9x1x256xf32, #tpu.memory_space<vmem>>, vector<1x1x256xf32>
    %17 = vector.shape_cast %16 : vector<1x1x256xf32> to vector<1x256xf32>
    %18 = vector.broadcast %17 : vector<1x256xf32> to vector<4x256xf32>
    %19 = arith.mulf %14, %18 : vector<4x256xf32>
    %20 = vector.broadcast %17 : vector<1x256xf32> to vector<32x256xf32>
    %21 = arith.mulf %15, %20 : vector<32x256xf32>
    %c15_i32 = arith.constant 15 : i32
    %22 = tpu.dynamic_rotate %1 by %c15_i32 dim 1 : vector<4x256xf32>, i32 -> vector<4x256xf32>
    %c15_i32_15 = arith.constant 15 : i32
    %23 = tpu.dynamic_rotate %3 by %c15_i32_15 dim 1 : vector<32x256xf32>, i32 -> vector<32x256xf32>
    %c2 = arith.constant 2 : index
    %c0_16 = arith.constant 0 : index
    %c0_17 = arith.constant 0 : index
    %24 = vector.load %arg7[%c2, %c0_16, %c0_17] : memref<9x1x256xf32, #tpu.memory_space<vmem>>, vector<1x1x256xf32>
    %25 = vector.shape_cast %24 : vector<1x1x256xf32> to vector<1x256xf32>
    %26 = vector.broadcast %25 : vector<1x256xf32> to vector<4x256xf32>
    %27 = arith.mulf %22, %26 : vector<4x256xf32>
    %28 = vector.broadcast %25 : vector<1x256xf32> to vector<32x256xf32>
    %29 = arith.mulf %23, %28 : vector<32x256xf32>
    %c1_i32 = arith.constant 1 : i32
    %30 = tpu.dynamic_rotate %1 by %c1_i32 dim 1 : vector<4x256xf32>, i32 -> vector<4x256xf32>
    %c1_i32_18 = arith.constant 1 : i32
    %31 = tpu.dynamic_rotate %3 by %c1_i32_18 dim 1 : vector<32x256xf32>, i32 -> vector<32x256xf32>
    %c3 = arith.constant 3 : index
    %c0_19 = arith.constant 0 : index
    %c0_20 = arith.constant 0 : index
    %32 = vector.load %arg7[%c3, %c0_19, %c0_20] : memref<9x1x256xf32, #tpu.memory_space<vmem>>, vector<1x1x256xf32>
    %33 = vector.shape_cast %32 : vector<1x1x256xf32> to vector<1x256xf32>
    %34 = vector.broadcast %33 : vector<1x256xf32> to vector<4x256xf32>
    %35 = arith.mulf %30, %34 : vector<4x256xf32>
    %36 = vector.broadcast %33 : vector<1x256xf32> to vector<32x256xf32>
    %37 = arith.mulf %31, %36 : vector<32x256xf32>
    %c255_i32 = arith.constant 255 : i32
    %38 = tpu.dynamic_rotate %1 by %c255_i32 dim 1 : vector<4x256xf32>, i32 -> vector<4x256xf32>
    %c255_i32_21 = arith.constant 255 : i32
    %39 = tpu.dynamic_rotate %3 by %c255_i32_21 dim 1 : vector<32x256xf32>, i32 -> vector<32x256xf32>
    %c5 = arith.constant 5 : index
    %c0_22 = arith.constant 0 : index
    %c0_23 = arith.constant 0 : index
    %40 = vector.load %arg7[%c5, %c0_22, %c0_23] : memref<9x1x256xf32, #tpu.memory_space<vmem>>, vector<1x1x256xf32>
    %41 = vector.shape_cast %40 : vector<1x1x256xf32> to vector<1x256xf32>
    %42 = vector.broadcast %41 : vector<1x256xf32> to vector<4x256xf32>
    %43 = arith.mulf %38, %42 : vector<4x256xf32>
    %44 = vector.broadcast %41 : vector<1x256xf32> to vector<32x256xf32>
    %45 = arith.mulf %39, %44 : vector<32x256xf32>
    %c241_i32 = arith.constant 241 : i32
    %46 = tpu.dynamic_rotate %1 by %c241_i32 dim 1 : vector<4x256xf32>, i32 -> vector<4x256xf32>
    %c241_i32_24 = arith.constant 241 : i32
    %47 = tpu.dynamic_rotate %3 by %c241_i32_24 dim 1 : vector<32x256xf32>, i32 -> vector<32x256xf32>
    %c6 = arith.constant 6 : index
    %c0_25 = arith.constant 0 : index
    %c0_26 = arith.constant 0 : index
    %48 = vector.load %arg7[%c6, %c0_25, %c0_26] : memref<9x1x256xf32, #tpu.memory_space<vmem>>, vector<1x1x256xf32>
    %49 = vector.shape_cast %48 : vector<1x1x256xf32> to vector<1x256xf32>
    %50 = vector.broadcast %49 : vector<1x256xf32> to vector<4x256xf32>
    %51 = arith.mulf %46, %50 : vector<4x256xf32>
    %52 = vector.broadcast %49 : vector<1x256xf32> to vector<32x256xf32>
    %53 = arith.mulf %47, %52 : vector<32x256xf32>
    %c240_i32 = arith.constant 240 : i32
    %54 = tpu.dynamic_rotate %1 by %c240_i32 dim 1 : vector<4x256xf32>, i32 -> vector<4x256xf32>
    %c240_i32_27 = arith.constant 240 : i32
    %55 = tpu.dynamic_rotate %3 by %c240_i32_27 dim 1 : vector<32x256xf32>, i32 -> vector<32x256xf32>
    %c7 = arith.constant 7 : index
    %c0_28 = arith.constant 0 : index
    %c0_29 = arith.constant 0 : index
    %56 = vector.load %arg7[%c7, %c0_28, %c0_29] : memref<9x1x256xf32, #tpu.memory_space<vmem>>, vector<1x1x256xf32>
    %57 = vector.shape_cast %56 : vector<1x1x256xf32> to vector<1x256xf32>
    %58 = vector.broadcast %57 : vector<1x256xf32> to vector<4x256xf32>
    %59 = arith.mulf %54, %58 : vector<4x256xf32>
    %60 = vector.broadcast %57 : vector<1x256xf32> to vector<32x256xf32>
    %61 = arith.mulf %55, %60 : vector<32x256xf32>
    %c239_i32 = arith.constant 239 : i32
    %62 = tpu.dynamic_rotate %1 by %c239_i32 dim 1 : vector<4x256xf32>, i32 -> vector<4x256xf32>
    %c239_i32_30 = arith.constant 239 : i32
    %63 = tpu.dynamic_rotate %3 by %c239_i32_30 dim 1 : vector<32x256xf32>, i32 -> vector<32x256xf32>
    %c8 = arith.constant 8 : index
    %c0_31 = arith.constant 0 : index
    %c0_32 = arith.constant 0 : index
    %64 = vector.load %arg7[%c8, %c0_31, %c0_32] : memref<9x1x256xf32, #tpu.memory_space<vmem>>, vector<1x1x256xf32>
    %65 = vector.shape_cast %64 : vector<1x1x256xf32> to vector<1x256xf32>
    %66 = vector.broadcast %65 : vector<1x256xf32> to vector<4x256xf32>
    %67 = arith.mulf %62, %66 : vector<4x256xf32>
    %68 = vector.broadcast %65 : vector<1x256xf32> to vector<32x256xf32>
    %69 = arith.mulf %63, %68 : vector<32x256xf32>
    %70 = tpu.concatenate %13, %21, %29, %37, %3, %45, %53, %61, %69 in 0 : vector<32x256xf32>, vector<32x256xf32>, vector<32x256xf32>, vector<32x256xf32>, vector<32x256xf32>, vector<32x256xf32>, vector<32x256xf32>, vector<32x256xf32>, vector<32x256xf32> -> vector<288x256xf32>
    %c0_33 = arith.constant 0 : index
    %c0_34 = arith.constant 0 : index
    %71 = vector.load %arg5[%c0_33, %c0_34] : memref<128x288xf32, #tpu.memory_space<vmem>>, vector<128x288xf32>
    %cst = arith.constant dense<0.000000e+00> : vector<128x256xf32>
    %72 = tpu.matmul %71, %70, %cst {dimension_numbers = #tpu.dot_dimension_numbers<[1], [0], [0], [1], [0, 0, 1, 1], [], []>} : vector<128x288xf32>, vector<288x256xf32>, vector<128x256xf32> -> vector<128x256xf32>
    %c0_35 = arith.constant 0 : index
    %c0_36 = arith.constant 0 : index
    %c0_37 = arith.constant 0 : index
    %73 = vector.load %arg4[%c0_35, %c0_36, %c0_37] : memref<9x128x4xf32, #tpu.memory_space<vmem>>, vector<1x128x4xf32>
    %74 = vector.shape_cast %73 : vector<1x128x4xf32> to vector<128x4xf32>
    %cst_38 = arith.constant dense<0.000000e+00> : vector<128x256xf32>
    %75 = tpu.matmul %74, %11, %cst_38 {dimension_numbers = #tpu.dot_dimension_numbers<[1], [0], [0], [1], [0, 0, 1, 1], [], []>} : vector<128x4xf32>, vector<4x256xf32>, vector<128x256xf32> -> vector<128x256xf32>
    %76 = arith.addf %72, %75 : vector<128x256xf32>
    %c1_39 = arith.constant 1 : index
    %c0_40 = arith.constant 0 : index
    %c0_41 = arith.constant 0 : index
    %77 = vector.load %arg4[%c1_39, %c0_40, %c0_41] : memref<9x128x4xf32, #tpu.memory_space<vmem>>, vector<1x128x4xf32>
    %78 = vector.shape_cast %77 : vector<1x128x4xf32> to vector<128x4xf32>
    %cst_42 = arith.constant dense<0.000000e+00> : vector<128x256xf32>
    %79 = tpu.matmul %78, %19, %cst_42 {dimension_numbers = #tpu.dot_dimension_numbers<[1], [0], [0], [1], [0, 0, 1, 1], [], []>} : vector<128x4xf32>, vector<4x256xf32>, vector<128x256xf32> -> vector<128x256xf32>
    %80 = arith.addf %76, %79 : vector<128x256xf32>
    %c2_43 = arith.constant 2 : index
    %c0_44 = arith.constant 0 : index
    %c0_45 = arith.constant 0 : index
    %81 = vector.load %arg4[%c2_43, %c0_44, %c0_45] : memref<9x128x4xf32, #tpu.memory_space<vmem>>, vector<1x128x4xf32>
    %82 = vector.shape_cast %81 : vector<1x128x4xf32> to vector<128x4xf32>
    %cst_46 = arith.constant dense<0.000000e+00> : vector<128x256xf32>
    %83 = tpu.matmul %82, %27, %cst_46 {dimension_numbers = #tpu.dot_dimension_numbers<[1], [0], [0], [1], [0, 0, 1, 1], [], []>} : vector<128x4xf32>, vector<4x256xf32>, vector<128x256xf32> -> vector<128x256xf32>
    %84 = arith.addf %80, %83 : vector<128x256xf32>
    %c3_47 = arith.constant 3 : index
    %c0_48 = arith.constant 0 : index
    %c0_49 = arith.constant 0 : index
    %85 = vector.load %arg4[%c3_47, %c0_48, %c0_49] : memref<9x128x4xf32, #tpu.memory_space<vmem>>, vector<1x128x4xf32>
    %86 = vector.shape_cast %85 : vector<1x128x4xf32> to vector<128x4xf32>
    %cst_50 = arith.constant dense<0.000000e+00> : vector<128x256xf32>
    %87 = tpu.matmul %86, %35, %cst_50 {dimension_numbers = #tpu.dot_dimension_numbers<[1], [0], [0], [1], [0, 0, 1, 1], [], []>} : vector<128x4xf32>, vector<4x256xf32>, vector<128x256xf32> -> vector<128x256xf32>
    %88 = arith.addf %84, %87 : vector<128x256xf32>
    %c4 = arith.constant 4 : index
    %c0_51 = arith.constant 0 : index
    %c0_52 = arith.constant 0 : index
    %89 = vector.load %arg4[%c4, %c0_51, %c0_52] : memref<9x128x4xf32, #tpu.memory_space<vmem>>, vector<1x128x4xf32>
    %90 = vector.shape_cast %89 : vector<1x128x4xf32> to vector<128x4xf32>
    %cst_53 = arith.constant dense<0.000000e+00> : vector<128x256xf32>
    %91 = tpu.matmul %90, %1, %cst_53 {dimension_numbers = #tpu.dot_dimension_numbers<[1], [0], [0], [1], [0, 0, 1, 1], [], []>} : vector<128x4xf32>, vector<4x256xf32>, vector<128x256xf32> -> vector<128x256xf32>
    %92 = arith.addf %88, %91 : vector<128x256xf32>
    %c5_54 = arith.constant 5 : index
    %c0_55 = arith.constant 0 : index
    %c0_56 = arith.constant 0 : index
    %93 = vector.load %arg4[%c5_54, %c0_55, %c0_56] : memref<9x128x4xf32, #tpu.memory_space<vmem>>, vector<1x128x4xf32>
    %94 = vector.shape_cast %93 : vector<1x128x4xf32> to vector<128x4xf32>
    %cst_57 = arith.constant dense<0.000000e+00> : vector<128x256xf32>
    %95 = tpu.matmul %94, %43, %cst_57 {dimension_numbers = #tpu.dot_dimension_numbers<[1], [0], [0], [1], [0, 0, 1, 1], [], []>} : vector<128x4xf32>, vector<4x256xf32>, vector<128x256xf32> -> vector<128x256xf32>
    %96 = arith.addf %92, %95 : vector<128x256xf32>
    %c6_58 = arith.constant 6 : index
    %c0_59 = arith.constant 0 : index
    %c0_60 = arith.constant 0 : index
    %97 = vector.load %arg4[%c6_58, %c0_59, %c0_60] : memref<9x128x4xf32, #tpu.memory_space<vmem>>, vector<1x128x4xf32>
    %98 = vector.shape_cast %97 : vector<1x128x4xf32> to vector<128x4xf32>
    %cst_61 = arith.constant dense<0.000000e+00> : vector<128x256xf32>
    %99 = tpu.matmul %98, %51, %cst_61 {dimension_numbers = #tpu.dot_dimension_numbers<[1], [0], [0], [1], [0, 0, 1, 1], [], []>} : vector<128x4xf32>, vector<4x256xf32>, vector<128x256xf32> -> vector<128x256xf32>
    %100 = arith.addf %96, %99 : vector<128x256xf32>
    %c7_62 = arith.constant 7 : index
    %c0_63 = arith.constant 0 : index
    %c0_64 = arith.constant 0 : index
    %101 = vector.load %arg4[%c7_62, %c0_63, %c0_64] : memref<9x128x4xf32, #tpu.memory_space<vmem>>, vector<1x128x4xf32>
    %102 = vector.shape_cast %101 : vector<1x128x4xf32> to vector<128x4xf32>
    %cst_65 = arith.constant dense<0.000000e+00> : vector<128x256xf32>
    %103 = tpu.matmul %102, %59, %cst_65 {dimension_numbers = #tpu.dot_dimension_numbers<[1], [0], [0], [1], [0, 0, 1, 1], [], []>} : vector<128x4xf32>, vector<4x256xf32>, vector<128x256xf32> -> vector<128x256xf32>
    %104 = arith.addf %100, %103 : vector<128x256xf32>
    %c8_66 = arith.constant 8 : index
    %c0_67 = arith.constant 0 : index
    %c0_68 = arith.constant 0 : index
    %105 = vector.load %arg4[%c8_66, %c0_67, %c0_68] : memref<9x128x4xf32, #tpu.memory_space<vmem>>, vector<1x128x4xf32>
    %106 = vector.shape_cast %105 : vector<1x128x4xf32> to vector<128x4xf32>
    %cst_69 = arith.constant dense<0.000000e+00> : vector<128x256xf32>
    %107 = tpu.matmul %106, %67, %cst_69 {dimension_numbers = #tpu.dot_dimension_numbers<[1], [0], [0], [1], [0, 0, 1, 1], [], []>} : vector<128x4xf32>, vector<4x256xf32>, vector<128x256xf32> -> vector<128x256xf32>
    %108 = arith.addf %104, %107 : vector<128x256xf32>
    %c0_70 = arith.constant 0 : index
    %c0_71 = arith.constant 0 : index
    %109 = vector.load %arg6[%c0_70, %c0_71] : memref<128x1xf32, #tpu.memory_space<vmem>>, vector<128x1xf32>
    %110 = vector.broadcast %109 : vector<128x1xf32> to vector<128x256xf32>
    %111 = arith.addf %108, %110 : vector<128x256xf32>
    %112 = vector.extract_strided_slice %111 {offsets = [0, 0], sizes = [32, 256], strides = [1, 1]} : vector<128x256xf32> to vector<32x256xf32>
    %cst_72 = arith.constant 0.000000e+00 : f32
    %113 = vector.broadcast %cst_72 : f32 to vector<32x256xf32>
    %114 = arith.subf %113, %112 : vector<32x256xf32>
    %115 = math.exp %114 : vector<32x256xf32>
    %cst_73 = arith.constant 1.000000e+00 : f32
    %116 = vector.broadcast %cst_73 : f32 to vector<32x256xf32>
    %117 = arith.addf %116, %115 : vector<32x256xf32>
    %cst_74 = arith.constant 1.000000e+00 : f32
    %118 = vector.broadcast %cst_74 : f32 to vector<32x256xf32>
    %119 = arith.divf %118, %117 : vector<32x256xf32>
    %120 = vector.extract_strided_slice %111 {offsets = [32, 0], sizes = [32, 256], strides = [1, 1]} : vector<128x256xf32> to vector<32x256xf32>
    %cst_75 = arith.constant 0.000000e+00 : f32
    %121 = vector.broadcast %cst_75 : f32 to vector<32x256xf32>
    %122 = arith.subf %121, %120 : vector<32x256xf32>
    %123 = math.exp %122 : vector<32x256xf32>
    %cst_76 = arith.constant 1.000000e+00 : f32
    %124 = vector.broadcast %cst_76 : f32 to vector<32x256xf32>
    %125 = arith.addf %124, %123 : vector<32x256xf32>
    %cst_77 = arith.constant 1.000000e+00 : f32
    %126 = vector.broadcast %cst_77 : f32 to vector<32x256xf32>
    %127 = arith.divf %126, %125 : vector<32x256xf32>
    %128 = vector.extract_strided_slice %111 {offsets = [64, 0], sizes = [32, 256], strides = [1, 1]} : vector<128x256xf32> to vector<32x256xf32>
    %cst_78 = arith.constant 0.000000e+00 : f32
    %129 = vector.broadcast %cst_78 : f32 to vector<32x256xf32>
    %130 = arith.subf %129, %128 : vector<32x256xf32>
    %131 = math.exp %130 : vector<32x256xf32>
    %cst_79 = arith.constant 1.000000e+00 : f32
    %132 = vector.broadcast %cst_79 : f32 to vector<32x256xf32>
    %133 = arith.addf %132, %131 : vector<32x256xf32>
    %cst_80 = arith.constant 1.000000e+00 : f32
    %134 = vector.broadcast %cst_80 : f32 to vector<32x256xf32>
    %135 = arith.divf %134, %133 : vector<32x256xf32>
    %136 = vector.extract_strided_slice %111 {offsets = [96, 0], sizes = [32, 256], strides = [1, 1]} : vector<128x256xf32> to vector<32x256xf32>
    %137 = math.tanh %136 : vector<32x256xf32>
    %138 = arith.mulf %127, %5 : vector<32x256xf32>
    %139 = arith.mulf %119, %137 : vector<32x256xf32>
    %140 = arith.addf %138, %139 : vector<32x256xf32>
    %141 = math.tanh %140 : vector<32x256xf32>
    %142 = arith.mulf %135, %141 : vector<32x256xf32>
    %c0_81 = arith.constant 0 : index
    %c0_82 = arith.constant 0 : index
    %c0_83 = arith.constant 0 : index
    %143 = vector.load %arg8[%c0_81, %c0_82, %c0_83] : memref<1x32x256xf32, #tpu.memory_space<vmem>>, vector<1x32x256xf32>
    %144 = vector.shape_cast %143 : vector<1x32x256xf32> to vector<32x256xf32>
    %145 = vector.shape_cast %142 : vector<32x256xf32> to vector<1x32x256xf32>
    tpu.vector_store %arg8[%c0_81, %c0_82, %c0_83], %145 {strides = array<i32>} : memref<1x32x256xf32, #tpu.memory_space<vmem>>, vector<1x32x256xf32>,
    %c0_84 = arith.constant 0 : index
    %c0_85 = arith.constant 0 : index
    %c0_86 = arith.constant 0 : index
    %146 = vector.load %arg9[%c0_84, %c0_85, %c0_86] : memref<1x32x256xf32, #tpu.memory_space<vmem>>, vector<1x32x256xf32>
    %147 = vector.shape_cast %146 : vector<1x32x256xf32> to vector<32x256xf32>
    %148 = vector.shape_cast %140 : vector<32x256xf32> to vector<1x32x256xf32>
    tpu.vector_store %arg9[%c0_84, %c0_85, %c0_86], %148 {strides = array<i32>} : memref<1x32x256xf32, #tpu.memory_space<vmem>>, vector<1x32x256xf32>,
    return
  }
  func.func @transform_0(%arg0: i32) -> (i32, i32, i32) {
    %c0_i32 = arith.constant 0 : i32
    %c0_i32_0 = arith.constant 0 : i32
    %c0_i32_1 = arith.constant 0 : i32
    return %arg0, %c0_i32, %c0_i32_0 : i32, i32, i32
  }
  func.func @transform_1(%arg0: i32) -> (i32, i32, i32) {
    %c0_i32 = arith.constant 0 : i32
    %c0_i32_0 = arith.constant 0 : i32
    %c0_i32_1 = arith.constant 0 : i32
    return %arg0, %c0_i32, %c0_i32_0 : i32, i32, i32
  }
  func.func @transform_2(%arg0: i32) -> (i32, i32, i32) {
    %c0_i32 = arith.constant 0 : i32
    %c0_i32_0 = arith.constant 0 : i32
    %c0_i32_1 = arith.constant 0 : i32
    return %arg0, %c0_i32, %c0_i32_0 : i32, i32, i32
  }
  func.func @transform_3(%arg0: i32) -> (i32, i32, i32) {
    %c0_i32 = arith.constant 0 : i32
    %c0_i32_0 = arith.constant 0 : i32
    %c0_i32_1 = arith.constant 0 : i32
    %c0_i32_2 = arith.constant 0 : i32
    return %c0_i32, %c0_i32_0, %c0_i32_1 : i32, i32, i32
  }
  func.func @transform_4(%arg0: i32) -> (i32, i32) {
    %c0_i32 = arith.constant 0 : i32
    %c0_i32_0 = arith.constant 0 : i32
    %c0_i32_1 = arith.constant 0 : i32
    return %c0_i32, %c0_i32_0 : i32, i32
  }
  func.func @transform_5(%arg0: i32) -> (i32, i32) {
    %c0_i32 = arith.constant 0 : i32
    %c0_i32_0 = arith.constant 0 : i32
    %c0_i32_1 = arith.constant 0 : i32
    return %c0_i32, %c0_i32_0 : i32, i32
  }
  func.func @transform_6(%arg0: i32) -> (i32, i32, i32) {
    %c0_i32 = arith.constant 0 : i32
    %c0_i32_0 = arith.constant 0 : i32
    %c0_i32_1 = arith.constant 0 : i32
    %c0_i32_2 = arith.constant 0 : i32
    return %c0_i32, %c0_i32_0, %c0_i32_1 : i32, i32, i32
  }
  func.func @transform_7(%arg0: i32) -> (i32, i32, i32) {
    %c0_i32 = arith.constant 0 : i32
    %c0_i32_0 = arith.constant 0 : i32
    %c0_i32_1 = arith.constant 0 : i32
    return %arg0, %c0_i32, %c0_i32_0 : i32, i32, i32
  }
  func.func @transform_8(%arg0: i32) -> (i32, i32, i32) {
    %c0_i32 = arith.constant 0 : i32
    %c0_i32_0 = arith.constant 0 : i32
    %c0_i32_1 = arith.constant 0 : i32
    return %arg0, %c0_i32, %c0_i32_0 : i32, i32, i32
  }
}

</mosaic_0001>

<bundles_post_ra>
// kernel: _convlstm2d_impl.1
= control target key start
LH: loop header
LB: loop body
LE: loop exit
PB: predicated region body
PF: predicated region fallthrough
CT: control target
= control target key end

     0   :  { %s4570_s27 = smov 0   ;;  %s6707_s0 = inlined_call_operand.vmem [shape: f32[2,4,256], index: 0, kind: input, shape index: {}]   ;;  %s6708_s1 = inlined_call_operand.vmem [shape: f32[2,32,256], index: 1, kind: input, shape index: {}]   ;;  %s6709_s2 = inlined_call_operand.vmem [shape: f32[2,32,256], index: 2, kind: input, shape index: {}]   ;;  %s6710_s3 = inlined_call_operand.vmem [shape: f32[9,128,4], index: 3, kind: input, shape index: {}]   ;;  %s6711_s4 = inlined_call_operand.vmem [shape: f32[128,288], index: 4, kind: input, shape index: {}]   ;;  %s6712_s5 = inlined_call_operand.vmem [shape: f32[128,1], index: 5, kind: input, shape index: {}]   ;;  %s6713_s6 = inlined_call_operand.vmem [shape: f32[9,1,256], index: 6, kind: input, shape index: {}]   ;;  %s6714_s7 = inlined_call_operand.vmem [shape: f32[2,32,256], index: 7, kind: output, shape index: {0}]   ;;  %s6715_s8 = inlined_call_operand.vmem [shape: f32[2,32,256], index: 8, kind: output, shape index: {1}]  }
   0x1 LB: > { %s4022_s28 = sadd.s32 4294967295, %s4513_s27   ;;  %p4026_p0 = scmp.ge.s32.totalorder %s4513_s27, 1  ;;  %s4513_s27 = sphi %s4570_s27, %s19_s27  }
   0x2   : > { %p285_p1 = scmp.lt.s32.totalorder %s4513_s27, 3 }
   0x4   : > { %p286_p2 = pnand %p4026_p0, %p285_p1 }
   0x6   : > { %289 = sbr.rel (%p286_p2) target bundleno = 819 (0x333), region = 48 }
   0xb   : > { %p334_p3 = scmp.lt.s32.totalorder %s4022_s28, 1  ;;  %s4515_s15 = smov 1   ;;  %v4519_v10 = vmov 0.0   ;;  %v383_v11 = vlaneseq  ;;  %v813_v13 = vld [vmem:[%s6711_s4 + $0x8] sm:$0xff]  ;;  %v4039_v17 = vld [vmem:[%s6713_s6 + $0x6] sm:$0x3] }
   0xc   : > { %s4516_s16 = smov 17   ;;  %s4517_s17 = smov 15   ;;  %996 = vmatprep.mubr.f32.mxu0 %v4519_v10  ;;  %1206 = vmatprep.mubr.f32.mxu1 %v813_v13  ;;  %v412_v23 = vld [vmem:[%s6713_s6] sm:$0x3]  ;;  %vm925_vm2 = vcmask 1043456   ;;  %vm876_vm3 = vcmask 31744  }
   0xd   : > { %s6733_s28 = smov (!%p334_p3, %s4022_s28), 1  ;;  %s4518_s18 = smov 16   ;;  %v415_v12 = vshrl.u32 %v383_v11, 7  ;;  %v4730_v14 = vand.u32 127, %v383_v11  ;;  %v860_v42 = vld [vmem:[%s6710_s3] sm:$0xff]  ;;  %v861_v50 = vld [vmem:[%s6710_s3 + $0x8] sm:$0xff] }
   0xe   : > { %s4578_s29 = sshll.u32 %s6733_s28, 6  ;;  %s4352_s30 = sshll.u32 %s6733_s28, 3  ;;  %v4038_v48 = vld [vmem:[%s6713_s6 + $0x4] sm:$0x3]  ;;  %v862_v59 = vld [vmem:[%s6710_s3 + $0x10] sm:$0xff]  ;;  %v863_v13 = vld [vmem:[%s6710_s3 + $0x18] sm:$0xff] }
   0xf   : > { %s343_s11 = scalar_lea.vmem %s6708_s1, %s4578_s29  ;;  %s4589_s14 = scalar_lea.vmem %s6707_s0, %s4352_s30  ;;  %v4732_v15 = vsub.s32 0, %v415_v12  ;;  %v4734_v16 = vsub.s32 1, %v415_v12  ;;  %vm546_vm0 = vcmp.lt.s32.totalorder %v4730_v14, 1  ;;  %vm385_vm1 = vcmp.lt.s32.totalorder %v4730_v14, 17 }
  0x10   : > { %v4584_v0 = vld [vmem:[%s343_s11 + $0x30] sm:$0xff]  ;;  %v4594_v1 = vld [vmem:[%s4589_s14] sm:$0xff]  ;;  %v4598_v2 = vld [vmem:[%s343_s11 + $0x38] sm:$0xff]  ;;  %s4520_s19 = smov 112   ;;  %s4521_s20 = smov 113   ;;  %vm492_vm4 = vcmp.lt.s32.totalorder %v4730_v14, 15 }
  0x11   : > { %555 = vrot.lane.b32.xlu1 %v4584_v0, %s4515_s15  ;;  %379 = vrot.lane.b32.xlu0 %v4594_v1, %s4516_s16  ;;  %v4600_v3 = vld [vmem:[%s343_s11 + $0x20] sm:$0xff]  ;;  %v4606_v4 = vld [vmem:[%s343_s11 + $0x28] sm:$0xff]  ;;  %v4610_v5 = vcombine.high %v4594_v1, %v4594_v1  ;;  %s4522_s21 = smov 127   ;;  %s4523_s26 = smov 111   ;;  %v4745_v20 = vrot.slane %v4039_v17, %v4732_v15  ;;  %v4748_v21 = vrot.slane %v4039_v17, %v4734_v16  ;;  %vm438_vm5 = vcmp.lt.s32.totalorder %v4730_v14, 16 }
  0x12   : > { %v4616_v6 = vld [vmem:[%s343_s11 + $0x18] sm:$0xff]  ;;  %v4618_v7 = vld [vmem:[%s343_s11 + $0x10] sm:$0xff]  ;;  %v4624_v8 = vld [vmem:[%s343_s11 + $0x8] sm:$0xff]  ;;  %v4767_v29 = vrot.slane %v412_v23, %v4732_v15  ;;  %v4770_v30 = vrot.slane %v412_v23, %v4734_v16  ;;  %v4816_v54 = vrot.slane %v4038_v48, %v4732_v15  ;;  %v4824_v57 = vrot.slane %v4038_v48, %v4734_v16  ;;  %s6658_s9 = scalar_lea.vmem %s6709_s2, %s4578_s29 }
  0x13   : > { %v4626_v9 = vld [vmem:[%s343_s11] sm:$0xff]  ;;  %vm708_vm6 = vcmp.lt.s32.totalorder %v4730_v14, 112  ;;  %vm654_vm7 = vcmp.lt.s32.totalorder %v4730_v14, 113  ;;  %vm600_vm8 = vcmp.lt.s32.totalorder %v4730_v14, 127  ;;  %vm762_vm9 = vcmp.lt.s32.totalorder %v4730_v14, 111 }
  0x14   : > { %vm1093_vm10 = vcmask 261120  }
  0x15   : > { %563 = vrot.lane.b32.xlu1 %v4598_v2, %s4515_s15  ;;  %553 = vrot.lane.b32.xlu0 %v4600_v3, %s4515_s15 }
  0x19   : > { %561 = vrot.lane.b32.xlu1 %v4606_v4, %s4515_s15  ;;  %381 = vrot.lane.b32.xlu0 %v4610_v5, %s4516_s16 }
  0x1d   : > { %559 = vrot.lane.b32.xlu1 %v4616_v6, %s4515_s15  ;;  %551 = vrot.lane.b32.xlu0 %v4618_v7, %s4515_s15 }
  0x21   : > { %557 = vrot.lane.b32.xlu1 %v4624_v8, %s4515_s15  ;;  %549 = vrot.lane.b32.xlu0 %v4626_v9, %s4515_s15 }
  0x25   : > { %509 = vrot.lane.b32.xlu1 %v4598_v2, %s4517_s17  ;;  %501 = vrot.lane.b32.xlu0 %v4584_v0, %s4517_s17 }
  0x29   : > { %507 = vrot.lane.b32.xlu1 %v4606_v4, %s4517_s17  ;;  %499 = vrot.lane.b32.xlu0 %v4600_v3, %s4517_s17 }
  0x2d   : > { %505 = vrot.lane.b32.xlu1 %v4616_v6, %s4517_s17  ;;  %497 = vrot.lane.b32.xlu0 %v4618_v7, %s4517_s17 }
  0x31   : > { %503 = vrot.lane.b32.xlu1 %v4624_v8, %s4517_s17  ;;  %495 = vrot.lane.b32.xlu0 %v4626_v9, %s4517_s17 }
  0x35   : > { %455 = vrot.lane.b32.xlu1 %v4598_v2, %s4518_s18  ;;  %447 = vrot.lane.b32.xlu0 %v4584_v0, %s4518_s18 }
  0x39   : > { %453 = vrot.lane.b32.xlu1 %v4606_v4, %s4518_s18  ;;  %445 = vrot.lane.b32.xlu0 %v4600_v3, %s4518_s18 }
  0x3d   : > { %451 = vrot.lane.b32.xlu1 %v4616_v6, %s4518_s18  ;;  %443 = vrot.lane.b32.xlu0 %v4618_v7, %s4518_s18 }
  0x41   : > { %449 = vrot.lane.b32.xlu1 %v4624_v8, %s4518_s18  ;;  %441 = vrot.lane.b32.xlu0 %v4626_v9, %s4518_s18 }
  0x45   : > { %402 = vrot.lane.b32.xlu1 %v4598_v2, %s4516_s16  ;;  %394 = vrot.lane.b32.xlu0 %v4584_v0, %s4516_s16 }
  0x49   : > { %400 = vrot.lane.b32.xlu1 %v4606_v4, %s4516_s16  ;;  %392 = vrot.lane.b32.xlu0 %v4600_v3, %s4516_s16 }
  0x4d   : > { %398 = vrot.lane.b32.xlu1 %v4616_v6, %s4516_s16  ;;  %390 = vrot.lane.b32.xlu0 %v4618_v7, %s4516_s16 }
  0x51   : > { %396 = vrot.lane.b32.xlu1 %v4624_v8, %s4516_s16  ;;  %388 = vrot.lane.b32.xlu0 %v4626_v9, %s4516_s16 }
  0x55   : > { %725 = vrot.lane.b32.xlu1 %v4598_v2, %s4520_s19  ;;  %717 = vrot.lane.b32.xlu0 %v4584_v0, %s4520_s19 }
  0x59   : > { %723 = vrot.lane.b32.xlu1 %v4606_v4, %s4520_s19  ;;  %715 = vrot.lane.b32.xlu0 %v4600_v3, %s4520_s19 }
  0x5d   : > { %721 = vrot.lane.b32.xlu1 %v4616_v6, %s4520_s19  ;;  %713 = vrot.lane.b32.xlu0 %v4618_v7, %s4520_s19 }
  0x61   : > { %719 = vrot.lane.b32.xlu1 %v4624_v8, %s4520_s19  ;;  %711 = vrot.lane.b32.xlu0 %v4626_v9, %s4520_s19 }
  0x65   : > { %671 = vrot.lane.b32.xlu1 %v4598_v2, %s4521_s20  ;;  %663 = vrot.lane.b32.xlu0 %v4584_v0, %s4521_s20 }
  0x69   : > { %669 = vrot.lane.b32.xlu1 %v4606_v4, %s4521_s20  ;;  %661 = vrot.lane.b32.xlu0 %v4600_v3, %s4521_s20 }
  0x6d   : > { %667 = vrot.lane.b32.xlu1 %v4616_v6, %s4521_s20  ;;  %659 = vrot.lane.b32.xlu0 %v4618_v7, %s4521_s20 }
  0x71   : > { %665 = vrot.lane.b32.xlu1 %v4624_v8, %s4521_s20  ;;  %657 = vrot.lane.b32.xlu0 %v4626_v9, %s4521_s20 }
  0x75   : > { %617 = vrot.lane.b32.xlu1 %v4598_v2, %s4522_s21  ;;  %609 = vrot.lane.b32.xlu0 %v4584_v0, %s4522_s21 }
  0x79   : > { %615 = vrot.lane.b32.xlu1 %v4606_v4, %s4522_s21  ;;  %607 = vrot.lane.b32.xlu0 %v4600_v3, %s4522_s21 }
  0x7d   : > { %613 = vrot.lane.b32.xlu1 %v4616_v6, %s4522_s21  ;;  %605 = vrot.lane.b32.xlu0 %v4618_v7, %s4522_s21 }
  0x81   : > { %611 = vrot.lane.b32.xlu1 %v4624_v8, %s4522_s21  ;;  %603 = vrot.lane.b32.xlu0 %v4626_v9, %s4522_s21 }
  0x83   : > { %v556_v18 = vpop.permute.xlu1 %555  ;;  %v380_v19 = vpop.permute.xlu0 %379 }
  0x85   : > { %779 = vrot.lane.b32.xlu1 %v4598_v2, %s4523_s26  ;;  %771 = vrot.lane.b32.xlu0 %v4584_v0, %s4523_s26 }
  0x87   : > { %v564_v22 = vpop.permute.xlu1 %563  ;;  %v554_v25 = vpop.permute.xlu0 %553 }
  0x88   : > { %v572_v24 = vsel %vm546_vm0, %v564_v22, %v556_v18  ;;  %v568_v26 = vsel %vm546_vm0, %v556_v18, %v564_v22 }
  0x89   : > { %777 = vrot.lane.b32.xlu1 %v4606_v4, %s4523_s26  ;;  %v595_v27 = vmul.f32 %v4748_v21, %v568_v26  ;;  %v594_v28 = vmul.f32 %v4745_v20, %v572_v24  ;;  %769 = vrot.lane.b32.xlu0 %v4600_v3, %s4523_s26 }
  0x8b   : > { %1142 = vmatprep.subr.mxu1 %v595_v27  ;;  %v562_v31 = vpop.permute.xlu1 %561  ;;  %v382_v34 = vpop.permute.xlu0 %381 }
  0x8c   : > { %v567_v32 = vsel %vm546_vm0, %v554_v25, %v562_v31  ;;  %v571_v33 = vsel %vm546_vm0, %v562_v31, %v554_v25  ;;  %1143 = vmatpush1.msra.mxu1 %v594_v28  ;;  %v386_v37 = vsel %vm385_vm1, %v380_v19, %v382_v34  ;;  %v387_v38 = vsel %vm385_vm1, %v382_v34, %v380_v19  ;;  %v864_v25 = vld [vmem:[%s6710_s3 + $0x20] sm:$0xff] }
  0x8d   : > { %v592_v35 = vmul.f32 %v4745_v20, %v571_v33  ;;  %v593_v36 = vmul.f32 %v4748_v21, %v567_v32  ;;  %775 = vrot.lane.b32.xlu1 %v4616_v6, %s4523_s26  ;;  %v424_v39 = vmul.f32 %v4767_v29, %v387_v38  ;;  %767 = vrot.lane.b32.xlu0 %v4618_v7, %s4523_s26  ;;  %v4037_v33 = vld [vmem:[%s6713_s6 + $0x2] sm:$0x3] }
  0x8e   : > { %v425_v40 = vmul.f32 %v4770_v30, %v386_v37 }
  0x8f   : > { %v560_v41 = vpop.permute.xlu1 %559  ;;  %1144 = vmatprep.subr.mxu1 %v593_v36  ;;  %v552_v43 = vpop.permute.xlu0 %551 }
  0x90   : > { %4044 = vmatprep.subr.msk.mxu0 %vm925_vm2, %v425_v40  ;;  %1145 = vmatpush1.msra.mxu1 %v592_v35  ;;  %v566_v44 = vsel %vm546_vm0, %v552_v43, %v560_v41  ;;  %v570_v45 = vsel %vm546_vm0, %v560_v41, %v552_v43  ;;  %v865_v35 = vld [vmem:[%s6710_s3 + $0x28] sm:$0xff] }
  0x91   : > { %4045 = vmatpush1.msk.msra.mxu0 %vm925_vm2, %v424_v39  ;;  %773 = vrot.lane.b32.xlu1 %v4624_v8, %s4523_s26  ;;  %v590_v46 = vmul.f32 %v4745_v20, %v570_v45  ;;  %v591_v47 = vmul.f32 %v4748_v21, %v566_v44  ;;  %v4886_v39 = vrot.slane %v4037_v33, %v4732_v15  ;;  %v866_v44 = vld [vmem:[%s6710_s3 + $0x30] sm:$0xff] }
  0x92   : > { %765 = vrot.lane.b32.xlu0 %v4626_v9, %s4523_s26  ;;  %4046 = vmatmul.mubr.msk.f32.vlgmr.msra.gmra.mxu0 %vm876_vm3, %v860_v42  ;;  %v4894_v42 = vrot.slane %v4037_v33, %v4734_v16 }
  0x93   : > { %v558_v49 = vpop.permute.xlu1 %557  ;;  %1002 = vmatprep.mubr.f32.mxu0 %v4519_v10  ;;  %1146 = vmatprep.subr.mxu1 %v591_v47  ;;  %v550_v51 = vpop.permute.xlu0 %549 }
  0x94   : > { %v565_v52 = vsel %vm546_vm0, %v550_v51, %v558_v49  ;;  %v569_v53 = vsel %vm546_vm0, %v558_v49, %v550_v51  ;;  %1147 = vmatpush1.msra.mxu1 %v590_v46  ;;  %v867_v51 = vld [vmem:[%s6710_s3 + $0x38] sm:$0xff] }
  0x95   : > { %436 = vrot.lane.b32.xlu1 %v4610_v5, %s4518_s18  ;;  %v588_v55 = vmul.f32 %v4745_v20, %v569_v53  ;;  %v589_v56 = vmul.f32 %v4748_v21, %v565_v52 }
  0x96   : > { %434 = vrot.lane.b32.xlu0 %v4594_v1, %s4518_s18  ;;  %4047 = vmatmul.mubr.msk.f32.gmra.mxu0 %vm876_vm3, %v861_v50 }
  0x97   : > { %v510_v58 = vpop.permute.xlu1 %509  ;;  %1008 = vmatprep.mubr.f32.mxu0 %v4519_v10  ;;  %1148 = vmatprep.subr.mxu1 %v589_v56  ;;  %v502_v60 = vpop.permute.xlu0 %501 }
  0x98   : > { %v514_v61 = vsel %vm492_vm4, %v502_v60, %v510_v58  ;;  %v518_v62 = vsel %vm492_vm4, %v510_v58, %v502_v60  ;;  %1149 = vmatpush1.msra.mxu1 %v588_v55  ;;  %v868_v60 = vld [vmem:[%s6710_s3 + $0x40] sm:$0xff] }
  0x99   : > { %490 = vrot.lane.b32.xlu1 %v4610_v5, %s4517_s17  ;;  %v540_v63 = vmul.f32 %v4816_v54, %v518_v62  ;;  %v541_v11 = vmul.f32 %v4824_v57, %v514_v61 }
  0x9a   : > { %488 = vrot.lane.b32.xlu0 %v4594_v1, %s4517_s17  ;;  %4048 = vmatmul.mubr.msk.f32.gmra.mxu0 %vm876_vm3, %v862_v59 }
  0x9b   : > { %v508_v12 = vpop.permute.xlu1 %507  ;;  %1014 = vmatprep.mubr.f32.mxu0 %v4519_v10  ;;  %1150 = vmatprep.subr.mxu1 %v541_v11  ;;  %v500_v17 = vpop.permute.xlu0 %499 }
  0x9c   : > { %v513_v18 = vsel %vm492_vm4, %v500_v17, %v508_v12  ;;  %v517_v19 = vsel %vm492_vm4, %v508_v12, %v500_v17  ;;  %1151 = vmatpush1.msra.mxu1 %v540_v63 }
  0x9d   : > { %544 = vrot.lane.b32.xlu1 %v4610_v5, %s4515_s15  ;;  %v538_v22 = vmul.f32 %v4816_v54, %v517_v19  ;;  %v539_v23 = vmul.f32 %v4824_v57, %v513_v18 }
  0x9e   : > { %4049 = vmatmul.mubr.msk.f32.gmra.mxu0 %vm876_vm3, %v863_v13  ;;  %542 = vrot.lane.b32.xlu0 %v4594_v1, %s4515_s15  ;;  %v869_v13 = vld [vmem:[%s6710_s3 + $0x48] sm:$0xff] }
  0x9f   : > { %v506_v24 = vpop.permute.xlu1 %505  ;;  %1020 = vmatprep.mubr.f32.mxu0 %v4519_v10  ;;  %1152 = vmatprep.subr.mxu1 %v539_v23  ;;  %v498_v26 = vpop.permute.xlu0 %497 }
  0xa0   : > { %v512_v27 = vsel %vm492_vm4, %v498_v26, %v506_v24  ;;  %v516_v28 = vsel %vm492_vm4, %v506_v24, %v498_v26  ;;  %1153 = vmatpush1.msra.mxu1 %v538_v22 }
  0xa1   : > { %598 = vrot.lane.b32.xlu1 %v4610_v5, %s4522_s21  ;;  %v536_v31 = vmul.f32 %v4816_v54, %v516_v28  ;;  %v537_v32 = vmul.f32 %v4824_v57, %v512_v27 }
  0xa2   : > { %4050 = vmatmul.mubr.msk.f32.gmra.mxu0 %vm876_vm3, %v864_v25  ;;  %596 = vrot.lane.b32.xlu0 %v4594_v1, %s4522_s21  ;;  %v870_v25 = vld [vmem:[%s6710_s3 + $0x50] sm:$0xff] }
  0xa3   : > { %v504_v34 = vpop.permute.xlu1 %503  ;;  %1026 = vmatprep.mubr.f32.mxu0 %v4519_v10  ;;  %1154 = vmatprep.subr.mxu1 %v537_v32  ;;  %v496_v36 = vpop.permute.xlu0 %495 }
  0xa4   : > { %v511_v37 = vsel %vm492_vm4, %v496_v36, %v504_v34  ;;  %v515_v38 = vsel %vm492_vm4, %v504_v34, %v496_v36  ;;  %1155 = vmatpush1.msra.mxu1 %v536_v31  ;;  %v871_v34 = vld [vmem:[%s6710_s3 + $0x58] sm:$0xff] }
  0xa5   : > { %652 = vrot.lane.b32.xlu1 %v4610_v5, %s4521_s20  ;;  %v534_v40 = vmul.f32 %v4816_v54, %v515_v38  ;;  %v535_v41 = vmul.f32 %v4824_v57, %v511_v37 }
  0xa6   : > { %4051 = vmatmul.mubr.msk.f32.gmra.mxu0 %vm876_vm3, %v865_v35  ;;  %650 = vrot.lane.b32.xlu0 %v4594_v1, %s4521_s20  ;;  %s6668_s20 = scalar_lea.vmem %s6715_s8, %s4578_s29 }
  0xa7   : > { %v456_v43 = vpop.permute.xlu1 %455  ;;  %1032 = vmatprep.mubr.f32.mxu0 %v4519_v10  ;;  %1156 = vmatprep.subr.mxu1 %v535_v41  ;;  %v448_v45 = vpop.permute.xlu0 %447 }
  0xa8   : > { %v460_v46 = vsel %vm438_vm5, %v448_v45, %v456_v43  ;;  %v464_v47 = vsel %vm438_vm5, %v456_v43, %v448_v45  ;;  %1157 = vmatpush1.msra.mxu1 %v534_v40  ;;  %v872_v43 = vld [vmem:[%s6710_s3 + $0x60] sm:$0xff] }
  0xa9   : > { %706 = vrot.lane.b32.xlu1 %v4610_v5, %s4520_s19  ;;  %v486_v48 = vmul.f32 %v4886_v39, %v464_v47  ;;  %v487_v49 = vmul.f32 %v4894_v42, %v460_v46 }
  0xaa   : > { %4052 = vmatmul.mubr.msk.f32.gmra.mxu0 %vm876_vm3, %v866_v44  ;;  %704 = vrot.lane.b32.xlu0 %v4594_v1, %s4520_s19 }
  0xab   : > { %v454_v50 = vpop.permute.xlu1 %453  ;;  %1038 = vmatprep.mubr.f32.mxu0 %v4519_v10  ;;  %1158 = vmatprep.subr.mxu1 %v487_v49  ;;  %v446_v52 = vpop.permute.xlu0 %445 }
  0xac   : > { %v459_v53 = vsel %vm438_vm5, %v446_v52, %v454_v50  ;;  %v463_v55 = vsel %vm438_vm5, %v454_v50, %v446_v52  ;;  %1159 = vmatpush1.msra.mxu1 %v486_v48  ;;  %v4042_v50 = vld [vmem:[%s6713_s6 + $0xe] sm:$0x3] }
  0xad   : > { %760 = vrot.lane.b32.xlu1 %v4610_v5, %s4523_s26  ;;  %v484_v56 = vmul.f32 %v4886_v39, %v463_v55  ;;  %v485_v58 = vmul.f32 %v4894_v42, %v459_v53 }
  0xae   : > { %4053 = vmatmul.mubr.msk.f32.gmra.mxu0 %vm876_vm3, %v867_v51  ;;  %758 = vrot.lane.b32.xlu0 %v4594_v1, %s4523_s26  ;;  %v873_v51 = vld [vmem:[%s6710_s3 + $0x68] sm:$0xff] }
  0xaf   : > { %v452_v59 = vpop.permute.xlu1 %451  ;;  %1044 = vmatprep.mubr.f32.mxu0 %v4519_v10  ;;  %1160 = vmatprep.subr.mxu1 %v485_v58  ;;  %v444_v61 = vpop.permute.xlu0 %443 }
  0xb0   : > { %v458_v62 = vsel %vm438_vm5, %v444_v61, %v452_v59  ;;  %v462_v63 = vsel %vm438_vm5, %v452_v59, %v444_v61  ;;  %1161 = vmatpush1.msra.mxu1 %v484_v56  ;;  %v4999_v59 = vrot.slane %v4042_v50, %v4732_v15 }
  0xb1   : > { %v482_v11 = vmul.f32 %v4886_v39, %v462_v63  ;;  %v483_v1 = vmul.f32 %v4894_v42, %v458_v62  ;;  %v874_v62 = vld [vmem:[%s6710_s3 + $0x70] sm:$0xff] }
  0xb2   : > { %4054 = vmatmul.mubr.msk.f32.gmra.mxu0 %vm876_vm3, %v868_v60  ;;  %v5002_v60 = vrot.slane %v4042_v50, %v4734_v16 }
  0xb3   : > { %v450_v12 = vpop.permute.xlu1 %449  ;;  %1050 = vmatprep.mubr.f32.mxu0 %v4519_v10  ;;  %1162 = vmatprep.subr.mxu1 %v483_v1  ;;  %v442_v17 = vpop.permute.xlu0 %441 }
  0xb4   : > { %v457_v18 = vsel %vm438_vm5, %v442_v17, %v450_v12  ;;  %v461_v19 = vsel %vm438_vm5, %v450_v12, %v442_v17  ;;  %1163 = vmatpush1.msra.mxu1 %v482_v11 }
  0xb5   : > { %v480_v22 = vmul.f32 %v4886_v39, %v461_v19  ;;  %v481_v23 = vmul.f32 %v4894_v42, %v457_v18 }
  0xb6   : > { %4055 = vmatmul.mubr.msk.f32.gmra.mxu0 %vm876_vm3, %v869_v13  ;;  %v875_v13 = vld [vmem:[%s6710_s3 + $0x78] sm:$0xff] }
  0xb7   : > { %v403_v24 = vpop.permute.xlu1 %402  ;;  %1056 = vmatprep.mubr.f32.mxu0 %v4519_v10  ;;  %1164 = vmatprep.subr.mxu1 %v481_v23  ;;  %v395_v26 = vpop.permute.xlu0 %394 }
  0xb8   : > { %v407_v27 = vsel %vm385_vm1, %v395_v26, %v403_v24  ;;  %v411_v28 = vsel %vm385_vm1, %v403_v24, %v395_v26  ;;  %1165 = vmatpush1.msra.mxu1 %v480_v22 }
  0xb9   : > { %v432_v31 = vmul.f32 %v4767_v29, %v411_v28  ;;  %v433_v32 = vmul.f32 %v4770_v30, %v407_v27 }
  0xba   : > { %4056 = vmatmul.mubr.msk.f32.gmra.mxu0 %vm876_vm3, %v870_v25 }
  0xbb   : > { %v401_v33 = vpop.permute.xlu1 %400  ;;  %1062 = vmatprep.mubr.f32.mxu0 %v4519_v10  ;;  %1166 = vmatprep.subr.mxu1 %v433_v32  ;;  %v393_v35 = vpop.permute.xlu0 %392 }
  0xbc   : > { %v406_v36 = vsel %vm385_vm1, %v393_v35, %v401_v33  ;;  %v410_v37 = vsel %vm385_vm1, %v401_v33, %v393_v35  ;;  %1167 = vmatpush1.msra.mxu1 %v432_v31  ;;  %v4041_v33 = vld [vmem:[%s6713_s6 + $0xc] sm:$0x3] }
  0xbd   : > { %v430_v38 = vmul.f32 %v4767_v29, %v410_v37  ;;  %v431_v40 = vmul.f32 %v4770_v30, %v406_v36 }
  0xbe   : > { %4057 = vmatmul.mubr.msk.f32.gmra.mxu0 %vm876_vm3, %v871_v34 }
  0xbf   : > { %v399_v41 = vpop.permute.xlu1 %398  ;;  %1068 = vmatprep.mubr.f32.mxu0 %v4519_v10  ;;  %1168 = vmatprep.subr.mxu1 %v431_v40  ;;  %v391_v44 = vpop.permute.xlu0 %390  ;;  %v5045_v40 = vrot.slane %v4041_v33, %v4732_v15 }
  0xc0   : > { %v405_v45 = vsel %vm385_vm1, %v391_v44, %v399_v41  ;;  %v409_v46 = vsel %vm385_vm1, %v399_v41, %v391_v44  ;;  %1169 = vmatpush1.msra.mxu1 %v430_v38  ;;  %v5048_v41 = vrot.slane %v4041_v33, %v4734_v16 }
  0xc1   : > { %v428_v47 = vmul.f32 %v4767_v29, %v409_v46  ;;  %v429_v48 = vmul.f32 %v4770_v30, %v405_v45 }
  0xc2   : > { %4058 = vmatmul.mubr.msk.f32.gmra.mxu0 %vm876_vm3, %v872_v43 }
  0xc3   : > { %v397_v49 = vpop.permute.xlu1 %396  ;;  %1074 = vmatprep.mubr.f32.mxu0 %v4519_v10  ;;  %1170 = vmatprep.subr.mxu1 %v429_v48  ;;  %v389_v52 = vpop.permute.xlu0 %388 }
  0xc4   : > { %v404_v53 = vsel %vm385_vm1, %v389_v52, %v397_v49  ;;  %v408_v55 = vsel %vm385_vm1, %v397_v49, %v389_v52  ;;  %1171 = vmatpush1.msra.mxu1 %v428_v47 }
  0xc5   : > { %v426_v56 = vmul.f32 %v4767_v29, %v408_v55  ;;  %v427_v58 = vmul.f32 %v4770_v30, %v404_v53 }
  0xc6   : > { %4059 = vmatmul.mubr.msk.f32.gmra.mxu0 %vm876_vm3, %v873_v51 }
  0xc7   : > { %v726_v61 = vpop.permute.xlu1 %725  ;;  %1080 = vmatprep.mubr.f32.mxu0 %v4519_v10  ;;  %1172 = vmatprep.subr.mxu1 %v427_v58  ;;  %v718_v63 = vpop.permute.xlu0 %717 }
  0xc8   : > { %v730_v29 = vsel %vm708_vm6, %v718_v63, %v726_v61  ;;  %v734_v30 = vsel %vm708_vm6, %v726_v61, %v718_v63  ;;  %1173 = vmatpush1.msra.mxu1 %v426_v56 }
  0xc9   : > { %v756_v11 = vmul.f32 %v4999_v59, %v730_v29  ;;  %v757_v1 = vmul.f32 %v5002_v60, %v734_v30 }
  0xca   : > { %4060 = vmatmul.mubr.msk.f32.gmra.mxu0 %vm876_vm3, %v874_v62 }
  0xcb   : > { %v724_v12 = vpop.permute.xlu1 %723  ;;  %1086 = vmatprep.mubr.f32.mxu0 %v4519_v10  ;;  %1174 = vmatprep.subr.mxu1 %v757_v1  ;;  %v716_v17 = vpop.permute.xlu0 %715 }
  0xcc   : > { %v729_v18 = vsel %vm708_vm6, %v716_v17, %v724_v12  ;;  %v733_v19 = vsel %vm708_vm6, %v724_v12, %v716_v17  ;;  %1175 = vmatpush2.msra.mxu1 %v756_v11  ;;  %v4040_v11 = vld [vmem:[%s6713_s6 + $0xa] sm:$0x3] }
  0xcd   : > { %v754_v22 = vmul.f32 %v4999_v59, %v729_v18  ;;  %v755_v23 = vmul.f32 %v5002_v60, %v733_v19  ;;  %v5079_v19 = vrot.slane %v4040_v11, %v4732_v15 }
  0xce   : > { %4061 = vmatmul.mubr.msk.f32.gmra.mxu0 %vm876_vm3, %v875_v13 }
  0xcf   : > { %v722_v24 = vpop.permute.xlu1 %721  ;;  %1367 = vmatprep.mubr.f32.mxu0 %v4519_v10  ;;  %1176 = vmatprep.subr.mxu1 %v755_v23  ;;  %v714_v25 = vpop.permute.xlu0 %713 }
  0xd0   : > { %v728_v26 = vsel %vm708_vm6, %v714_v25, %v722_v24  ;;  %v732_v27 = vsel %vm708_vm6, %v722_v24, %v714_v25  ;;  %1177 = vmatpush2.msra.mxu1 %v754_v22  ;;  %v5082_v22 = vrot.slane %v4040_v11, %v4734_v16 }
  0xd1   : > { %v752_v28 = vmul.f32 %v4999_v59, %v728_v26  ;;  %v753_v31 = vmul.f32 %v5002_v60, %v732_v27 }
  0xd3   : > { %v720_v32 = vpop.permute.xlu1 %719  ;;  %1178 = vmatprep.subr.mxu1 %v753_v31  ;;  %v712_v34 = vpop.permute.xlu0 %711 }
  0xd4   : > { %v727_v35 = vsel %vm708_vm6, %v712_v34, %v720_v32  ;;  %v731_v36 = vsel %vm708_vm6, %v720_v32, %v712_v34  ;;  %1179 = vmatpush2.msra.mxu1 %v752_v28 }
  0xd5   : > { %v750_v37 = vmul.f32 %v4999_v59, %v727_v35  ;;  %v751_v38 = vmul.f32 %v5002_v60, %v731_v36 }
  0xd7   : > { %v672_v43 = vpop.permute.xlu1 %671  ;;  %1180 = vmatprep.subr.mxu1 %v751_v38  ;;  %v664_v44 = vpop.permute.xlu0 %663 }
  0xd8   : > { %v676_v45 = vsel %vm654_vm7, %v664_v44, %v672_v43  ;;  %v680_v46 = vsel %vm654_vm7, %v672_v43, %v664_v44  ;;  %1181 = vmatpush2.msra.mxu1 %v750_v37 }
  0xd9   : > { %v702_v47 = vmul.f32 %v5045_v40, %v676_v45  ;;  %v703_v48 = vmul.f32 %v5048_v41, %v680_v46 }
  0xdb   : > { %v670_v49 = vpop.permute.xlu1 %669  ;;  %1182 = vmatprep.subr.mxu1 %v703_v48  ;;  %v662_v50 = vpop.permute.xlu0 %661  ;;  %v4043_v48 = vld [vmem:[%s6713_s6 + $0x10] sm:$0x3] }
  0xdc   : > { %v675_v51 = vsel %vm654_vm7, %v662_v50, %v670_v49  ;;  %v679_v52 = vsel %vm654_vm7, %v670_v49, %v662_v50  ;;  %1183 = vmatpush2.msra.mxu1 %v702_v47 }
  0xdd   : > { %v700_v53 = vmul.f32 %v5045_v40, %v675_v51  ;;  %v701_v55 = vmul.f32 %v5048_v41, %v679_v52 }
  0xdf   : > { %v668_v56 = vpop.permute.xlu1 %667  ;;  %1184 = vmatprep.subr.mxu1 %v701_v55  ;;  %v660_v58 = vpop.permute.xlu0 %659  ;;  %v5113_v55 = vrot.slane %v4043_v48, %v4732_v15 }
  0xe0   : > { %v674_v61 = vsel %vm654_vm7, %v660_v58, %v668_v56  ;;  %v678_v62 = vsel %vm654_vm7, %v668_v56, %v660_v58  ;;  %1185 = vmatpush2.msra.mxu1 %v700_v53  ;;  %v5116_v56 = vrot.slane %v4043_v48, %v4734_v16 }
  0xe1   : > { %v698_v63 = vmul.f32 %v5045_v40, %v674_v61  ;;  %v699_v29 = vmul.f32 %v5048_v41, %v678_v62 }
  0xe3   : > { %v666_v30 = vpop.permute.xlu1 %665  ;;  %1186 = vmatprep.subr.mxu1 %v699_v29  ;;  %v658_v1 = vpop.permute.xlu0 %657 }
  0xe4   : > { %v673_v12 = vsel %vm654_vm7, %v658_v1, %v666_v30  ;;  %v677_v13 = vsel %vm654_vm7, %v666_v30, %v658_v1  ;;  %1187 = vmatpush2.msra.mxu1 %v698_v63 }
  0xe5   : > { %v696_v17 = vmul.f32 %v5045_v40, %v673_v12  ;;  %v697_v18 = vmul.f32 %v5048_v41, %v677_v13 }
  0xe7   : > { %v618_v23 = vpop.permute.xlu1 %617  ;;  %1188 = vmatprep.subr.mxu1 %v697_v18  ;;  %v610_v24 = vpop.permute.xlu0 %609 }
  0xe8   : > { %v622_v25 = vsel %vm600_vm8, %v610_v24, %v618_v23  ;;  %v626_v26 = vsel %vm600_vm8, %v618_v23, %v610_v24  ;;  %1189 = vmatpush2.msra.mxu1 %v696_v17  ;;  %v815_v23 = vld [vmem:[%s6711_s4 + $0x18] sm:$0xff] }
  0xe9   : > { %v648_v27 = vmul.f32 %v5079_v19, %v622_v25  ;;  %v649_v28 = vmul.f32 %v5082_v22, %v626_v26  ;;  %v819_v25 = vld [vmem:[%s6711_s4 + $0x38] sm:$0xff] }
  0xeb   : > { %v616_v31 = vpop.permute.xlu1 %615  ;;  %1190 = vmatprep.subr.mxu1 %v649_v28  ;;  %v608_v32 = vpop.permute.xlu0 %607 }
  0xec   : > { %v621_v33 = vsel %vm600_vm8, %v608_v32, %v616_v31  ;;  %v625_v34 = vsel %vm600_vm8, %v616_v31, %v608_v32  ;;  %1191 = vmatpush2.msra.mxu1 %v648_v27  ;;  %v818_v31 = vld [vmem:[%s6711_s4 + $0x30] sm:$0xff] }
  0xed   : > { %v646_v35 = vmul.f32 %v5079_v19, %v621_v33  ;;  %v647_v36 = vmul.f32 %v5082_v22, %v625_v34  ;;  %v814_v32 = vld [vmem:[%s6711_s4 + $0x10] sm:$0xff] }
  0xee   : > { %v822_v34 = vld [vmem:[%s6711_s4 + $0x50] sm:$0xff] }
  0xef   : > { %v614_v37 = vpop.permute.xlu1 %613  ;;  %1192 = vmatprep.subr.mxu1 %v647_v36  ;;  %v606_v38 = vpop.permute.xlu0 %605 }
  0xf0   : > { %v620_v43 = vsel %vm600_vm8, %v606_v38, %v614_v37  ;;  %v624_v44 = vsel %vm600_vm8, %v614_v37, %v606_v38  ;;  %1193 = vmatpush2.msra.mxu1 %v646_v35 }
  0xf1   : > { %v644_v45 = vmul.f32 %v5079_v19, %v620_v43  ;;  %v645_v46 = vmul.f32 %v5082_v22, %v624_v44  ;;  %v821_v44 = vld [vmem:[%s6711_s4 + $0x48] sm:$0xff] }
  0xf3   : > { %v612_v47 = vpop.permute.xlu1 %611  ;;  %1194 = vmatprep.subr.mxu1 %v645_v46  ;;  %v604_v49 = vpop.permute.xlu0 %603 }
  0xf4   : > { %v619_v50 = vsel %vm600_vm8, %v604_v49, %v612_v47  ;;  %v623_v51 = vsel %vm600_vm8, %v612_v47, %v604_v49  ;;  %1195 = vmatpush2.msra.mxu1 %v644_v45  ;;  %v817_v45 = vld [vmem:[%s6711_s4 + $0x28] sm:$0xff] }
  0xf5   : > { %v642_v52 = vmul.f32 %v5079_v19, %v619_v50  ;;  %v643_v53 = vmul.f32 %v5082_v22, %v623_v51  ;;  %v825_v47 = vld [vmem:[%s6711_s4 + $0x68] sm:$0xff]  ;;  %v824_v51 = vld [vmem:[%s6711_s4 + $0x60] sm:$0xff] }
  0xf7   : > { %v780_v58 = vpop.permute.xlu1 %779  ;;  %1196 = vmatprep.subr.mxu1 %v643_v53  ;;  %v772_v61 = vpop.permute.xlu0 %771 }
  0xf8   : > { %v784_v62 = vsel %vm762_vm9, %v772_v61, %v780_v58  ;;  %v788_v63 = vsel %vm762_vm9, %v780_v58, %v772_v61  ;;  %1197 = vmatpush2.msra.mxu1 %v642_v52  ;;  %v820_v52 = vld [vmem:[%s6711_s4 + $0x40] sm:$0xff] }
  0xf9   : > { %v810_v29 = vmul.f32 %v5113_v55, %v784_v62  ;;  %v811_v30 = vmul.f32 %v5116_v56, %v788_v63  ;;  %1198 = vmatprep.subr.mxu1 %v4598_v2  ;;  %v828_v58 = vld [vmem:[%s6711_s4 + $0x80] sm:$0xff]  ;;  %v827_v62 = vld [vmem:[%s6711_s4 + $0x78] sm:$0xff] }
  0xfa   : > { %1199 = vmatpush2.msra.mxu1 %v4584_v0  ;;  %v823_v63 = vld [vmem:[%s6711_s4 + $0x58] sm:$0xff] }
  0xfb   : > { %v778_v15 = vpop.permute.xlu1 %777  ;;  %1200 = vmatprep.subr.mxu1 %v4606_v4  ;;  %1327 = vmatprep.subr.mxu0 %v811_v30  ;;  %v770_v16 = vpop.permute.xlu0 %769  ;;  %v812_v4 = vld [vmem:[%s6711_s4] sm:$0xff]  ;;  %v826_v30 = vld [vmem:[%s6711_s4 + $0x70] sm:$0xff] }
  0xfc   : > { %v783_v11 = vsel %vm762_vm9, %v770_v16, %v778_v15  ;;  %v787_v1 = vsel %vm762_vm9, %v778_v15, %v770_v16  ;;  %1201 = vmatpush2.msra.mxu1 %v4600_v3  ;;  %1328 = vmatpush1.msra.mxu0 %v810_v29  ;;  %v816_v3 = vld [vmem:[%s6711_s4 + $0x20] sm:$0xff]  ;;  %v831_v29 = vld [vmem:[%s6711_s4 + $0x98] sm:$0xff]  ;;  %v834_v15 = vld [vmem:[%s6711_s4 + $0xb0] sm:$0xff] }
  0xfd   : > { %v808_v12 = vmul.f32 %v5113_v55, %v783_v11  ;;  %v809_v2 = vmul.f32 %v5116_v56, %v787_v1  ;;  %1202 = vmatprep.subr.mxu1 %v4616_v6  ;;  %v829_v16 = vld [vmem:[%s6711_s4 + $0x88] sm:$0xff]  ;;  %v836_v1 = vld [vmem:[%s6711_s4 + $0xc0] sm:$0xff] }
  0xfe   : > { %1203 = vmatpush2.msra.mxu1 %v4618_v7  ;;  %v837_v11 = vld [vmem:[%s6711_s4 + $0xc8] sm:$0xff] }
  0xff   : > { %v776_v0 = vpop.permute.xlu1 %775  ;;  %1204 = vmatprep.subr.mxu1 %v4624_v8  ;;  %v768_v13 = vpop.permute.xlu0 %767  ;;  %1329 = vmatprep.subr.mxu0 %v809_v2  ;;  %v840_v2 = vld [vmem:[%s6711_s4 + $0xe0] sm:$0xff] }
 0x100   : > { %v782_v17 = vsel %vm762_vm9, %v768_v13, %v776_v0  ;;  %v786_v6 = vsel %vm762_vm9, %v776_v0, %v768_v13  ;;  %1205 = vmatpush2.msra.mxu1 %v4626_v9  ;;  %1330 = vmatpush1.msra.mxu0 %v808_v12  ;;  %v832_v12 = vld [vmem:[%s6711_s4 + $0xa0] sm:$0xff]  ;;  %v839_v0 = vld [vmem:[%s6711_s4 + $0xd8] sm:$0xff] }
 0x101   : > { %v806_v7 = vmul.f32 %v5113_v55, %v782_v17  ;;  %v807_v18 = vmul.f32 %v5116_v56, %v786_v6  ;;  %1207 = vmatmul.mubr.f32.vlgmr.msra.gmra.mxu1 %v812_v4  ;;  %v835_v4 = vld [vmem:[%s6711_s4 + $0xb8] sm:$0xff]  ;;  %v838_v17 = vld [vmem:[%s6711_s4 + $0xd0] sm:$0xff] }
 0x102   : > { %1212 = vmatprep.mubr.f32.mxu1 %v816_v3  ;;  %v843_v13 = vld [vmem:[%s6711_s4 + $0xf8] sm:$0xff]  ;;  %v842_v3 = vld [vmem:[%s6711_s4 + $0xf0] sm:$0xff] }
 0x103   : > { %v774_v8 = vpop.permute.xlu1 %773  ;;  %1331 = vmatprep.subr.mxu0 %v807_v18  ;;  %v846_v6 = vld [vmem:[%s6711_s4 + $0x110] sm:$0xff]  ;;  %v841_v18 = vld [vmem:[%s6711_s4 + $0xe8] sm:$0xff] }
 0x104   : > { %v766_v24 = vpop.permute.xlu0 %765  ;;  %1332 = vmatpush1.msra.mxu0 %v806_v7  ;;  %v845_v7 = vld [vmem:[%s6711_s4 + $0x108] sm:$0xff] }
 0x105   : > { %v781_v9 = vsel %vm762_vm9, %v766_v24, %v774_v8  ;;  %v785_v26 = vsel %vm762_vm9, %v774_v8, %v766_v24  ;;  %1213 = vmatmul.mubr.f32.gmra.mxu1 %v815_v23  ;;  %v849_v8 = vld [vmem:[%s6711_s4 + $0x128] sm:$0xff]  ;;  %v848_v23 = vld [vmem:[%s6711_s4 + $0x120] sm:$0xff] }
 0x106   : > { %v804_v27 = vmul.f32 %v5113_v55, %v781_v9  ;;  %v805_v28 = vmul.f32 %v5116_v56, %v785_v26  ;;  %1218 = vmatprep.mubr.f32.mxu1 %v819_v25  ;;  %v844_v24 = vld [vmem:[%s6711_s4 + $0x100] sm:$0xff]  ;;  %v851_v9 = vld [vmem:[%s6711_s4 + $0x138] sm:$0xff] }
 0x107   : > { %v437_v33 = vpop.permute.xlu1 %436  ;;  %v852_v25 = vld [vmem:[%s6711_s4 + $0x140] sm:$0xff]  ;;  %v847_v26 = vld [vmem:[%s6711_s4 + $0x118] sm:$0xff] }
 0x108   : > { %1333 = vmatprep.subr.mxu0 %v805_v28  ;;  %v435_v35 = vpop.permute.xlu0 %434  ;;  %v854_v28 = vld [vmem:[%s6711_s4 + $0x150] sm:$0xff] }
 0x109   : > { %1334 = vmatpush1.msra.mxu0 %v804_v27  ;;  %v439_v36 = vsel %vm438_vm5, %v435_v35, %v437_v33  ;;  %v440_v37 = vsel %vm438_vm5, %v437_v33, %v435_v35  ;;  %1219 = vmatmul.mubr.f32.gmra.mxu1 %v818_v31  ;;  %v855_v27 = vld [vmem:[%s6711_s4 + $0x158] sm:$0xff]  ;;  %v850_v31 = vld [vmem:[%s6711_s4 + $0x130] sm:$0xff]  ;;  %v857_v33 = vld [vmem:[%s6711_s4 + $0x168] sm:$0xff] }
 0x10a   : > { %4062 = vmatmul.mubr.msk.f32.vlgmr.msra.gmra.mxu0 %vm1093_vm10, %v814_v32  ;;  %v478_v38 = vmul.f32 %v4886_v39, %v440_v37  ;;  %v479_v43 = vmul.f32 %v4894_v42, %v439_v36  ;;  %1224 = vmatprep.mubr.f32.mxu1 %v822_v34  ;;  %v858_v32 = vld [vmem:[%s6711_s4 + $0x170] sm:$0xff]  ;;  %v853_v34 = vld [vmem:[%s6711_s4 + $0x148] sm:$0xff] }
 0x10b   : > { %1373 = vmatprep.mubr.f32.mxu0 %v4519_v10  ;;  %v491_v46 = vpop.permute.xlu1 %490 }
 0x10c   : > { %4094 = vmatprep.subr.msk.mxu1 %vm925_vm2, %v479_v43  ;;  %v489_v39 = vpop.permute.xlu0 %488  ;;  %v856_v43 = vld [vmem:[%s6711_s4 + $0x160] sm:$0xff] }
 0x10d   : > { %v493_v42 = vsel %vm492_vm4, %v489_v39, %v491_v46  ;;  %v494_v48 = vsel %vm492_vm4, %v491_v46, %v489_v39  ;;  %4095 = vmatpush1.msk.msra.mxu1 %vm925_vm2, %v478_v38  ;;  %v4079_v39 = vld [vmem:[%s6710_s3 + $0x88] sm:$0xff] }
 0x10e   : > { %1225 = vmatmul.mubr.f32.gmra.mxu1 %v821_v44  ;;  %4063 = vmatmul.mubr.msk.f32.gmra.mxu0 %vm1093_vm10, %v817_v45  ;;  %v532_v49 = vmul.f32 %v4816_v54, %v494_v48  ;;  %v533_v50 = vmul.f32 %v4824_v57, %v493_v42  ;;  %v4078_v44 = vld [vmem:[%s6710_s3 + $0x80] sm:$0xff]  ;;  %v4080_v48 = vld [vmem:[%s6710_s3 + $0x90] sm:$0xff] }
 0x10f   : > { %1230 = vmatprep.mubr.f32.mxu1 %v825_v47  ;;  %1379 = vmatprep.mubr.f32.mxu0 %v4519_v10  ;;  %v5204_v53 = vpop.permute.xlu1 %544  ;;  %v859_v47 = vld [vmem:[%s6711_s4 + $0x178] sm:$0xff] }
 0x110   : > { %4128 = vmatprep.subr.msk.mxu0 %vm925_vm2, %v533_v50  ;;  %v5210_v54 = vpop.permute.xlu0 %542 }
 0x111   : > { %4129 = vmatpush1.msk.msra.mxu0 %vm925_vm2, %v532_v49  ;;  %v547_v57 = vsel %vm546_vm0, %v5210_v54, %v5204_v53  ;;  %v548_v37 = vsel %vm546_vm0, %v5204_v53, %v5210_v54  ;;  %v4112_v49 = vld [vmem:[%s6710_s3 + $0x100] sm:$0xff] }
 0x112   : > { %1231 = vmatmul.mubr.f32.gmra.mxu1 %v824_v51  ;;  %4064 = vmatmul.mubr.msk.f32.gmra.mxu0 %vm1093_vm10, %v820_v52  ;;  %v587_v61 = vmul.f32 %v4748_v21, %v547_v57  ;;  %v830_v21 = vld [vmem:[%s6711_s4 + $0x90] sm:$0xff]  ;;  %v586_v45 = vmul.f32 %v4745_v20, %v548_v37  ;;  %v4081_v51 = vld [vmem:[%s6710_s3 + $0x98] sm:$0xff]  ;;  %v4113_v52 = vld [vmem:[%s6710_s3 + $0x108] sm:$0xff] }
 0x113   : > { %1236 = vmatprep.mubr.f32.mxu1 %v828_v58  ;;  %1385 = vmatprep.mubr.f32.mxu0 %v4519_v10  ;;  %v5339_v35 = vpop.permute.xlu1 %598  ;;  %v4506_v53 = vld [vmem:[%s4589_s14] sm:$0xff]  ;;  %v4114_v58 = vld [vmem:[%s6710_s3 + $0x110] sm:$0xff]  ;;  %v4083_v57 = vld [vmem:[%s6710_s3 + $0xa8] sm:$0xff]  ;;  %s6693_s14 = scalar_lea.vmem %s6714_s7, %s4578_s29 }
 0x114   : > { %4162 = vmatprep.subr.msk.mxu1 %vm925_vm2, %v587_v61  ;;  %4196 = vmatprep.subr.msk.mxu0 %vm925_vm2, %v4610_v5  ;;  %v833_v5 = vld [vmem:[%s6711_s4 + $0xa8] sm:$0xff]  ;;  %v5341_v36 = vpop.permute.xlu0 %596  ;;  %v4115_v61 = vld [vmem:[%s6710_s3 + $0x118] sm:$0xff] }
 0x115   : > { %v602_v38 = vsel %vm600_vm8, %v5339_v35, %v5341_v36 }
 0x116   : > { %1237 = vmatmul.mubr.f32.gmra.mxu1 %v827_v62  ;;  %4065 = vmatmul.mubr.msk.f32.gmra.mxu0 %vm1093_vm10, %v823_v63  ;;  %v641_v46 = vmul.f32 %v5082_v22, %v602_v38 }
 0x117   : > { %1242 = vmatprep.mubr.f32.mxu1 %v831_v29  ;;  %1391 = vmatprep.mubr.f32.mxu0 %v4519_v10  ;;  %v5372_v42 = vpop.permute.xlu1 %652  ;;  %v4084_v29 = vld [vmem:[%s6710_s3 + $0xb0] sm:$0xff] }
 0x118   : > { %v5374_v20 = vpop.permute.xlu0 %650 }
 0x119   : > { %v656_v22 = vsel %vm654_vm7, %v5372_v42, %v5374_v20 }
 0x11a   : > { %1243 = vmatmul.mubr.f32.gmra.mxu1 %v830_v21  ;;  %4066 = vmatmul.mubr.msk.f32.gmra.mxu0 %vm1093_vm10, %v826_v30  ;;  %v695_v50 = vmul.f32 %v5048_v41, %v656_v22  ;;  %v4082_v41 = vld [vmem:[%s6710_s3 + $0xa0] sm:$0xff]  ;;  %v4147_v22 = vld [vmem:[%s6710_s3 + $0x188] sm:$0xff] }
 0x11b   : > { %1248 = vmatprep.mubr.f32.mxu1 %v834_v15  ;;  %1397 = vmatprep.mubr.f32.mxu0 %v4519_v10  ;;  %v4116_v21 = vld [vmem:[%s6710_s3 + $0x120] sm:$0xff]  ;;  %v4085_v15 = vld [vmem:[%s6710_s3 + $0xb8] sm:$0xff] }
 0x11c   : > { %v5552_v37 = vpop.permute.xlu0 %704 }
 0x11e   : > { %1249 = vmatmul.mubr.f32.gmra.mxu1 %v833_v5  ;;  %4067 = vmatmul.mubr.msk.f32.gmra.mxu0 %vm1093_vm10, %v829_v16  ;;  %v4117_v5 = vld [vmem:[%s6710_s3 + $0x128] sm:$0xff] }
 0x11f   : > { %1254 = vmatprep.mubr.f32.mxu1 %v837_v11  ;;  %1403 = vmatprep.mubr.f32.mxu0 %v4519_v10  ;;  %v4086_v11 = vld [vmem:[%s6710_s3 + $0xc0] sm:$0xff] }
 0x122   : > { %1255 = vmatmul.mubr.f32.gmra.mxu1 %v836_v1  ;;  %4068 = vmatmul.mubr.msk.f32.gmra.mxu0 %vm1093_vm10, %v832_v12  ;;  %v4118_v1 = vld [vmem:[%s6710_s3 + $0x130] sm:$0xff] }
 0x123   : > { %1260 = vmatprep.mubr.f32.mxu1 %v840_v2  ;;  %1409 = vmatprep.mubr.f32.mxu0 %v4519_v10  ;;  %v4087_v2 = vld [vmem:[%s6710_s3 + $0xc8] sm:$0xff] }
 0x126   : > { %1261 = vmatmul.mubr.f32.gmra.mxu1 %v839_v0  ;;  %4069 = vmatmul.mubr.msk.f32.gmra.mxu0 %vm1093_vm10, %v835_v4  ;;  %v4119_v0 = vld [vmem:[%s6710_s3 + $0x138] sm:$0xff] }
 0x127   : > { %1266 = vmatprep.mubr.f32.mxu1 %v843_v13  ;;  %1415 = vmatprep.mubr.f32.mxu0 %v4519_v10  ;;  %v4088_v13 = vld [vmem:[%s6710_s3 + $0xd0] sm:$0xff] }
 0x12a   : > { %1267 = vmatmul.mubr.f32.gmra.mxu1 %v842_v3  ;;  %4070 = vmatmul.mubr.msk.f32.gmra.mxu0 %vm1093_vm10, %v838_v17  ;;  %v4120_v3 = vld [vmem:[%s6710_s3 + $0x140] sm:$0xff] }
 0x12b   : > { %1272 = vmatprep.mubr.f32.mxu1 %v846_v6  ;;  %1421 = vmatprep.mubr.f32.mxu0 %v4519_v10  ;;  %v4089_v6 = vld [vmem:[%s6710_s3 + $0xd8] sm:$0xff] }
 0x12e   : > { %1273 = vmatmul.mubr.f32.gmra.mxu1 %v845_v7  ;;  %4071 = vmatmul.mubr.msk.f32.gmra.mxu0 %vm1093_vm10, %v841_v18  ;;  %v4121_v7 = vld [vmem:[%s6710_s3 + $0x148] sm:$0xff] }
 0x12f   : > { %1278 = vmatprep.mubr.f32.mxu1 %v849_v8  ;;  %1427 = vmatprep.mubr.f32.mxu0 %v4519_v10  ;;  %v4090_v8 = vld [vmem:[%s6710_s3 + $0xe0] sm:$0xff] }
 0x132   : > { %1279 = vmatmul.mubr.f32.gmra.mxu1 %v848_v23  ;;  %4072 = vmatmul.mubr.msk.f32.gmra.mxu0 %vm1093_vm10, %v844_v24  ;;  %v4122_v23 = vld [vmem:[%s6710_s3 + $0x150] sm:$0xff] }
 0x133   : > { %1284 = vmatprep.mubr.f32.mxu1 %v852_v25  ;;  %1433 = vmatprep.mubr.f32.mxu0 %v4519_v10  ;;  %v4091_v25 = vld [vmem:[%s6710_s3 + $0xe8] sm:$0xff] }
 0x136   : > { %1285 = vmatmul.mubr.f32.gmra.mxu1 %v851_v9  ;;  %4073 = vmatmul.mubr.msk.f32.gmra.mxu0 %vm1093_vm10, %v847_v26  ;;  %v4123_v9 = vld [vmem:[%s6710_s3 + $0x158] sm:$0xff] }
 0x137   : > { %1290 = vmatprep.mubr.f32.mxu1 %v855_v27  ;;  %1439 = vmatprep.mubr.f32.mxu0 %v4519_v10  ;;  %v4092_v27 = vld [vmem:[%s6710_s3 + $0xf0] sm:$0xff] }
 0x13a   : > { %1291 = vmatmul.mubr.f32.gmra.mxu1 %v854_v28  ;;  %4074 = vmatmul.mubr.msk.f32.gmra.mxu0 %vm1093_vm10, %v850_v31  ;;  %v4124_v28 = vld [vmem:[%s6710_s3 + $0x160] sm:$0xff] }
 0x13b   : > { %1296 = vmatprep.mubr.f32.mxu1 %v858_v32  ;;  %1445 = vmatprep.mubr.f32.mxu0 %v4519_v10  ;;  %v4093_v32 = vld [vmem:[%s6710_s3 + $0xf8] sm:$0xff] }
 0x13e   : > { %1297 = vmatmul.mubr.f32.gmra.mxu1 %v857_v33  ;;  %4075 = vmatmul.mubr.msk.f32.gmra.mxu0 %vm1093_vm10, %v853_v34  ;;  %v4125_v33 = vld [vmem:[%s6710_s3 + $0x168] sm:$0xff]  ;;  %v5550_v34 = vpop.permute.xlu1 %706 }
 0x13f   : > { %1451 = vmatprep.mubr.f32.mxu0 %v4519_v10  ;;  %1599 = vmatprep.mubr.f32.mxu1 %v4519_v10 }
 0x142   : > { %4076 = vmatmul.mubr.msk.f32.gmra.mxu0 %vm1093_vm10, %v856_v43  ;;  %4096 = vmatmul.mubr.msk.f32.vlgmr.msra.gmra.mxu1 %vm876_vm3, %v4078_v44  ;;  %v601_v43 = vsel %vm600_vm8, %v5341_v36, %v5339_v35  ;;  %v710_v44 = vsel %vm708_vm6, %v5550_v34, %v5552_v37  ;;  %v4146_v35 = vld [vmem:[%s6710_s3 + $0x180] sm:$0xff] }
 0x143   : > { %1457 = vmatprep.mubr.f32.mxu0 %v4519_v10  ;;  %1605 = vmatprep.mubr.f32.mxu1 %v4519_v10 }
 0x144   : > { %4163 = vmatpush1.msk.msra.mxu1 %vm925_vm2, %v586_v45  ;;  %v4126_v45 = vld [vmem:[%s6710_s3 + $0x170] sm:$0xff] }
 0x145   : > { %4230 = vmatprep.subr.msk.mxu1 %vm925_vm2, %v641_v46  ;;  %v640_v46 = vmul.f32 %v5079_v19, %v601_v43  ;;  %v5590_v19 = vpop.permute.xlu0 %758 }
 0x146   : > { %4077 = vmatmul.mubr.msk.f32.gmra.mxu0 %vm1093_vm10, %v859_v47  ;;  %4097 = vmatmul.mubr.msk.f32.gmra.mxu1 %vm876_vm3, %v4079_v39  ;;  %v749_v47 = vmul.f32 %v5002_v60, %v710_v44  ;;  %v4127_v39 = vld [vmem:[%s6710_s3 + $0x178] sm:$0xff]  ;;  %v4158_v44 = vld [vmem:[%s6710_s3 + $0x1e0] sm:$0xff] }
 0x147   : > { %1611 = vmatprep.mubr.f32.mxu1 %v4519_v10  ;;  %1863 = vmatprep.mubr.f32.mxu0 %v4519_v10 }
 0x14a   : > { %4098 = vmatmul.mubr.msk.f32.gmra.mxu1 %vm876_vm3, %v4080_v48  ;;  %4130 = vmatmul.mubr.msk.f32.vlgmr.msra.gmra.mxu0 %vm876_vm3, %v4112_v49  ;;  %v5588_v48 = vpop.permute.xlu1 %760  ;;  %v655_v49 = vsel %vm654_vm7, %v5374_v20, %v5372_v42  ;;  %v4180_v42 = vld [vmem:[%s6710_s3 + $0x200] sm:$0xff] }
 0x14b   : > { %1617 = vmatprep.mubr.f32.mxu1 %v4519_v10  ;;  %1869 = vmatprep.mubr.f32.mxu0 %v4519_v10 }
 0x14c   : > { %4197 = vmatpush1.msk.msra.mxu0 %vm925_vm2, %v4506_v53 }
 0x14d   : > { %4264 = vmatprep.subr.msk.mxu0 %vm925_vm2, %v695_v50  ;;  %v764_v50 = vsel %vm762_vm9, %v5588_v48, %v5590_v19 }
 0x14e   : > { %4099 = vmatmul.mubr.msk.f32.gmra.mxu1 %vm876_vm3, %v4081_v51  ;;  %4131 = vmatmul.mubr.msk.f32.gmra.mxu0 %vm876_vm3, %v4113_v52  ;;  %v4148_v51 = vld [vmem:[%s6710_s3 + $0x190] sm:$0xff]  ;;  %v694_v52 = vmul.f32 %v5045_v40, %v655_v49  ;;  %v803_v53 = vmul.f32 %v5116_v56, %v764_v50  ;;  %v4150_v40 = vld [vmem:[%s6710_s3 + $0x1a0] sm:$0xff] }
 0x14f   : > { %1623 = vmatprep.mubr.f32.mxu1 %v4519_v10  ;;  %1875 = vmatprep.mubr.f32.mxu0 %v4519_v10  ;;  %v4182_v56 = vld [vmem:[%s6710_s3 + $0x210] sm:$0xff]  ;;  %v4192_v49 = vld [vmem:[%s6710_s3 + $0x260] sm:$0xff] }
 0x152   : > { %4100 = vmatmul.mubr.msk.f32.gmra.mxu1 %vm876_vm3, %v4082_v41  ;;  %4132 = vmatmul.mubr.msk.f32.gmra.mxu0 %vm876_vm3, %v4114_v58  ;;  %v5418_v54 = vpop.f32.mrf.mxu0  ;;  %v4149_v41 = vld [vmem:[%s6710_s3 + $0x198] sm:$0xff]  ;;  %v4181_v58 = vld [vmem:[%s6710_s3 + $0x208] sm:$0xff] }
 0x153   : > { %1629 = vmatprep.mubr.f32.mxu1 %v4519_v10  ;;  %1881 = vmatprep.mubr.f32.mxu0 %v4519_v10 }
 0x154   : > { %v5428_v62 = vpop.f32.mrf.mxu0 }
 0x156   : > { %4101 = vmatmul.mubr.msk.f32.gmra.mxu1 %vm876_vm3, %v4083_v57  ;;  %4133 = vmatmul.mubr.msk.f32.gmra.mxu0 %vm876_vm3, %v4115_v61  ;;  %v5432_v63 = vpop.f32.mrf.mxu0 }
 0x157   : > { %1635 = vmatprep.mubr.f32.mxu1 %v4519_v10  ;;  %1887 = vmatprep.mubr.f32.mxu0 %v4519_v10 }
 0x158   : > { %v5442_v30 = vpop.f32.mrf.mxu0 }
 0x15a   : > { %4102 = vmatmul.mubr.msk.f32.gmra.mxu1 %vm876_vm3, %v4084_v29  ;;  %4134 = vmatmul.mubr.msk.f32.gmra.mxu0 %vm876_vm3, %v4116_v21  ;;  %v5454_v16 = vpop.f32.mrf.mxu0  ;;  %v4151_v29 = vld [vmem:[%s6710_s3 + $0x1a8] sm:$0xff]  ;;  %v4183_v21 = vld [vmem:[%s6710_s3 + $0x218] sm:$0xff] }
 0x15b   : > { %1641 = vmatprep.mubr.f32.mxu1 %v4519_v10  ;;  %1893 = vmatprep.mubr.f32.mxu0 %v4519_v10 }
 0x15c   : > { %v5466_v12 = vpop.f32.mrf.mxu0 }
 0x15e   : > { %4103 = vmatmul.mubr.msk.f32.gmra.mxu1 %vm876_vm3, %v4085_v15  ;;  %4135 = vmatmul.mubr.msk.f32.gmra.mxu0 %vm876_vm3, %v4117_v5  ;;  %v5478_v4 = vpop.f32.mrf.mxu0  ;;  %v4152_v5 = vld [vmem:[%s6710_s3 + $0x1b0] sm:$0xff] }
 0x15f   : > { %1647 = vmatprep.mubr.f32.mxu1 %v4519_v10  ;;  %1899 = vmatprep.mubr.f32.mxu0 %v4519_v10 }
 0x160   : > { %v5490_v17 = vpop.f32.mrf.mxu0 }
 0x162   : > { %4104 = vmatmul.mubr.msk.f32.gmra.mxu1 %vm876_vm3, %v4086_v11  ;;  %4136 = vmatmul.mubr.msk.f32.gmra.mxu0 %vm876_vm3, %v4118_v1  ;;  %v5502_v18 = vpop.f32.mrf.mxu0  ;;  %v4184_v11 = vld [vmem:[%s6710_s3 + $0x220] sm:$0xff] }
 0x163   : > { %1653 = vmatprep.mubr.f32.mxu1 %v4519_v10  ;;  %1905 = vmatprep.mubr.f32.mxu0 %v4519_v10 }
 0x164   : > { %v5514_v24 = vpop.f32.mrf.mxu0 }
 0x166   : > { %4105 = vmatmul.mubr.msk.f32.gmra.mxu1 %vm876_vm3, %v4087_v2  ;;  %4137 = vmatmul.mubr.msk.f32.gmra.mxu0 %vm876_vm3, %v4119_v0  ;;  %v5526_v26 = vpop.f32.mrf.mxu0  ;;  %v4153_v2 = vld [vmem:[%s6710_s3 + $0x1b8] sm:$0xff]  ;;  %v4185_v0 = vld [vmem:[%s6710_s3 + $0x228] sm:$0xff] }
 0x167   : > { %1659 = vmatprep.mubr.f32.mxu1 %v4519_v10  ;;  %1911 = vmatprep.mubr.f32.mxu0 %v4519_v10 }
 0x168   : > { %v5538_v31 = vpop.f32.mrf.mxu0 }
 0x16a   : > { %4106 = vmatmul.mubr.msk.f32.gmra.mxu1 %vm876_vm3, %v4088_v13  ;;  %4138 = vmatmul.mubr.msk.f32.gmra.mxu0 %vm876_vm3, %v4120_v3  ;;  %v5554_v38 = vpop.f32.mrf.mxu0  ;;  %v4154_v3 = vld [vmem:[%s6710_s3 + $0x1c0] sm:$0xff] }
 0x16b   : > { %1665 = vmatprep.mubr.f32.mxu1 %v4519_v10  ;;  %1917 = vmatprep.mubr.f32.mxu0 %v4519_v10 }
 0x16c   : > { %v5574_v36 = vpop.f32.mrf.mxu0 }
 0x16e   : > { %4107 = vmatmul.mubr.msk.f32.gmra.mxu1 %vm876_vm3, %v4089_v6  ;;  %4139 = vmatmul.mubr.msk.f32.gmra.mxu0 %vm876_vm3, %v4121_v7  ;;  %v5592_v60 = vpop.f32.mrf.mxu0  ;;  %v4186_v6 = vld [vmem:[%s6710_s3 + $0x230] sm:$0xff] }
 0x16f   : > { %1671 = vmatprep.mubr.f32.mxu1 %v4519_v10  ;;  %1923 = vmatprep.mubr.f32.mxu0 %v4519_v10 }
 0x170   : > { %v5614_v20 = vpop.f32.mrf.mxu0 }
 0x172   : > { %4108 = vmatmul.mubr.msk.f32.gmra.mxu1 %vm876_vm3, %v4090_v8  ;;  %4140 = vmatmul.mubr.msk.f32.gmra.mxu0 %vm876_vm3, %v4122_v23  ;;  %v5628_v57 = vpop.f32.mrf.mxu0  ;;  %v4155_v8 = vld [vmem:[%s6710_s3 + $0x1c8] sm:$0xff]  ;;  %v4187_v23 = vld [vmem:[%s6710_s3 + $0x238] sm:$0xff] }
 0x173   : > { %1677 = vmatprep.mubr.f32.mxu1 %v4519_v10  ;;  %1929 = vmatprep.mubr.f32.mxu0 %v4519_v10 }
 0x174   : > { %v5642_v61 = vpop.f32.mrf.mxu0 }
 0x176   : > { %4109 = vmatmul.mubr.msk.f32.gmra.mxu1 %vm876_vm3, %v4091_v25  ;;  %4141 = vmatmul.mubr.msk.f32.gmra.mxu0 %vm876_vm3, %v4123_v9  ;;  %v5654_v15 = vpop.f32.mrf.mxu0  ;;  %v4156_v9 = vld [vmem:[%s6710_s3 + $0x1d0] sm:$0xff] }
 0x177   : > { %1683 = vmatprep.mubr.f32.mxu1 %v4519_v10  ;;  %1935 = vmatprep.mubr.f32.mxu0 %v4519_v10 }
 0x178   : > { %v5666_v1 = vpop.f32.mrf.mxu0 }
 0x17a   : > { %4110 = vmatmul.mubr.msk.f32.gmra.mxu1 %vm876_vm3, %v4092_v27  ;;  %4142 = vmatmul.mubr.msk.f32.gmra.mxu0 %vm876_vm3, %v4124_v28  ;;  %v5678_v13 = vpop.f32.mrf.mxu0  ;;  %v4188_v27 = vld [vmem:[%s6710_s3 + $0x240] sm:$0xff] }
 0x17b   : > { %1689 = vmatprep.mubr.f32.mxu1 %v4519_v10  ;;  %1941 = vmatprep.mubr.f32.mxu0 %v4519_v10 }
 0x17c   : > { %v5690_v7 = vpop.f32.mrf.mxu0 }
 0x17e   : > { %4111 = vmatmul.mubr.msk.f32.gmra.mxu1 %vm876_vm3, %v4093_v32  ;;  %4143 = vmatmul.mubr.msk.f32.gmra.mxu0 %vm876_vm3, %v4125_v33  ;;  %v5702_v25 = vpop.f32.mrf.mxu0  ;;  %v4157_v32 = vld [vmem:[%s6710_s3 + $0x1d8] sm:$0xff]  ;;  %v4189_v33 = vld [vmem:[%s6710_s3 + $0x248] sm:$0xff] }
 0x17f   : > { %1947 = vmatprep.mubr.f32.mxu0 %v4519_v10  ;;  %2127 = vmatprep.mubr.f32.mxu1 %v4519_v10 }
 0x180   : > { %v5714_v28 = vpop.f32.mrf.mxu0 }
 0x182   : > { %4144 = vmatmul.mubr.msk.f32.gmra.mxu0 %vm876_vm3, %v4126_v45  ;;  %4164 = vmatmul.mubr.msk.f32.vlgmr.msra.gmra.mxu1 %vm876_vm3, %v4146_v35  ;;  %v5726_v43 = vpop.f32.mrf.mxu0  ;;  %v4190_v45 = vld [vmem:[%s6710_s3 + $0x250] sm:$0xff] }
 0x183   : > { %1953 = vmatprep.mubr.f32.mxu0 %v4519_v10  ;;  %2133 = vmatprep.mubr.f32.mxu1 %v4519_v10 }
 0x184   : > { %4231 = vmatpush1.msk.msra.mxu1 %vm925_vm2, %v640_v46  ;;  %v5738_v35 = vpop.f32.mrf.mxu0  ;;  %v4159_v46 = vld [vmem:[%s6710_s3 + $0x1e8] sm:$0xff] }
 0x185   : > { %4298 = vmatprep.subr.msk.mxu1 %vm925_vm2, %v749_v47  ;;  %v4191_v47 = vld [vmem:[%s6710_s3 + $0x258] sm:$0xff] }
 0x186   : > { %4145 = vmatmul.mubr.msk.f32.gmra.mxu0 %vm876_vm3, %v4127_v39  ;;  %4165 = vmatmul.mubr.msk.f32.gmra.mxu1 %vm876_vm3, %v4147_v22  ;;  %v5750_v39 = vpop.f32.mrf.mxu0  ;;  %v4160_v22 = vld [vmem:[%s6710_s3 + $0x1f0] sm:$0xff] }
 0x187   : > { %2139 = vmatprep.mubr.f32.mxu1 %v4519_v10  ;;  %2389 = vmatprep.mubr.f32.mxu0 %v4519_v10 }
 0x188   : > { %v5762_v50 = vpop.f32.mrf.mxu0 }
 0x18a   : > { %4166 = vmatmul.mubr.msk.f32.gmra.mxu1 %vm876_vm3, %v4148_v51  ;;  %4198 = vmatmul.mubr.msk.f32.vlgmr.msra.gmra.mxu0 %vm876_vm3, %v4180_v42  ;;  %v4161_v51 = vld [vmem:[%s6710_s3 + $0x1f8] sm:$0xff]  ;;  %v4193_v42 = vld [vmem:[%s6710_s3 + $0x268] sm:$0xff] }
 0x18b   : > { %2145 = vmatprep.mubr.f32.mxu1 %v4519_v10  ;;  %2395 = vmatprep.mubr.f32.mxu0 %v4519_v10 }
 0x18c   : > { %4265 = vmatpush1.msk.msra.mxu0 %vm925_vm2, %v694_v52  ;;  %v5774_v52 = vpop.f32.mrf.mxu0 }
 0x18d   : > { %4332 = vmatprep.subr.msk.mxu0 %vm925_vm2, %v803_v53  ;;  %v709_v53 = vsel %vm708_vm6, %v5552_v37, %v5550_v34 }
 0x18e   : > { %4167 = vmatmul.mubr.msk.f32.gmra.mxu1 %vm876_vm3, %v4149_v41  ;;  %4199 = vmatmul.mubr.msk.f32.gmra.mxu0 %vm876_vm3, %v4181_v58  ;;  %v4194_v41 = vld [vmem:[%s6710_s3 + $0x270] sm:$0xff]  ;;  %v4214_v58 = vld [vmem:[%s6710_s3 + $0x280] sm:$0xff]  ;;  %v748_v34 = vmul.f32 %v4999_v59, %v709_v53  ;;  %v763_v59 = vsel %vm762_vm9, %v5590_v19, %v5588_v48 }
 0x18f   : > { %2151 = vmatprep.mubr.f32.mxu1 %v4519_v10  ;;  %2401 = vmatprep.mubr.f32.mxu0 %v4519_v10  ;;  %v802_v48 = vmul.f32 %v5113_v55, %v763_v59  ;;  %v4217_v55 = vld [vmem:[%s6710_s3 + $0x298] sm:$0xff] }
 0x192   : > { %4168 = vmatmul.mubr.msk.f32.gmra.mxu1 %vm876_vm3, %v4150_v40  ;;  %4200 = vmatmul.mubr.msk.f32.gmra.mxu0 %vm876_vm3, %v4182_v56  ;;  %v5790_v40 = vpop.f32.mrf.mxu0  ;;  %v4195_v56 = vld [vmem:[%s6710_s3 + $0x278] sm:$0xff] }
 0x193   : > { %2157 = vmatprep.mubr.f32.mxu1 %v4519_v10  ;;  %2407 = vmatprep.mubr.f32.mxu0 %v4519_v10 }
 0x196   : > { %4169 = vmatmul.mubr.msk.f32.gmra.mxu1 %vm876_vm3, %v4151_v29  ;;  %4201 = vmatmul.mubr.msk.f32.gmra.mxu0 %vm876_vm3, %v4183_v21  ;;  %v4215_v29 = vld [vmem:[%s6710_s3 + $0x288] sm:$0xff] }
 0x197   : > { %2163 = vmatprep.mubr.f32.mxu1 %v4519_v10  ;;  %2413 = vmatprep.mubr.f32.mxu0 %v4519_v10 }
 0x19a   : > { %4170 = vmatmul.mubr.msk.f32.gmra.mxu1 %vm876_vm3, %v4152_v5  ;;  %4202 = vmatmul.mubr.msk.f32.gmra.mxu0 %vm876_vm3, %v4184_v11  ;;  %v5803_v5 = vpop.f32.mrf.mxu0 }
 0x19b   : > { %2169 = vmatprep.mubr.f32.mxu1 %v4519_v10  ;;  %2419 = vmatprep.mubr.f32.mxu0 %v4519_v10 }
 0x19e   : > { %4171 = vmatmul.mubr.msk.f32.gmra.mxu1 %vm876_vm3, %v4153_v2  ;;  %4203 = vmatmul.mubr.msk.f32.gmra.mxu0 %vm876_vm3, %v4185_v0  ;;  %v4216_v2 = vld [vmem:[%s6710_s3 + $0x290] sm:$0xff]  ;;  %v4248_v0 = vld [vmem:[%s6710_s3 + $0x300] sm:$0xff] }
 0x19f   : > { %2175 = vmatprep.mubr.f32.mxu1 %v4519_v10  ;;  %2425 = vmatprep.mubr.f32.mxu0 %v4519_v10 }
 0x1a2   : > { %4172 = vmatmul.mubr.msk.f32.gmra.mxu1 %vm876_vm3, %v4154_v3  ;;  %4204 = vmatmul.mubr.msk.f32.gmra.mxu0 %vm876_vm3, %v4186_v6  ;;  %v5820_v3 = vpop.f32.mrf.mxu0 }
 0x1a3   : > { %2181 = vmatprep.mubr.f32.mxu1 %v4519_v10  ;;  %2431 = vmatprep.mubr.f32.mxu0 %v4519_v10 }
 0x1a6   : > { %4173 = vmatmul.mubr.msk.f32.gmra.mxu1 %vm876_vm3, %v4155_v8  ;;  %4205 = vmatmul.mubr.msk.f32.gmra.mxu0 %vm876_vm3, %v4187_v23 }
 0x1a7   : > { %2187 = vmatprep.mubr.f32.mxu1 %v4519_v10  ;;  %2437 = vmatprep.mubr.f32.mxu0 %v4519_v10 }
 0x1aa   : > { %4174 = vmatmul.mubr.msk.f32.gmra.mxu1 %vm876_vm3, %v4156_v9  ;;  %4206 = vmatmul.mubr.msk.f32.gmra.mxu0 %vm876_vm3, %v4188_v27 }
 0x1ab   : > { %2193 = vmatprep.mubr.f32.mxu1 %v4519_v10  ;;  %2443 = vmatprep.mubr.f32.mxu0 %v4519_v10 }
 0x1ae   : > { %4175 = vmatmul.mubr.msk.f32.gmra.mxu1 %vm876_vm3, %v4157_v32  ;;  %4207 = vmatmul.mubr.msk.f32.gmra.mxu0 %vm876_vm3, %v4189_v33 }
 0x1af   : > { %2199 = vmatprep.mubr.f32.mxu1 %v4519_v10  ;;  %2449 = vmatprep.mubr.f32.mxu0 %v4519_v10 }
 0x1b2   : > { %4176 = vmatmul.mubr.msk.f32.gmra.mxu1 %vm876_vm3, %v4158_v44  ;;  %4208 = vmatmul.mubr.msk.f32.gmra.mxu0 %vm876_vm3, %v4190_v45 }
 0x1b3   : > { %2205 = vmatprep.mubr.f32.mxu1 %v4519_v10  ;;  %2455 = vmatprep.mubr.f32.mxu0 %v4519_v10 }
 0x1b6   : > { %4177 = vmatmul.mubr.msk.f32.gmra.mxu1 %vm876_vm3, %v4159_v46  ;;  %4209 = vmatmul.mubr.msk.f32.gmra.mxu0 %vm876_vm3, %v4191_v47 }
 0x1b7   : > { %2211 = vmatprep.mubr.f32.mxu1 %v4519_v10  ;;  %2461 = vmatprep.mubr.f32.mxu0 %v4519_v10 }
 0x1ba   : > { %4178 = vmatmul.mubr.msk.f32.gmra.mxu1 %vm876_vm3, %v4160_v22  ;;  %4210 = vmatmul.mubr.msk.f32.gmra.mxu0 %vm876_vm3, %v4192_v49  ;;  %v4250_v22 = vld [vmem:[%s6710_s3 + $0x310] sm:$0xff] }
 0x1bb   : > { %2217 = vmatprep.mubr.f32.mxu1 %v4519_v10  ;;  %2467 = vmatprep.mubr.f32.mxu0 %v4519_v10 }
 0x1be   : > { %4179 = vmatmul.mubr.msk.f32.gmra.mxu1 %vm876_vm3, %v4161_v51  ;;  %4211 = vmatmul.mubr.msk.f32.gmra.mxu0 %vm876_vm3, %v4193_v42  ;;  %v4524_v42 = vmov 0  }
 0x1bf   : > { %2473 = vmatprep.mubr.f32.mxu0 %v4519_v10  ;;  %2653 = vmatprep.mubr.f32.mxu1 %v4519_v10 }
 0x1c0   : > { %4375 = vset.pattern.permute.xlu0 %v4524_v42  ;;  %4376 = vset.pattern.permute.xlu1 %v4524_v42 }
 0x1c1   : > { %v1208_v37 = vpop.f32.mrf.mxu1 }
 0x1c2   : > { %4212 = vmatmul.mubr.msk.f32.gmra.mxu0 %vm876_vm3, %v4194_v41  ;;  %4232 = vmatmul.mubr.msk.f32.vlgmr.msra.gmra.mxu1 %vm876_vm3, %v4214_v58  ;;  %v1209_v19 = vadd.f32 %v1208_v37, %v5418_v54  ;;  %v4249_v54 = vld [vmem:[%s6710_s3 + $0x308] sm:$0xff] }
 0x1c3   : > { %2479 = vmatprep.mubr.f32.mxu0 %v4519_v10  ;;  %2659 = vmatprep.mubr.f32.mxu1 %v4519_v10  ;;  %v1210_v21 = vpop.f32.mrf.mxu1  ;;  %v3575_v37 = vld [vmem:[%s6712_s5 + $0x8] sm:$0xff] }
 0x1c4   : > { %4299 = vmatpush1.msk.msra.mxu1 %vm925_vm2, %v748_v34  ;;  %v1211_v23 = vadd.f32 %v1210_v21, %v5428_v62  ;;  %v4251_v21 = vld [vmem:[%s6710_s3 + $0x318] sm:$0xff]  ;;  %3597 = vperm.xlu1 %4376, %v3575_v37  }
 0x1c5   : > { %v1214_v11 = vpop.f32.mrf.mxu1 }
 0x1c6   : > { %4213 = vmatmul.mubr.msk.f32.gmra.mxu0 %vm876_vm3, %v4195_v56  ;;  %4233 = vmatmul.mubr.msk.f32.gmra.mxu1 %vm876_vm3, %v4215_v29  ;;  %v1215_v62 = vadd.f32 %v1214_v11, %v5432_v63  ;;  %v4218_v63 = vld [vmem:[%s6710_s3 + $0x2a0] sm:$0xff] }
 0x1c7   : > { %2665 = vmatprep.mubr.f32.mxu1 %v4519_v10  ;;  %2917 = vmatprep.mubr.f32.mxu0 %v4519_v10  ;;  %v1216_v14 = vpop.f32.mrf.mxu1 }
 0x1c8   : > { %v1217_v46 = vadd.f32 %v1216_v14, %v5442_v30  ;;  %v3574_v30 = vld [vmem:[%s6712_s5] sm:$0xff] }
 0x1c9   : > { %v1220_v6 = vpop.f32.mrf.mxu1  ;;  %3592 = vperm.xlu0 %4375, %v3574_v30  }
 0x1ca   : > { %v1369_v8 = vpop.f32.mrf.mxu0  ;;  %4234 = vmatmul.mubr.msk.f32.gmra.mxu1 %vm876_vm3, %v4216_v2  ;;  %4266 = vmatmul.mubr.msk.f32.vlgmr.msra.gmra.mxu0 %vm876_vm3, %v4248_v0  ;;  %v1221_v53 = vadd.f32 %v1220_v6, %v5454_v16  ;;  %v4219_v16 = vld [vmem:[%s6710_s3 + $0x2a8] sm:$0xff] }
 0x1cb   : > { %v5827_v9 = vadd.f32 %v1369_v8, %v1209_v19  ;;  %2671 = vmatprep.mubr.f32.mxu1 %v4519_v10  ;;  %2923 = vmatprep.mubr.f32.mxu0 %v4519_v10  ;;  %v1222_v27 = vpop.f32.mrf.mxu1  ;;  %v3577_v19 = vld [vmem:[%s6712_s5 + $0x18] sm:$0xff] }
 0x1cc   : > { %v1371_v32 = vpop.f32.mrf.mxu0  ;;  %4333 = vmatpush1.msk.msra.mxu0 %vm925_vm2, %v802_v48  ;;  %v1223_v56 = vadd.f32 %v1222_v27, %v5466_v12  ;;  %v3576_v48 = vld [vmem:[%s6712_s5 + $0x10] sm:$0xff] }
 0x1cd   : > { %v5839_v33 = vadd.f32 %v1371_v32, %v1211_v23  ;;  %v4252_v23 = vld [vmem:[%s6710_s3 + $0x320] sm:$0xff]  ;;  %3602 = vperm.xlu1 %4376, %v3576_v48   ;;  %3607 = vperm.xlu0 %4375, %v3577_v19   ;;  %v3583_v48 = vld [vmem:[%s6712_s5 + $0x48] sm:$0xff] }
 0x1ce   : > { %v1226_v44 = vpop.f32.mrf.mxu1  ;;  %v1375_v45 = vpop.f32.mrf.mxu0  ;;  %4235 = vmatmul.mubr.msk.f32.gmra.mxu1 %vm876_vm3, %v4217_v55  ;;  %4267 = vmatmul.mubr.msk.f32.gmra.mxu0 %vm876_vm3, %v4249_v54 }
 0x1cf   : > { %v5844_v47 = vadd.f32 %v1375_v45, %v1215_v62  ;;  %2677 = vmatprep.mubr.f32.mxu1 %v4519_v10  ;;  %2929 = vmatprep.mubr.f32.mxu0 %v4519_v10  ;;  %v1227_v2 = vadd.f32 %v1226_v44, %v5478_v4  ;;  %v4220_v4 = vld [vmem:[%s6710_s3 + $0x2b0] sm:$0xff]  ;;  %v3578_v44 = vld [vmem:[%s6712_s5 + $0x20] sm:$0xff]  ;;  %v3579_v45 = vld [vmem:[%s6712_s5 + $0x28] sm:$0xff] }
 0x1d0   : > { %v1228_v49 = vpop.f32.mrf.mxu1  ;;  %v1377_v51 = vpop.f32.mrf.mxu0 }
 0x1d1   : > { %v5858_v41 = vadd.f32 %v1377_v51, %v1217_v46  ;;  %v1229_v6 = vadd.f32 %v1228_v49, %v5490_v17  ;;  %3612 = vperm.xlu1 %4376, %v3578_v44   ;;  %3617 = vperm.xlu0 %4375, %v3579_v45   ;;  %v3585_v44 = vld [vmem:[%s6712_s5 + $0x58] sm:$0xff] }
 0x1d2   : > { %v1232_v58 = vpop.f32.mrf.mxu1  ;;  %v1381_v34 = vpop.f32.mrf.mxu0  ;;  %4236 = vmatmul.mubr.msk.f32.gmra.mxu1 %vm876_vm3, %v4218_v63  ;;  %4268 = vmatmul.mubr.msk.f32.gmra.mxu0 %vm876_vm3, %v4250_v22  ;;  %v4253_v22 = vld [vmem:[%s6710_s3 + $0x328] sm:$0xff] }
 0x1d3   : > { %v5866_v29 = vadd.f32 %v1381_v34, %v1221_v53  ;;  %2683 = vmatprep.mubr.f32.mxu1 %v4519_v10  ;;  %2935 = vmatprep.mubr.f32.mxu0 %v4519_v10  ;;  %v1233_v17 = vadd.f32 %v1232_v58, %v5502_v18  ;;  %v4221_v18 = vld [vmem:[%s6710_s3 + $0x2b8] sm:$0xff]  ;;  %v3580_v58 = vld [vmem:[%s6712_s5 + $0x30] sm:$0xff] }
 0x1d4   : > { %v1234_v59 = vpop.f32.mrf.mxu1  ;;  %v1383_v11 = vpop.f32.mrf.mxu0  ;;  %v3581_v34 = vld [vmem:[%s6712_s5 + $0x38] sm:$0xff] }
 0x1d5   : > { %v5877_v12 = vadd.f32 %v1383_v11, %v1223_v56  ;;  %v1235_v46 = vadd.f32 %v1234_v59, %v5514_v24  ;;  %3622 = vperm.xlu1 %4376, %v3580_v58   ;;  %3627 = vperm.xlu0 %4375, %v3581_v34   ;;  %v3587_v58 = vld [vmem:[%s6712_s5 + $0x68] sm:$0xff] }
 0x1d6   : > { %v1238_v0 = vpop.f32.mrf.mxu1  ;;  %v1387_v14 = vpop.f32.mrf.mxu0  ;;  %4237 = vmatmul.mubr.msk.f32.gmra.mxu1 %vm876_vm3, %v4219_v16  ;;  %4269 = vmatmul.mubr.msk.f32.gmra.mxu0 %vm876_vm3, %v4251_v21  ;;  %v4254_v16 = vld [vmem:[%s6710_s3 + $0x330] sm:$0xff] }
 0x1d7   : > { %v5888_v8 = vadd.f32 %v1387_v14, %v1227_v2  ;;  %2689 = vmatprep.mubr.f32.mxu1 %v4519_v10  ;;  %2941 = vmatprep.mubr.f32.mxu0 %v4519_v10  ;;  %v1239_v24 = vadd.f32 %v1238_v0, %v5526_v26  ;;  %v4222_v26 = vld [vmem:[%s6710_s3 + $0x2c0] sm:$0xff] }
 0x1d8   : > { %v1240_v55 = vpop.f32.mrf.mxu1  ;;  %v1389_v54 = vpop.f32.mrf.mxu0  ;;  %v3582_v14 = vld [vmem:[%s6712_s5 + $0x40] sm:$0xff] }
 0x1d9   : > { %v5899_v27 = vadd.f32 %v1389_v54, %v1229_v6  ;;  %v1241_v37 = vadd.f32 %v1240_v55, %v5538_v31  ;;  %3632 = vperm.xlu1 %4376, %v3582_v14   ;;  %3637 = vperm.xlu0 %4375, %v3583_v48   ;;  %v3589_v14 = vld [vmem:[%s6712_s5 + $0x78] sm:$0xff] }
 0x1da   : > { %v1244_v32 = vpop.f32.mrf.mxu1  ;;  %v1393_v62 = vpop.f32.mrf.mxu0  ;;  %4238 = vmatmul.mubr.msk.f32.gmra.mxu1 %vm876_vm3, %v4220_v4  ;;  %4270 = vmatmul.mubr.msk.f32.gmra.mxu0 %vm876_vm3, %v4252_v23  ;;  %v4255_v4 = vld [vmem:[%s6710_s3 + $0x338] sm:$0xff] }
 0x1db   : > { %v5910_v63 = vadd.f32 %v1393_v62, %v1233_v17  ;;  %2695 = vmatprep.mubr.f32.mxu1 %v4519_v10  ;;  %2947 = vmatprep.mubr.f32.mxu0 %v4519_v10  ;;  %v1245_v31 = vadd.f32 %v1244_v32, %v5554_v38  ;;  %v4223_v38 = vld [vmem:[%s6710_s3 + $0x2c8] sm:$0xff]  ;;  %v3584_v62 = vld [vmem:[%s6712_s5 + $0x50] sm:$0xff] }
 0x1dc   : > { %v1246_v49 = vpop.f32.mrf.mxu1  ;;  %v1395_v51 = vpop.f32.mrf.mxu0 }
 0x1dd   : > { %v5921_v42 = vadd.f32 %v1395_v51, %v1235_v46  ;;  %v1247_v19 = vadd.f32 %v1246_v49, %v5574_v36  ;;  %3642 = vperm.xlu1 %4376, %v3584_v62   ;;  %3647 = vperm.xlu0 %4375, %v3585_v44   ;;  %v4259_v44 = vld [vmem:[%s6710_s3 + $0x358] sm:$0xff] }
 0x1de   : > { %v1250_v30 = vpop.f32.mrf.mxu1  ;;  %v1399_v53 = vpop.f32.mrf.mxu0  ;;  %4239 = vmatmul.mubr.msk.f32.gmra.mxu1 %vm876_vm3, %v4221_v18  ;;  %4271 = vmatmul.mubr.msk.f32.gmra.mxu0 %vm876_vm3, %v4253_v22  ;;  %v4256_v18 = vld [vmem:[%s6710_s3 + $0x340] sm:$0xff] }
 0x1df   : > { %v5932_v56 = vadd.f32 %v1399_v53, %v1239_v24  ;;  %2701 = vmatprep.mubr.f32.mxu1 %v4519_v10  ;;  %2953 = vmatprep.mubr.f32.mxu0 %v4519_v10  ;;  %v1251_v36 = vadd.f32 %v1250_v30, %v5592_v60  ;;  %v4224_v60 = vld [vmem:[%s6710_s3 + $0x2d0] sm:$0xff]  ;;  %v3586_v53 = vld [vmem:[%s6712_s5 + $0x60] sm:$0xff] }
 0x1e0   : > { %v1252_v21 = vpop.f32.mrf.mxu1  ;;  %v1401_v59 = vpop.f32.mrf.mxu0 }
 0x1e1   : > { %v5943_v11 = vadd.f32 %v1401_v59, %v1241_v37  ;;  %v1253_v45 = vadd.f32 %v1252_v21, %v5614_v20  ;;  %3652 = vperm.xlu1 %4376, %v3586_v53   ;;  %3657 = vperm.xlu0 %4375, %v3587_v58  }
 0x1e2   : > { %v1256_v2 = vpop.f32.mrf.mxu1  ;;  %v1405_v0 = vpop.f32.mrf.mxu0  ;;  %4240 = vmatmul.mubr.msk.f32.gmra.mxu1 %vm876_vm3, %v4222_v26  ;;  %4272 = vmatmul.mubr.msk.f32.gmra.mxu0 %vm876_vm3, %v4254_v16  ;;  %v4257_v26 = vld [vmem:[%s6710_s3 + $0x348] sm:$0xff] }
 0x1e3   : > { %v5954_v6 = vadd.f32 %v1405_v0, %v1245_v31  ;;  %2707 = vmatprep.mubr.f32.mxu1 %v4519_v10  ;;  %2959 = vmatprep.mubr.f32.mxu0 %v4519_v10  ;;  %v1257_v20 = vadd.f32 %v1256_v2, %v5628_v57  ;;  %v4225_v57 = vld [vmem:[%s6710_s3 + $0x2d8] sm:$0xff]  ;;  %v3588_v0 = vld [vmem:[%s6712_s5 + $0x70] sm:$0xff] }
 0x1e4   : > { %v1258_v23 = vpop.f32.mrf.mxu1  ;;  %v1407_v55 = vpop.f32.mrf.mxu0 }
 0x1e5   : > { %v5965_v54 = vadd.f32 %v1407_v55, %v1247_v19  ;;  %v1259_v34 = vadd.f32 %v1258_v23, %v5642_v61  ;;  %3662 = vperm.xlu1 %4376, %v3588_v0   ;;  %3667 = vperm.xlu0 %4375, %v3589_v14  }
 0x1e6   : > { %v1262_v17 = vpop.f32.mrf.mxu1  ;;  %v1411_v32 = vpop.f32.mrf.mxu0  ;;  %4241 = vmatmul.mubr.msk.f32.gmra.mxu1 %vm876_vm3, %v4223_v38  ;;  %4273 = vmatmul.mubr.msk.f32.gmra.mxu0 %vm876_vm3, %v4255_v4  ;;  %v4258_v38 = vld [vmem:[%s6710_s3 + $0x350] sm:$0xff] }
 0x1e7   : > { %v5976_v46 = vadd.f32 %v1411_v32, %v1251_v36  ;;  %2713 = vmatprep.mubr.f32.mxu1 %v4519_v10  ;;  %2965 = vmatprep.mubr.f32.mxu0 %v4519_v10  ;;  %v1263_v61 = vadd.f32 %v1262_v17, %v5654_v15  ;;  %v4226_v15 = vld [vmem:[%s6710_s3 + $0x2e0] sm:$0xff] }
 0x1e8   : > { %v1264_v22 = vpop.f32.mrf.mxu1  ;;  %v1413_v49 = vpop.f32.mrf.mxu0 }
 0x1e9   : > { %v5987_v51 = vadd.f32 %v1413_v49, %v1253_v45  ;;  %v1265_v48 = vadd.f32 %v1264_v22, %v5666_v1 }
 0x1ea   : > { %v1268_v24 = vpop.f32.mrf.mxu1  ;;  %v1417_v30 = vpop.f32.mrf.mxu0  ;;  %4242 = vmatmul.mubr.msk.f32.gmra.mxu1 %vm876_vm3, %v4224_v60  ;;  %4274 = vmatmul.mubr.msk.f32.gmra.mxu0 %vm876_vm3, %v4256_v18 }
 0x1eb   : > { %v5998_v37 = vadd.f32 %v1417_v30, %v1257_v20  ;;  %2719 = vmatprep.mubr.f32.mxu1 %v4519_v10  ;;  %2971 = vmatprep.mubr.f32.mxu0 %v4519_v10  ;;  %v1269_v1 = vadd.f32 %v1268_v24, %v5678_v13  ;;  %v4227_v13 = vld [vmem:[%s6710_s3 + $0x2e8] sm:$0xff]  ;;  %v4260_v30 = vld [vmem:[%s6710_s3 + $0x360] sm:$0xff] }
 0x1ec   : > { %v1270_v16 = vpop.f32.mrf.mxu1  ;;  %v1419_v21 = vpop.f32.mrf.mxu0 }
 0x1ed   : > { %v6009_v59 = vadd.f32 %v1419_v21, %v1259_v34  ;;  %v1271_v32 = vadd.f32 %v1270_v16, %v5690_v7 }
 0x1ee   : > { %v1274_v31 = vpop.f32.mrf.mxu1  ;;  %v1423_v2 = vpop.f32.mrf.mxu0  ;;  %4243 = vmatmul.mubr.msk.f32.gmra.mxu1 %vm876_vm3, %v4225_v57  ;;  %4275 = vmatmul.mubr.msk.f32.gmra.mxu0 %vm876_vm3, %v4257_v26 }
 0x1ef   : > { %v6020_v19 = vadd.f32 %v1423_v2, %v1263_v61  ;;  %2725 = vmatprep.mubr.f32.mxu1 %v4519_v10  ;;  %2977 = vmatprep.mubr.f32.mxu0 %v4519_v10  ;;  %v1275_v18 = vadd.f32 %v1274_v31, %v5702_v25  ;;  %v4228_v25 = vld [vmem:[%s6710_s3 + $0x2f0] sm:$0xff]  ;;  %v4261_v61 = vld [vmem:[%s6710_s3 + $0x368] sm:$0xff] }
 0x1f0   : > { %v1276_v4 = vpop.f32.mrf.mxu1  ;;  %v1425_v23 = vpop.f32.mrf.mxu0 }
 0x1f1   : > { %v6031_v55 = vadd.f32 %v1425_v23, %v1265_v48  ;;  %v1277_v20 = vadd.f32 %v1276_v4, %v5714_v28  ;;  %v4282_v4 = vld [vmem:[%s6710_s3 + $0x380] sm:$0xff] }
 0x1f2   : > { %v1280_v36 = vpop.f32.mrf.mxu1  ;;  %v1429_v17 = vpop.f32.mrf.mxu0  ;;  %4244 = vmatmul.mubr.msk.f32.gmra.mxu1 %vm876_vm3, %v4226_v15  ;;  %4276 = vmatmul.mubr.msk.f32.gmra.mxu0 %vm876_vm3, %v4258_v38 }
 0x1f3   : > { %v6036_v62 = vadd.f32 %v1429_v17, %v1269_v1  ;;  %2731 = vmatprep.mubr.f32.mxu1 %v4519_v10  ;;  %2983 = vmatprep.mubr.f32.mxu0 %v4519_v10  ;;  %v1281_v34 = vadd.f32 %v1280_v36, %v5726_v43  ;;  %v4229_v43 = vld [vmem:[%s6710_s3 + $0x2f8] sm:$0xff] }
 0x1f4   : > { %v1282_v45 = vpop.f32.mrf.mxu1  ;;  %v1431_v60 = vpop.f32.mrf.mxu0 }
 0x1f5   : > { %v6047_v22 = vadd.f32 %v1431_v60, %v1271_v32  ;;  %v1283_v16 = vadd.f32 %v1282_v45, %v5738_v35 }
 0x1f6   : > { %v1286_v7 = vpop.f32.mrf.mxu1  ;;  %v1435_v49 = vpop.f32.mrf.mxu0  ;;  %4245 = vmatmul.mubr.msk.f32.gmra.mxu1 %vm876_vm3, %v4227_v13  ;;  %4277 = vmatmul.mubr.msk.f32.gmra.mxu0 %vm876_vm3, %v4259_v44 }
 0x1f7   : > { %v6052_v24 = vadd.f32 %v1435_v49, %v1275_v18  ;;  %2737 = vmatprep.mubr.f32.mxu1 %v4519_v10  ;;  %2989 = vmatprep.mubr.f32.mxu0 %v4519_v10  ;;  %v1287_v0 = vadd.f32 %v1286_v7, %v5750_v39  ;;  %v4262_v39 = vld [vmem:[%s6710_s3 + $0x370] sm:$0xff] }
 0x1f8   : > { %v1288_v53 = vpop.f32.mrf.mxu1  ;;  %v1437_v58 = vpop.f32.mrf.mxu0 }
 0x1f9   : > { %v6063_v57 = vadd.f32 %v1437_v58, %v1277_v20  ;;  %v1289_v15 = vadd.f32 %v1288_v53, %v5762_v50 }
 0x1fa   : > { %v1292_v28 = vpop.f32.mrf.mxu1  ;;  %v1441_v26 = vpop.f32.mrf.mxu0  ;;  %4246 = vmatmul.mubr.msk.f32.gmra.mxu1 %vm876_vm3, %v4228_v25  ;;  %4278 = vmatmul.mubr.msk.f32.gmra.mxu0 %vm876_vm3, %v4260_v30 }
 0x1fb   : > { %v6068_v21 = vadd.f32 %v1441_v26, %v1281_v34  ;;  %2743 = vmatprep.mubr.f32.mxu1 %v4519_v10  ;;  %2995 = vmatprep.mubr.f32.mxu0 %v4519_v10  ;;  %v1293_v36 = vadd.f32 %v1292_v28, %v5774_v52  ;;  %v4263_v52 = vld [vmem:[%s6710_s3 + $0x378] sm:$0xff] }
 0x1fc   : > { %v1294_v31 = vpop.f32.mrf.mxu1  ;;  %v1443_v2 = vpop.f32.mrf.mxu0 }
 0x1fd   : > { %v6079_v14 = vadd.f32 %v1443_v2, %v1283_v16  ;;  %v1295_v44 = vadd.f32 %v1294_v31, %v5790_v40  ;;  %v4285_v31 = vld [vmem:[%s6710_s3 + $0x398] sm:$0xff] }
 0x1fe   : > { %v1298_v35 = vpop.f32.mrf.mxu1  ;;  %v1447_v48 = vpop.f32.mrf.mxu0  ;;  %4247 = vmatmul.mubr.msk.f32.gmra.mxu1 %vm876_vm3, %v4229_v43  ;;  %4279 = vmatmul.mubr.msk.f32.gmra.mxu0 %vm876_vm3, %v4261_v61 }
 0x1ff   : > { %v6084_v38 = vadd.f32 %v1447_v48, %v1287_v0  ;;  %3001 = vmatprep.mubr.f32.mxu0 %v4519_v10  ;;  %3181 = vmatprep.mubr.f32.mxu1 %v4519_v10  ;;  %v1299_v40 = vadd.f32 %v1298_v35, %v5803_v5  ;;  %v4284_v5 = vld [vmem:[%s6710_s3 + $0x390] sm:$0xff] }
 0x200   : > { %v1300_v23 = vpop.f32.mrf.mxu1  ;;  %v1449_v1 = vpop.f32.mrf.mxu0 }
 0x201   : > { %v1301_v50 = vadd.f32 %v1300_v23, %v5820_v3  ;;  %v6096_v17 = vadd.f32 %v1449_v1, %v1289_v15  ;;  %v4283_v3 = vld [vmem:[%s6710_s3 + $0x388] sm:$0xff]  ;;  %v4318_v23 = vld [vmem:[%s6710_s3 + $0x410] sm:$0xff] }
 0x202   : > { %v1453_v32 = vpop.f32.mrf.mxu0  ;;  %v1601_v13 = vpop.f32.mrf.mxu1  ;;  %4280 = vmatmul.mubr.msk.f32.gmra.mxu0 %vm876_vm3, %v4262_v39  ;;  %4300 = vmatmul.mubr.msk.f32.vlgmr.msra.gmra.mxu1 %vm876_vm3, %v4282_v4 }
 0x203   : > { %v6101_v45 = vadd.f32 %v1453_v32, %v1293_v36  ;;  %v1696_v60 = vadd.f32 %v1601_v13, %v5827_v9  ;;  %3007 = vmatprep.mubr.f32.mxu0 %v4519_v10  ;;  %3187 = vmatprep.mubr.f32.mxu1 %v4519_v10 }
 0x204   : > { %v1455_v18 = vpop.f32.mrf.mxu0  ;;  %v1603_v7 = vpop.f32.mrf.mxu1 }
 0x205   : > { %v6113_v49 = vadd.f32 %v1455_v18, %v1295_v44  ;;  %v1697_v9 = vadd.f32 %v1603_v7, %v5839_v33  ;;  %v4316_v33 = vld [vmem:[%s6710_s3 + $0x400] sm:$0xff] }
 0x206   : > { %v1459_v20 = vpop.f32.mrf.mxu0  ;;  %v1607_v25 = vpop.f32.mrf.mxu1  ;;  %4281 = vmatmul.mubr.msk.f32.gmra.mxu0 %vm876_vm3, %v4263_v52  ;;  %4301 = vmatmul.mubr.msk.f32.gmra.mxu1 %vm876_vm3, %v4283_v3  ;;  %v4319_v52 = vld [vmem:[%s6710_s3 + $0x418] sm:$0xff] }
 0x207   : > { %v6118_v30 = vadd.f32 %v1459_v20, %v1299_v40  ;;  %v1698_v53 = vadd.f32 %v1607_v25, %v5844_v47  ;;  %3193 = vmatprep.mubr.f32.mxu1 %v4519_v10  ;;  %3445 = vmatprep.mubr.f32.mxu0 %v4519_v10 }
 0x208   : > { %v1461_v58 = vpop.f32.mrf.mxu0  ;;  %v1609_v34 = vpop.f32.mrf.mxu1 }
 0x209   : > { %v6129_v28 = vadd.f32 %v1461_v58, %v1301_v50  ;;  %v1699_v26 = vadd.f32 %v1609_v34, %v5858_v41  ;;  %v4317_v41 = vld [vmem:[%s6710_s3 + $0x408] sm:$0xff] }
 0x20a   : > { %v1613_v16 = vpop.f32.mrf.mxu1  ;;  %v1865_v47 = vpop.f32.mrf.mxu0  ;;  %4302 = vmatmul.mubr.msk.f32.gmra.mxu1 %vm876_vm3, %v4284_v5  ;;  %4334 = vmatmul.mubr.msk.f32.vlgmr.msra.gmra.mxu0 %vm876_vm3, %v4316_v33 }
 0x20b   : > { %v1700_v43 = vadd.f32 %v1613_v16, %v5866_v29  ;;  %v6135_v61 = vadd.f32 %v1865_v47, %v1696_v60  ;;  %3199 = vmatprep.mubr.f32.mxu1 %v4519_v10  ;;  %3451 = vmatprep.mubr.f32.mxu0 %v4519_v10 }
 0x20c   : > { %v1615_v2 = vpop.f32.mrf.mxu1  ;;  %v1867_v0 = vpop.f32.mrf.mxu0 }
 0x20d   : > { %v1701_v35 = vadd.f32 %v1615_v2, %v5877_v12  ;;  %v6146_v48 = vadd.f32 %v1867_v0, %v1697_v9  ;;  %v4286_v12 = vld [vmem:[%s6710_s3 + $0x3a0] sm:$0xff] }
 0x20e   : > { %v1619_v29 = vpop.f32.mrf.mxu1  ;;  %v1871_v15 = vpop.f32.mrf.mxu0  ;;  %4303 = vmatmul.mubr.msk.f32.gmra.mxu1 %vm876_vm3, %v4285_v31  ;;  %4335 = vmatmul.mubr.msk.f32.gmra.mxu0 %vm876_vm3, %v4317_v41 }
 0x20f   : > { %v1702_v39 = vadd.f32 %v1619_v29, %v5888_v8  ;;  %v6151_v4 = vadd.f32 %v1871_v15, %v1698_v53  ;;  %3205 = vmatprep.mubr.f32.mxu1 %v4519_v10  ;;  %3457 = vmatprep.mubr.f32.mxu0 %v4519_v10  ;;  %v4320_v53 = vld [vmem:[%s6710_s3 + $0x420] sm:$0xff] }
 0x210   : > { %v1621_v1 = vpop.f32.mrf.mxu1  ;;  %v1873_v36 = vpop.f32.mrf.mxu0 }
 0x211   : > { %v1703_v50 = vadd.f32 %v1621_v1, %v5899_v27  ;;  %v6162_v32 = vadd.f32 %v1873_v36, %v1699_v26  ;;  %v4287_v27 = vld [vmem:[%s6710_s3 + $0x3a8] sm:$0xff] }
 0x212   : > { %v1625_v8 = vpop.f32.mrf.mxu1  ;;  %v1877_v13 = vpop.f32.mrf.mxu0  ;;  %4304 = vmatmul.mubr.msk.f32.gmra.mxu1 %vm876_vm3, %v4286_v12  ;;  %4336 = vmatmul.mubr.msk.f32.gmra.mxu0 %vm876_vm3, %v4318_v23 }
 0x213   : > { %v1704_v44 = vadd.f32 %v1625_v8, %v5910_v63  ;;  %v6167_v60 = vadd.f32 %v1877_v13, %v1700_v43  ;;  %3211 = vmatprep.mubr.f32.mxu1 %v4519_v10  ;;  %3463 = vmatprep.mubr.f32.mxu0 %v4519_v10  ;;  %v4321_v43 = vld [vmem:[%s6710_s3 + $0x428] sm:$0xff] }
 0x214   : > { %v1627_v3 = vpop.f32.mrf.mxu1  ;;  %v1879_v18 = vpop.f32.mrf.mxu0 }
 0x215   : > { %v1705_v7 = vadd.f32 %v1627_v3, %v5921_v42  ;;  %v6178_v40 = vadd.f32 %v1879_v18, %v1701_v35  ;;  %v4288_v42 = vld [vmem:[%s6710_s3 + $0x3b0] sm:$0xff] }
 0x216   : > { %v1631_v63 = vpop.f32.mrf.mxu1  ;;  %v1883_v9 = vpop.f32.mrf.mxu0  ;;  %4305 = vmatmul.mubr.msk.f32.gmra.mxu1 %vm876_vm3, %v4287_v27  ;;  %4337 = vmatmul.mubr.msk.f32.gmra.mxu0 %vm876_vm3, %v4319_v52 }
 0x217   : > { %v1706_v20 = vadd.f32 %v1631_v63, %v5932_v56  ;;  %v6183_v25 = vadd.f32 %v1883_v9, %v1702_v39  ;;  %3217 = vmatprep.mubr.f32.mxu1 %v4519_v10  ;;  %3469 = vmatprep.mubr.f32.mxu0 %v4519_v10  ;;  %v4322_v39 = vld [vmem:[%s6710_s3 + $0x430] sm:$0xff] }
 0x218   : > { %v1633_v5 = vpop.f32.mrf.mxu1  ;;  %v1885_v33 = vpop.f32.mrf.mxu0 }
 0x219   : > { %v1707_v58 = vadd.f32 %v1633_v5, %v5943_v11  ;;  %v6194_v34 = vadd.f32 %v1885_v33, %v1703_v50  ;;  %v4289_v11 = vld [vmem:[%s6710_s3 + $0x3b8] sm:$0xff] }
 0x21a   : > { %v1637_v56 = vpop.f32.mrf.mxu1  ;;  %v1889_v26 = vpop.f32.mrf.mxu0  ;;  %4306 = vmatmul.mubr.msk.f32.gmra.mxu1 %vm876_vm3, %v4288_v42  ;;  %4338 = vmatmul.mubr.msk.f32.gmra.mxu0 %vm876_vm3, %v4320_v53 }
 0x21b   : > { %v1708_v16 = vadd.f32 %v1637_v56, %v5954_v6  ;;  %v6199_v47 = vadd.f32 %v1889_v26, %v1704_v44  ;;  %3223 = vmatprep.mubr.f32.mxu1 %v4519_v10  ;;  %3475 = vmatprep.mubr.f32.mxu0 %v4519_v10  ;;  %v4323_v44 = vld [vmem:[%s6710_s3 + $0x438] sm:$0xff] }
 0x21c   : > { %v1639_v31 = vpop.f32.mrf.mxu1  ;;  %v1891_v41 = vpop.f32.mrf.mxu0 }
 0x21d   : > { %v1709_v2 = vadd.f32 %v1639_v31, %v5965_v54  ;;  %v6210_v0 = vadd.f32 %v1891_v41, %v1705_v7  ;;  %v4290_v54 = vld [vmem:[%s6710_s3 + $0x3c0] sm:$0xff] }
 0x21e   : > { %v1643_v6 = vpop.f32.mrf.mxu1  ;;  %v1895_v35 = vpop.f32.mrf.mxu0  ;;  %4307 = vmatmul.mubr.msk.f32.gmra.mxu1 %vm876_vm3, %v4289_v11  ;;  %4339 = vmatmul.mubr.msk.f32.gmra.mxu0 %vm876_vm3, %v4321_v43 }
 0x21f   : > { %v1710_v29 = vadd.f32 %v1643_v6, %v5976_v46  ;;  %v6215_v15 = vadd.f32 %v1895_v35, %v1706_v20  ;;  %3229 = vmatprep.mubr.f32.mxu1 %v4519_v10  ;;  %3481 = vmatprep.mubr.f32.mxu0 %v4519_v10  ;;  %v4324_v20 = vld [vmem:[%s6710_s3 + $0x440] sm:$0xff] }
 0x220   : > { %v1645_v12 = vpop.f32.mrf.mxu1  ;;  %v1897_v23 = vpop.f32.mrf.mxu0 }
 0x221   : > { %v1711_v1 = vadd.f32 %v1645_v12, %v5987_v51  ;;  %v6226_v36 = vadd.f32 %v1897_v23, %v1707_v58  ;;  %v4291_v51 = vld [vmem:[%s6710_s3 + $0x3c8] sm:$0xff] }
 0x222   : > { %v1649_v46 = vpop.f32.mrf.mxu1  ;;  %v1901_v50 = vpop.f32.mrf.mxu0  ;;  %4308 = vmatmul.mubr.msk.f32.gmra.mxu1 %vm876_vm3, %v4290_v54  ;;  %4340 = vmatmul.mubr.msk.f32.gmra.mxu0 %vm876_vm3, %v4322_v39 }
 0x223   : > { %v1712_v8 = vadd.f32 %v1649_v46, %v5998_v37  ;;  %v6231_v13 = vadd.f32 %v1901_v50, %v1708_v16  ;;  %3235 = vmatprep.mubr.f32.mxu1 %v4519_v10  ;;  %3487 = vmatprep.mubr.f32.mxu0 %v4519_v10  ;;  %v4325_v16 = vld [vmem:[%s6710_s3 + $0x448] sm:$0xff] }
 0x224   : > { %v1651_v27 = vpop.f32.mrf.mxu1  ;;  %v1903_v52 = vpop.f32.mrf.mxu0 }
 0x225   : > { %v1713_v3 = vadd.f32 %v1651_v27, %v6009_v59  ;;  %v6242_v18 = vadd.f32 %v1903_v52, %v1709_v2  ;;  %v4292_v59 = vld [vmem:[%s6710_s3 + $0x3d0] sm:$0xff] }
 0x226   : > { %v1655_v37 = vpop.f32.mrf.mxu1  ;;  %v1907_v7 = vpop.f32.mrf.mxu0  ;;  %4309 = vmatmul.mubr.msk.f32.gmra.mxu1 %vm876_vm3, %v4291_v51  ;;  %4341 = vmatmul.mubr.msk.f32.gmra.mxu0 %vm876_vm3, %v4323_v44 }
 0x227   : > { %v1714_v63 = vadd.f32 %v1655_v37, %v6020_v19  ;;  %v6247_v9 = vadd.f32 %v1907_v7, %v1710_v29  ;;  %3241 = vmatprep.mubr.f32.mxu1 %v4519_v10  ;;  %3493 = vmatprep.mubr.f32.mxu0 %v4519_v10  ;;  %v4326_v29 = vld [vmem:[%s6710_s3 + $0x450] sm:$0xff] }
 0x228   : > { %v1657_v42 = vpop.f32.mrf.mxu1  ;;  %v1909_v53 = vpop.f32.mrf.mxu0 }
 0x229   : > { %v1715_v5 = vadd.f32 %v1657_v42, %v6031_v55  ;;  %v6258_v33 = vadd.f32 %v1909_v53, %v1711_v1  ;;  %v4293_v55 = vld [vmem:[%s6710_s3 + $0x3d8] sm:$0xff] }
 0x22a   : > { %v1661_v19 = vpop.f32.mrf.mxu1  ;;  %v1913_v58 = vpop.f32.mrf.mxu0  ;;  %4310 = vmatmul.mubr.msk.f32.gmra.mxu1 %vm876_vm3, %v4292_v59  ;;  %4342 = vmatmul.mubr.msk.f32.gmra.mxu0 %vm876_vm3, %v4324_v20 }
 0x22b   : > { %v1716_v56 = vadd.f32 %v1661_v19, %v6036_v62  ;;  %v6263_v26 = vadd.f32 %v1913_v58, %v1712_v8  ;;  %3247 = vmatprep.mubr.f32.mxu1 %v4519_v10  ;;  %3499 = vmatprep.mubr.f32.mxu0 %v4519_v10  ;;  %v4327_v8 = vld [vmem:[%s6710_s3 + $0x458] sm:$0xff] }
 0x22c   : > { %v1663_v11 = vpop.f32.mrf.mxu1  ;;  %v1915_v43 = vpop.f32.mrf.mxu0 }
 0x22d   : > { %v1717_v31 = vadd.f32 %v1663_v11, %v6047_v22  ;;  %v6274_v41 = vadd.f32 %v1915_v43, %v1713_v3  ;;  %v4294_v22 = vld [vmem:[%s6710_s3 + $0x3e0] sm:$0xff] }
 0x22e   : > { %v1667_v62 = vpop.f32.mrf.mxu1  ;;  %v1919_v2 = vpop.f32.mrf.mxu0  ;;  %4311 = vmatmul.mubr.msk.f32.gmra.mxu1 %vm876_vm3, %v4293_v55  ;;  %4343 = vmatmul.mubr.msk.f32.gmra.mxu0 %vm876_vm3, %v4325_v16 }
 0x22f   : > { %v1718_v6 = vadd.f32 %v1667_v62, %v6052_v24  ;;  %v6279_v35 = vadd.f32 %v1919_v2, %v1714_v63  ;;  %3253 = vmatprep.mubr.f32.mxu1 %v4519_v10  ;;  %3505 = vmatprep.mubr.f32.mxu0 %v4519_v10  ;;  %v4328_v63 = vld [vmem:[%s6710_s3 + $0x460] sm:$0xff] }
 0x230   : > { %v1669_v54 = vpop.f32.mrf.mxu1  ;;  %v1921_v39 = vpop.f32.mrf.mxu0 }
 0x231   : > { %v1719_v12 = vadd.f32 %v1669_v54, %v6063_v57  ;;  %v6290_v23 = vadd.f32 %v1921_v39, %v1715_v5  ;;  %v4295_v57 = vld [vmem:[%s6710_s3 + $0x3e8] sm:$0xff] }
 0x232   : > { %v1673_v24 = vpop.f32.mrf.mxu1  ;;  %v1925_v1 = vpop.f32.mrf.mxu0  ;;  %4312 = vmatmul.mubr.msk.f32.gmra.mxu1 %vm876_vm3, %v4294_v22  ;;  %4344 = vmatmul.mubr.msk.f32.gmra.mxu0 %vm876_vm3, %v4326_v29 }
 0x233   : > { %v1720_v46 = vadd.f32 %v1673_v24, %v6068_v21  ;;  %v6295_v50 = vadd.f32 %v1925_v1, %v1716_v56  ;;  %3259 = vmatprep.mubr.f32.mxu1 %v4519_v10  ;;  %3511 = vmatprep.mubr.f32.mxu0 %v4519_v10  ;;  %v4329_v56 = vld [vmem:[%s6710_s3 + $0x468] sm:$0xff]  ;;  %v4331_v1 = vld [vmem:[%s6710_s3 + $0x478] sm:$0xff] }
 0x234   : > { %v1675_v51 = vpop.f32.mrf.mxu1  ;;  %v1927_v44 = vpop.f32.mrf.mxu0 }
 0x235   : > { %v1721_v27 = vadd.f32 %v1675_v51, %v6079_v14  ;;  %v6306_v52 = vadd.f32 %v1927_v44, %v1717_v31  ;;  %v4296_v14 = vld [vmem:[%s6710_s3 + $0x3f0] sm:$0xff] }
 0x236   : > { %v1679_v21 = vpop.f32.mrf.mxu1  ;;  %v1931_v3 = vpop.f32.mrf.mxu0  ;;  %4313 = vmatmul.mubr.msk.f32.gmra.mxu1 %vm876_vm3, %v4295_v57  ;;  %4345 = vmatmul.mubr.msk.f32.gmra.mxu0 %vm876_vm3, %v4327_v8 }
 0x237   : > { %v1722_v37 = vadd.f32 %v1679_v21, %v6084_v38  ;;  %v6311_v7 = vadd.f32 %v1931_v3, %v1718_v6  ;;  %3265 = vmatprep.mubr.f32.mxu1 %v4519_v10  ;;  %3517 = vmatprep.mubr.f32.mxu0 %v4519_v10  ;;  %v4330_v6 = vld [vmem:[%s6710_s3 + $0x470] sm:$0xff] }
 0x238   : > { %v1681_v59 = vpop.f32.mrf.mxu1  ;;  %v1933_v20 = vpop.f32.mrf.mxu0 }
 0x239   : > { %v1723_v42 = vadd.f32 %v1681_v59, %v6096_v17  ;;  %v6322_v53 = vadd.f32 %v1933_v20, %v1719_v12  ;;  %v4297_v17 = vld [vmem:[%s6710_s3 + $0x3f8] sm:$0xff] }
 0x23a   : > { %v1685_v38 = vpop.f32.mrf.mxu1  ;;  %v1937_v5 = vpop.f32.mrf.mxu0  ;;  %4314 = vmatmul.mubr.msk.f32.gmra.mxu1 %vm876_vm3, %v4296_v14  ;;  %4346 = vmatmul.mubr.msk.f32.gmra.mxu0 %vm876_vm3, %v4328_v63 }
 0x23b   : > { %v1724_v19 = vadd.f32 %v1685_v38, %v6101_v45  ;;  %v6327_v58 = vadd.f32 %v1937_v5, %v1720_v46  ;;  %3271 = vmatprep.mubr.f32.mxu1 %v4519_v10  ;;  %3523 = vmatprep.mubr.f32.mxu0 %v4519_v10 }
 0x23c   : > { %v1687_v55 = vpop.f32.mrf.mxu1  ;;  %v1939_v16 = vpop.f32.mrf.mxu0 }
 0x23d   : > { %v1725_v11 = vadd.f32 %v1687_v55, %v6113_v49  ;;  %v6338_v43 = vadd.f32 %v1939_v16, %v1721_v27 }
 0x23e   : > { %v1691_v45 = vpop.f32.mrf.mxu1  ;;  %v1943_v31 = vpop.f32.mrf.mxu0  ;;  %4315 = vmatmul.mubr.msk.f32.gmra.mxu1 %vm876_vm3, %v4297_v17  ;;  %4347 = vmatmul.mubr.msk.f32.gmra.mxu0 %vm876_vm3, %v4329_v56 }
 0x23f   : > { %v1726_v62 = vadd.f32 %v1691_v45, %v6118_v30  ;;  %v6343_v2 = vadd.f32 %v1943_v31, %v1722_v37  ;;  %3529 = vmatprep.mubr.f32.mxu0 %v4519_v10 }
 0x240   : > { %v1693_v22 = vpop.f32.mrf.mxu1  ;;  %v1945_v49 = vpop.f32.mrf.mxu0 }
 0x241   : > { %v1727_v29 = vadd.f32 %v1693_v22, %v6129_v28  ;;  %v6350_v54 = vadd.f32 %v1945_v49, %v1723_v42 }
 0x242   : > { %v1949_v39 = vpop.f32.mrf.mxu0  ;;  %v2129_v12 = vpop.f32.mrf.mxu1  ;;  %4348 = vmatmul.mubr.msk.f32.gmra.mxu0 %vm876_vm3, %v4330_v6 }
 0x243   : > { %v6353_v24 = vadd.f32 %v1949_v39, %v1724_v19  ;;  %v2224_v30 = vadd.f32 %v2129_v12, %v6135_v61  ;;  %3535 = vmatprep.mubr.f32.mxu0 %v4519_v10 }
 0x244   : > { %v1951_v46 = vpop.f32.mrf.mxu0  ;;  %v2131_v57 = vpop.f32.mrf.mxu1 }
 0x245   : > { %v6360_v8 = vadd.f32 %v1951_v46, %v1725_v11  ;;  %v2225_v28 = vadd.f32 %v2131_v57, %v6146_v48 }
 0x246   : > { %v1955_v51 = vpop.f32.mrf.mxu0  ;;  %v2135_v44 = vpop.f32.mrf.mxu1  ;;  %4349 = vmatmul.mubr.msk.f32.gmra.mxu0 %vm876_vm3, %v4331_v1 }
 0x247   : > { %v6364_v27 = vadd.f32 %v1955_v51, %v1726_v62  ;;  %v2226_v61 = vadd.f32 %v2135_v44, %v6151_v4 }
 0x248   : > { %v1957_v21 = vpop.f32.mrf.mxu0  ;;  %v2137_v10 = vpop.f32.mrf.mxu1 }
 0x249   : > { %v6367_v3 = vadd.f32 %v1957_v21, %v1727_v29  ;;  %v2227_v37 = vadd.f32 %v2137_v10, %v6162_v32 }
 0x24a   : > { %v2141_v14 = vpop.f32.mrf.mxu1  ;;  %v2391_v63 = vpop.f32.mrf.mxu0 }
 0x24b   : > { %v2228_v59 = vadd.f32 %v2141_v14, %v6167_v60  ;;  %v6371_v20 = vadd.f32 %v2391_v63, %v2224_v30 }
 0x24c   : > { %v2143_v48 = vpop.f32.mrf.mxu1  ;;  %v2393_v42 = vpop.f32.mrf.mxu0 }
 0x24d   : > { %v2229_v38 = vadd.f32 %v2143_v48, %v6178_v40  ;;  %v6374_v5 = vadd.f32 %v2393_v42, %v2225_v28 }
 0x24e   : > { %v2147_v19 = vpop.f32.mrf.mxu1  ;;  %v2397_v4 = vpop.f32.mrf.mxu0 }
 0x24f   : > { %v2230_v17 = vadd.f32 %v2147_v19, %v6183_v25  ;;  %v6377_v56 = vadd.f32 %v2397_v4, %v2226_v61 }
 0x250   : > { %v2149_v55 = vpop.f32.mrf.mxu1  ;;  %v2399_v32 = vpop.f32.mrf.mxu0 }
 0x251   : > { %v2231_v16 = vadd.f32 %v2149_v55, %v6194_v34  ;;  %v6380_v11 = vadd.f32 %v2399_v32, %v2227_v37 }
 0x252   : > { %v2153_v60 = vpop.f32.mrf.mxu1  ;;  %v2403_v45 = vpop.f32.mrf.mxu0 }
 0x253   : > { %v2232_v31 = vadd.f32 %v2153_v60, %v6199_v47  ;;  %v6383_v62 = vadd.f32 %v2403_v45, %v2228_v59 }
 0x254   : > { %v2155_v40 = vpop.f32.mrf.mxu1  ;;  %v2405_v6 = vpop.f32.mrf.mxu0 }
 0x255   : > { %v2233_v22 = vadd.f32 %v2155_v40, %v6210_v0  ;;  %v6386_v49 = vadd.f32 %v2405_v6, %v2229_v38 }
 0x256   : > { %v2159_v25 = vpop.f32.mrf.mxu1  ;;  %v2409_v29 = vpop.f32.mrf.mxu0 }
 0x257   : > { %v2234_v39 = vadd.f32 %v2159_v25, %v6215_v15  ;;  %v6389_v12 = vadd.f32 %v2409_v29, %v2230_v17 }
 0x258   : > { %v2161_v34 = vpop.f32.mrf.mxu1  ;;  %v2411_v30 = vpop.f32.mrf.mxu0 }
 0x259   : > { %v2235_v1 = vadd.f32 %v2161_v34, %v6226_v36  ;;  %v6392_v46 = vadd.f32 %v2411_v30, %v2231_v16 }
 0x25a   : > { %v2165_v47 = vpop.f32.mrf.mxu1  ;;  %v2415_v57 = vpop.f32.mrf.mxu0 }
 0x25b   : > { %v2236_v28 = vadd.f32 %v2165_v47, %v6231_v13  ;;  %v6395_v51 = vadd.f32 %v2415_v57, %v2232_v31 }
 0x25c   : > { %v2167_v0 = vpop.f32.mrf.mxu1  ;;  %v2417_v44 = vpop.f32.mrf.mxu0 }
 0x25d   : > { %v2237_v61 = vadd.f32 %v2167_v0, %v6242_v18  ;;  %v6398_v21 = vadd.f32 %v2417_v44, %v2233_v22 }
 0x25e   : > { %v2171_v15 = vpop.f32.mrf.mxu1  ;;  %v2421_v10 = vpop.f32.mrf.mxu0 }
 0x25f   : > { %v2238_v37 = vadd.f32 %v2171_v15, %v6247_v9  ;;  %v6401_v14 = vadd.f32 %v2421_v10, %v2234_v39 }
 0x260   : > { %v2173_v36 = vpop.f32.mrf.mxu1  ;;  %v2423_v63 = vpop.f32.mrf.mxu0 }
 0x261   : > { %v2239_v59 = vadd.f32 %v2173_v36, %v6258_v33  ;;  %v6404_v48 = vadd.f32 %v2423_v63, %v2235_v1 }
 0x262   : > { %v2177_v13 = vpop.f32.mrf.mxu1  ;;  %v2427_v42 = vpop.f32.mrf.mxu0 }
 0x263   : > { %v2240_v38 = vadd.f32 %v2177_v13, %v6263_v26  ;;  %v6407_v19 = vadd.f32 %v2427_v42, %v2236_v28 }
 0x264   : > { %v2179_v18 = vpop.f32.mrf.mxu1  ;;  %v2429_v4 = vpop.f32.mrf.mxu0 }
 0x265   : > { %v2241_v17 = vadd.f32 %v2179_v18, %v6274_v41  ;;  %v6410_v55 = vadd.f32 %v2429_v4, %v2237_v61 }
 0x266   : > { %v2183_v9 = vpop.f32.mrf.mxu1  ;;  %v2433_v32 = vpop.f32.mrf.mxu0 }
 0x267   : > { %v2242_v16 = vadd.f32 %v2183_v9, %v6279_v35  ;;  %v6413_v60 = vadd.f32 %v2433_v32, %v2238_v37 }
 0x268   : > { %v2185_v33 = vpop.f32.mrf.mxu1  ;;  %v2435_v45 = vpop.f32.mrf.mxu0 }
 0x269   : > { %v2243_v31 = vadd.f32 %v2185_v33, %v6290_v23  ;;  %v6416_v40 = vadd.f32 %v2435_v45, %v2239_v59 }
 0x26a   : > { %v2189_v26 = vpop.f32.mrf.mxu1  ;;  %v2439_v6 = vpop.f32.mrf.mxu0 }
 0x26b   : > { %v2244_v22 = vadd.f32 %v2189_v26, %v6295_v50  ;;  %v6419_v25 = vadd.f32 %v2439_v6, %v2240_v38 }
 0x26c   : > { %v2191_v41 = vpop.f32.mrf.mxu1  ;;  %v2441_v29 = vpop.f32.mrf.mxu0 }
 0x26d   : > { %v2245_v39 = vadd.f32 %v2191_v41, %v6306_v52  ;;  %v6422_v34 = vadd.f32 %v2441_v29, %v2241_v17 }
 0x26e   : > { %v2195_v35 = vpop.f32.mrf.mxu1  ;;  %v2445_v30 = vpop.f32.mrf.mxu0 }
 0x26f   : > { %v2246_v1 = vadd.f32 %v2195_v35, %v6311_v7  ;;  %v6425_v47 = vadd.f32 %v2445_v30, %v2242_v16 }
 0x270   : > { %v2197_v23 = vpop.f32.mrf.mxu1  ;;  %v2447_v57 = vpop.f32.mrf.mxu0 }
 0x271   : > { %v2247_v28 = vadd.f32 %v2197_v23, %v6322_v53  ;;  %v6428_v0 = vadd.f32 %v2447_v57, %v2243_v31 }
 0x272   : > { %v2201_v50 = vpop.f32.mrf.mxu1  ;;  %v2451_v44 = vpop.f32.mrf.mxu0 }
 0x273   : > { %v2248_v61 = vadd.f32 %v2201_v50, %v6327_v58  ;;  %v6431_v15 = vadd.f32 %v2451_v44, %v2244_v22 }
 0x274   : > { %v2203_v52 = vpop.f32.mrf.mxu1  ;;  %v2453_v10 = vpop.f32.mrf.mxu0 }
 0x275   : > { %v2249_v37 = vadd.f32 %v2203_v52, %v6338_v43  ;;  %v6434_v36 = vadd.f32 %v2453_v10, %v2245_v39 }
 0x276   : > { %v2207_v7 = vpop.f32.mrf.mxu1  ;;  %v2457_v63 = vpop.f32.mrf.mxu0 }
 0x277   : > { %v2250_v59 = vadd.f32 %v2207_v7, %v6343_v2  ;;  %v6437_v13 = vadd.f32 %v2457_v63, %v2246_v1 }
 0x278   : > { %v2209_v53 = vpop.f32.mrf.mxu1  ;;  %v2459_v42 = vpop.f32.mrf.mxu0 }
 0x279   : > { %v2251_v38 = vadd.f32 %v2209_v53, %v6350_v54  ;;  %v6440_v18 = vadd.f32 %v2459_v42, %v2247_v28 }
 0x27a   : > { %v2213_v58 = vpop.f32.mrf.mxu1  ;;  %v2463_v4 = vpop.f32.mrf.mxu0 }
 0x27b   : > { %v2252_v17 = vadd.f32 %v2213_v58, %v6353_v24  ;;  %v6443_v9 = vadd.f32 %v2463_v4, %v2248_v61 }
 0x27c   : > { %v2215_v43 = vpop.f32.mrf.mxu1  ;;  %v2465_v32 = vpop.f32.mrf.mxu0 }
 0x27d   : > { %v2253_v16 = vadd.f32 %v2215_v43, %v6360_v8  ;;  %v6446_v33 = vadd.f32 %v2465_v32, %v2249_v37 }
 0x27e   : > { %v2219_v2 = vpop.f32.mrf.mxu1  ;;  %v2469_v45 = vpop.f32.mrf.mxu0 }
 0x27f   : > { %v2254_v31 = vadd.f32 %v2219_v2, %v6364_v27  ;;  %v6449_v26 = vadd.f32 %v2469_v45, %v2250_v59 }
 0x280   : > { %v2221_v54 = vpop.f32.mrf.mxu1  ;;  %v2471_v6 = vpop.f32.mrf.mxu0 }
 0x281   : > { %v2255_v22 = vadd.f32 %v2221_v54, %v6367_v3  ;;  %v6452_v41 = vadd.f32 %v2471_v6, %v2251_v38 }
 0x282   : > { %v2475_v24 = vpop.f32.mrf.mxu0  ;;  %v2655_v29 = vpop.f32.mrf.mxu1 }
 0x283   : > { %v6454_v39 = vadd.f32 %v2475_v24, %v2252_v17  ;;  %v2750_v8 = vadd.f32 %v2655_v29, %v6371_v20 }
 0x284   : > { %v2477_v35 = vpop.f32.mrf.mxu0  ;;  %v2657_v30 = vpop.f32.mrf.mxu1 }
 0x285   : > { %v6457_v1 = vadd.f32 %v2477_v35, %v2253_v16  ;;  %v2751_v27 = vadd.f32 %v2657_v30, %v6374_v5 }
 0x286   : > { %v2481_v23 = vpop.f32.mrf.mxu0  ;;  %v2661_v57 = vpop.f32.mrf.mxu1 }
 0x287   : > { %v6460_v28 = vadd.f32 %v2481_v23, %v2254_v31  ;;  %v2752_v3 = vadd.f32 %v2661_v57, %v6377_v56 }
 0x288   : > { %v2483_v50 = vpop.f32.mrf.mxu0  ;;  %v2663_v44 = vpop.f32.mrf.mxu1 }
 0x289   : > { %v6463_v61 = vadd.f32 %v2483_v50, %v2255_v22  ;;  %v2753_v52 = vadd.f32 %v2663_v44, %v6380_v11 }
 0x28a   : > { %v2667_v10 = vpop.f32.mrf.mxu1  ;;  %v2919_v20 = vpop.f32.mrf.mxu0 }
 0x28b   : > { %6716 = vst [vmem:[#allocation2_spill] sm:$0xff] %v6463_v61  ;;  %v2754_v37 = vadd.f32 %v2667_v10, %v6383_v62  ;;  %v6467_v7 = vadd.f32 %v2919_v20, %v2750_v8 }
 0x28c   : > { %v2669_v63 = vpop.f32.mrf.mxu1  ;;  %v2921_v5 = vpop.f32.mrf.mxu0 }
 0x28d   : > { %v2755_v59 = vadd.f32 %v2669_v63, %v6386_v49  ;;  %v6470_v53 = vadd.f32 %v2921_v5, %v2751_v27 }
 0x28e   : > { %v2673_v42 = vpop.f32.mrf.mxu1  ;;  %v2925_v56 = vpop.f32.mrf.mxu0 }
 0x28f   : > { %v2756_v38 = vadd.f32 %v2673_v42, %v6389_v12  ;;  %v6473_v58 = vadd.f32 %v2925_v56, %v2752_v3 }
 0x290   : > { %v2675_v4 = vpop.f32.mrf.mxu1  ;;  %v2927_v11 = vpop.f32.mrf.mxu0 }
 0x291   : > { %v2757_v17 = vadd.f32 %v2675_v4, %v6392_v46  ;;  %v6476_v43 = vadd.f32 %v2927_v11, %v2753_v52 }
 0x292   : > { %v2679_v62 = vpop.f32.mrf.mxu1  ;;  %v2931_v32 = vpop.f32.mrf.mxu0 }
 0x293   : > { %v2758_v16 = vadd.f32 %v2679_v62, %v6395_v51  ;;  %v6479_v2 = vadd.f32 %v2931_v32, %v2754_v37 }
 0x294   : > { %v2681_v49 = vpop.f32.mrf.mxu1  ;;  %v2933_v45 = vpop.f32.mrf.mxu0 }
 0x295   : > { %v2759_v31 = vadd.f32 %v2681_v49, %v6398_v21  ;;  %v6482_v54 = vadd.f32 %v2933_v45, %v2755_v59 }
 0x296   : > { %v2685_v12 = vpop.f32.mrf.mxu1  ;;  %v2937_v6 = vpop.f32.mrf.mxu0 }
 0x297   : > { %v2760_v22 = vadd.f32 %v2685_v12, %v6401_v14  ;;  %v6485_v24 = vadd.f32 %v2937_v6, %v2756_v38 }
 0x298   : > { %v2687_v46 = vpop.f32.mrf.mxu1  ;;  %v2939_v29 = vpop.f32.mrf.mxu0 }
 0x299   : > { %v2761_v8 = vadd.f32 %v2687_v46, %v6404_v48  ;;  %v6488_v35 = vadd.f32 %v2939_v29, %v2757_v17 }
 0x29a   : > { %v2691_v51 = vpop.f32.mrf.mxu1  ;;  %v2943_v30 = vpop.f32.mrf.mxu0 }
 0x29b   : > { %v2762_v27 = vadd.f32 %v2691_v51, %v6407_v19  ;;  %v6491_v23 = vadd.f32 %v2943_v30, %v2758_v16 }
 0x29c   : > { %v2693_v21 = vpop.f32.mrf.mxu1  ;;  %v2945_v57 = vpop.f32.mrf.mxu0 }
 0x29d   : > { %v2763_v3 = vadd.f32 %v2693_v21, %v6410_v55  ;;  %v6494_v50 = vadd.f32 %v2945_v57, %v2759_v31 }
 0x29e   : > { %v2697_v14 = vpop.f32.mrf.mxu1  ;;  %v2949_v44 = vpop.f32.mrf.mxu0 }
 0x29f   : > { %v2764_v52 = vadd.f32 %v2697_v14, %v6413_v60  ;;  %v6497_v10 = vadd.f32 %v2949_v44, %v2760_v22 }
 0x2a0   : > { %v2699_v48 = vpop.f32.mrf.mxu1  ;;  %v2951_v20 = vpop.f32.mrf.mxu0 }
 0x2a1   : > { %v2765_v37 = vadd.f32 %v2699_v48, %v6416_v40  ;;  %v6500_v63 = vadd.f32 %v2951_v20, %v2761_v8 }
 0x2a2   : > { %v2703_v19 = vpop.f32.mrf.mxu1  ;;  %v2955_v5 = vpop.f32.mrf.mxu0 }
 0x2a3   : > { %v2766_v59 = vadd.f32 %v2703_v19, %v6419_v25  ;;  %v6503_v42 = vadd.f32 %v2955_v5, %v2762_v27 }
 0x2a4   : > { %v2705_v55 = vpop.f32.mrf.mxu1  ;;  %v2957_v56 = vpop.f32.mrf.mxu0 }
 0x2a5   : > { %v2767_v38 = vadd.f32 %v2705_v55, %v6422_v34  ;;  %v6506_v4 = vadd.f32 %v2957_v56, %v2763_v3 }
 0x2a6   : > { %v2709_v60 = vpop.f32.mrf.mxu1  ;;  %v2961_v11 = vpop.f32.mrf.mxu0 }
 0x2a7   : > { %v2768_v17 = vadd.f32 %v2709_v60, %v6425_v47  ;;  %v6509_v62 = vadd.f32 %v2961_v11, %v2764_v52 }
 0x2a8   : > { %v2711_v40 = vpop.f32.mrf.mxu1  ;;  %v2963_v32 = vpop.f32.mrf.mxu0 }
 0x2a9   : > { %v2769_v16 = vadd.f32 %v2711_v40, %v6428_v0  ;;  %v6512_v49 = vadd.f32 %v2963_v32, %v2765_v37 }
 0x2aa   : > { %v2715_v25 = vpop.f32.mrf.mxu1  ;;  %v2967_v45 = vpop.f32.mrf.mxu0 }
 0x2ab   : > { %v2770_v31 = vadd.f32 %v2715_v25, %v6431_v15  ;;  %v6515_v12 = vadd.f32 %v2967_v45, %v2766_v59 }
 0x2ac   : > { %v2717_v34 = vpop.f32.mrf.mxu1  ;;  %v2969_v6 = vpop.f32.mrf.mxu0 }
 0x2ad   : > { %v2771_v22 = vadd.f32 %v2717_v34, %v6434_v36  ;;  %v6518_v46 = vadd.f32 %v2969_v6, %v2767_v38 }
 0x2ae   : > { %v2721_v47 = vpop.f32.mrf.mxu1  ;;  %v2973_v29 = vpop.f32.mrf.mxu0 }
 0x2af   : > { %v2772_v8 = vadd.f32 %v2721_v47, %v6437_v13  ;;  %v6521_v51 = vadd.f32 %v2973_v29, %v2768_v17 }
 0x2b0   : > { %v2723_v0 = vpop.f32.mrf.mxu1  ;;  %v2975_v30 = vpop.f32.mrf.mxu0 }
 0x2b1   : > { %v2773_v27 = vadd.f32 %v2723_v0, %v6440_v18  ;;  %v6524_v21 = vadd.f32 %v2975_v30, %v2769_v16 }
 0x2b2   : > { %v6526_v15 = vpop.f32.mrf.mxu1  ;;  %v2979_v57 = vpop.f32.mrf.mxu0 }
 0x2b3   : > { %v6528_v3 = vadd.f32 %v2979_v57, %v2770_v31 }
 0x2b4   : > { %v6530_v36 = vpop.f32.mrf.mxu1  ;;  %v2981_v14 = vpop.f32.mrf.mxu0 }
 0x2b5   : > { %v6532_v44 = vadd.f32 %v2981_v14, %v2771_v22  ;;  %v3593_v22 = vpop.permute.xlu0 %3592 }
 0x2b6   : > { %v6534_v52 = vpop.f32.mrf.mxu1  ;;  %v2985_v13 = vpop.f32.mrf.mxu0 }
 0x2b7   : > { %v6536_v48 = vadd.f32 %v2985_v13, %v2772_v8 }
 0x2b8   : > { %v6538_v20 = vpop.f32.mrf.mxu1  ;;  %v2987_v18 = vpop.f32.mrf.mxu0 }
 0x2b9   : > { %v6540_v37 = vadd.f32 %v2987_v18, %v2773_v27 }
 0x2ba   : > { %v6542_v19 = vpop.f32.mrf.mxu1  ;;  %v6544_v5 = vpop.f32.mrf.mxu0 }
 0x2bb   : > { %6717 = vst [vmem:[#allocation3_spill] sm:$0xff] %v6540_v37 }
 0x2bc   : > { %v6546_v59 = vpop.f32.mrf.mxu1  ;;  %v6548_v55 = vpop.f32.mrf.mxu0 }
 0x2be   : > { %v6550_v56 = vpop.f32.mrf.mxu1  ;;  %v6552_v38 = vpop.f32.mrf.mxu0 }
 0x2c0   : > { %v6554_v60 = vpop.f32.mrf.mxu1  ;;  %v6556_v11 = vpop.f32.mrf.mxu0 }
 0x2c1   : > { %6718 = vst [vmem:[#allocation4_spill] sm:$0xff] %v6554_v60  ;;  %6719 = vst [vmem:[#allocation5_spill] sm:$0xff] %v6556_v11  ;;  %v3598_v60 = vpop.permute.xlu1 %3597 }
 0x2c2   : > { %v6558_v17 = vpop.f32.mrf.mxu0  ;;  %v3183_v40 = vpop.f32.mrf.mxu1 }
 0x2c3   : > { %6720 = vst [vmem:[#allocation6_spill] sm:$0xff] %v6558_v17  ;;  %v3278_v6 = vadd.f32 %v3183_v40, %v6467_v7 }
 0x2c4   : > { %v6560_v32 = vpop.f32.mrf.mxu0  ;;  %v3185_v16 = vpop.f32.mrf.mxu1 }
 0x2c5   : > { %6721 = vst [vmem:[#allocation7_spill] sm:$0xff] %v6560_v32  ;;  %v3279_v8 = vadd.f32 %v3185_v16, %v6470_v53 }
 0x2c6   : > { %v6562_v25 = vpop.f32.mrf.mxu0  ;;  %v3189_v45 = vpop.f32.mrf.mxu1 }
 0x2c7   : > { %6722 = vst [vmem:[#allocation8_spill] sm:$0xff] %v6562_v25  ;;  %v3280_v57 = vadd.f32 %v3189_v45, %v6473_v58 }
 0x2c8   : > { %v6564_v31 = vpop.f32.mrf.mxu0  ;;  %v3191_v34 = vpop.f32.mrf.mxu1 }
 0x2c9   : > { %6723 = vst [vmem:[#allocation9_spill] sm:$0xff] %v6564_v31  ;;  %v3281_v7 = vadd.f32 %v3191_v34, %v6476_v43  ;;  %v3603_v43 = vpop.permute.xlu1 %3602 }
 0x2ca   : > { %v3195_v47 = vpop.f32.mrf.mxu1  ;;  %v3447_v29 = vpop.f32.mrf.mxu0 }
 0x2cb   : > { %v3542_v0 = vadd.f32 %v3447_v29, %v3278_v6  ;;  %v3282_v53 = vadd.f32 %v3195_v47, %v6479_v2 }
 0x2cc   : > { %v3197_v30 = vpop.f32.mrf.mxu1  ;;  %v3449_v27 = vpop.f32.mrf.mxu0 }
 0x2cd   : > { %v3543_v14 = vadd.f32 %v3449_v27, %v3279_v8  ;;  %v3670_v13 = vadd.f32 %v3593_v22, %v3542_v0  ;;  %v3283_v45 = vadd.f32 %v3197_v30, %v6482_v54 }
 0x2ce   : > { %v3201_v18 = vpop.f32.mrf.mxu1  ;;  %v3453_v25 = vpop.f32.mrf.mxu0 }
 0x2cf   : > { %v3671_v32 = vadd.f32 %v3593_v22, %v3543_v14  ;;  %v3702_v17 = vsub.f32 0.0, %v3670_v13  ;;  %v3544_v31 = vadd.f32 %v3453_v25, %v3280_v57  ;;  %v3284_v57 = vadd.f32 %v3201_v18, %v6485_v24 }
 0x2d0   : > { %v3203_v40 = vpop.f32.mrf.mxu1  ;;  %v3455_v61 = vpop.f32.mrf.mxu0 }
 0x2d1   : > { %v3672_v11 = vadd.f32 %v3598_v60, %v3544_v31  ;;  %v3703_v16 = vsub.f32 0.0, %v3671_v32  ;;  %v3710_v6 = vmul.f32 1.442695, %v3702_v17  ;;  %v3545_v29 = vadd.f32 %v3455_v61, %v3281_v7 }
 0x2d2   : > { %v3207_v37 = vpop.f32.mrf.mxu1  ;;  %v3459_v58 = vpop.f32.mrf.mxu0  ;;  %v3285_v2 = vadd.f32 %v3203_v40, %v6488_v35 }
 0x2d3   : > { %v3704_v8 = vsub.f32 0.0, %v3672_v11  ;;  %v3673_v0 = vadd.f32 %v3598_v60, %v3545_v29  ;;  %v3546_v22 = vadd.f32 %v3459_v58, %v3282_v53  ;;  %4378 = vpow2.f32 %v3710_v6  ;;  %v3608_v11 = vpop.permute.xlu0 %3607 }
 0x2d4   : > { %v3209_v27 = vpop.f32.mrf.mxu1  ;;  %v3461_v25 = vpop.f32.mrf.mxu0  ;;  %v3712_v31 = vmul.f32 1.442695, %v3703_v16  ;;  %v3286_v18 = vadd.f32 %v3207_v37, %v6491_v23 }
 0x2d5   : > { %v3547_v34 = vadd.f32 %v3461_v25, %v3283_v45  ;;  %v3674_v32 = vadd.f32 %v3603_v43, %v3546_v22  ;;  %v3714_v47 = vmul.f32 1.442695, %v3704_v8  ;;  %v3705_v14 = vsub.f32 0.0, %v3673_v0 }
 0x2d6   : > { %v3213_v17 = vpop.f32.mrf.mxu1  ;;  %v3465_v61 = vpop.f32.mrf.mxu0  ;;  %4380 = vpow2.f32 %v3712_v31  ;;  %v3287_v8 = vadd.f32 %v3209_v27, %v6494_v50 }
 0x2d7   : > { %v3675_v13 = vadd.f32 %v3603_v43, %v3547_v34  ;;  %v3548_v54 = vadd.f32 %v3465_v61, %v3284_v57  ;;  %v3706_v60 = vsub.f32 0.0, %v3674_v32  ;;  %4382 = vpow2.f32 %v3714_v47 }
 0x2d8   : > { %v3215_v30 = vpop.f32.mrf.mxu1  ;;  %v3467_v7 = vpop.f32.mrf.mxu0  ;;  %v3716_v35 = vmul.f32 1.442695, %v3705_v14  ;;  %v3288_v43 = vadd.f32 %v3213_v17, %v6497_v10 }
 0x2d9   : > { %v3707_v53 = vsub.f32 0.0, %v3675_v13  ;;  %v3549_v29 = vadd.f32 %v3467_v7, %v3285_v2  ;;  %v3676_v24 = vadd.f32 %v3608_v11, %v3548_v54  ;;  %v3718_v45 = vmul.f32 1.442695, %v3706_v60  ;;  %v3613_v2 = vpop.permute.xlu1 %3612  ;;  %v3618_v10 = vpop.permute.xlu0 %3617 }
 0x2da   : > { %v3219_v16 = vpop.f32.mrf.mxu1  ;;  %v3471_v6 = vpop.f32.mrf.mxu0  ;;  %4384 = vpow2.f32 %v3716_v35  ;;  %v3289_v61 = vadd.f32 %v3215_v30, %v6500_v63 }
 0x2db   : > { %v3677_v40 = vadd.f32 %v3608_v11, %v3549_v29  ;;  %v3708_v58 = vsub.f32 0.0, %v3676_v24  ;;  %v3550_v0 = vadd.f32 %v3471_v6, %v3286_v18  ;;  %v3720_v57 = vmul.f32 1.442695, %v3707_v53 }
 0x2dc   : > { %v3221_v22 = vpop.f32.mrf.mxu1  ;;  %v3473_v25 = vpop.f32.mrf.mxu0  ;;  %4386 = vpow2.f32 %v3718_v45  ;;  %v3290_v17 = vadd.f32 %v3219_v16, %v6503_v42 }
 0x2dd   : > { %v3709_v34 = vsub.f32 0.0, %v3677_v40  ;;  %v3678_v31 = vadd.f32 %v3613_v2, %v3550_v0  ;;  %v3551_v32 = vadd.f32 %v3473_v25, %v3287_v8  ;;  %v3722_v47 = vmul.f32 1.442695, %v3708_v58  ;;  %v3623_v25 = vpop.permute.xlu1 %3622 }
 0x2de   : > { %v3225_v23 = vpop.f32.mrf.mxu1  ;;  %v3477_v37 = vpop.f32.mrf.mxu0  ;;  %4388 = vpow2.f32 %v3720_v57  ;;  %v3291_v6 = vadd.f32 %v3221_v22, %v6506_v4 }
 0x2df   : > { %v3552_v14 = vadd.f32 %v3477_v37, %v3288_v43  ;;  %v3750_v13 = vsub.f32 0.0, %v3678_v31  ;;  %v3679_v50 = vadd.f32 %v3613_v2, %v3551_v32  ;;  %v3724_v11 = vmul.f32 1.442695, %v3709_v34 }
 0x2e0   : > { %v3227_v27 = vpop.f32.mrf.mxu1  ;;  %v3479_v54 = vpop.f32.mrf.mxu0  ;;  %4390 = vpow2.f32 %v3722_v47  ;;  %v3292_v42 = vadd.f32 %v3225_v23, %v6509_v62 }
 0x2e1   : > { %v3553_v60 = vadd.f32 %v3479_v54, %v3289_v61  ;;  %v3751_v7 = vsub.f32 0.0, %v3679_v50  ;;  %v3680_v53 = vadd.f32 %v3618_v10, %v3552_v14  ;;  %v4379_v18 = vpop.eup %4378  ;;  %v3758_v63 = vmul.f32 1.442695, %v3750_v13 }
 0x2e2   : > { %v3231_v29 = vpop.f32.mrf.mxu1  ;;  %v3483_v24 = vpop.f32.mrf.mxu0  ;;  %4392 = vpow2.f32 %v3724_v11  ;;  %v3726_v31 = vadd.f32 1.0, %v4379_v18  ;;  %v3293_v32 = vadd.f32 %v3227_v27, %v6512_v49 }
 0x2e3   : > { %v3681_v30 = vadd.f32 %v3618_v10, %v3553_v60  ;;  %v3752_v35 = vsub.f32 0.0, %v3680_v53  ;;  %v3554_v40 = vadd.f32 %v3483_v24, %v3290_v17  ;;  %v3760_v8 = vmul.f32 1.442695, %v3751_v7  ;;  %v4381_v2 = vpop.eup %4380  ;;  %v3628_v27 = vpop.permute.xlu0 %3627 }
 0x2e4   : > { %v3233_v58 = vpop.f32.mrf.mxu1  ;;  %v3485_v45 = vpop.f32.mrf.mxu0  ;;  %4394 = vpow2.f32 %v3758_v63  ;;  %v3727_v54 = vadd.f32 1.0, %v4381_v2  ;;  %v3294_v62 = vadd.f32 %v3231_v29, %v6515_v12  ;;  %v2774_v10 = vadd.f32 %v6526_v15, %v6443_v9 }
 0x2e5   : > { %v3753_v0 = vsub.f32 0.0, %v3681_v30  ;;  %v3682_v16 = vadd.f32 %v3623_v25, %v3554_v40  ;;  %v3555_v57 = vadd.f32 %v3485_v45, %v3291_v6  ;;  %v4383_v4 = vpop.eup %4382  ;;  %v3762_v22 = vmul.f32 1.442695, %v3752_v35 }
 0x2e6   : > { %v3237_v43 = vpop.f32.mrf.mxu1  ;;  %v3489_v34 = vpop.f32.mrf.mxu0  ;;  %4396 = vpow2.f32 %v3760_v8  ;;  %v3728_v49 = vadd.f32 1.0, %v4383_v4  ;;  %v3295_v7 = vadd.f32 %v3233_v58, %v6518_v46  ;;  %v6588_v12 = vadd.f32 %v6530_v36, %v6446_v33 }
 0x2e7   : > { %v3556_v37 = vadd.f32 %v3489_v34, %v3292_v42  ;;  %v3764_v14 = vmul.f32 1.442695, %v3753_v0  ;;  %v3754_v13 = vsub.f32 0.0, %v3682_v16  ;;  %v3683_v23 = vadd.f32 %v3623_v25, %v3555_v57  ;;  %v4385_v17 = vpop.eup %4384  ;;  %v3633_v8 = vpop.permute.xlu1 %3632 }
 0x2e8   : > { %v3239_v61 = vpop.f32.mrf.mxu1  ;;  %v3491_v47 = vpop.f32.mrf.mxu0  ;;  %4398 = vrcp.f32 %v3726_v31  ;;  %v6592_v15 = vadd.f32 %v6534_v52, %v6449_v26  ;;  %v6598_v45 = vadd.f32 %v6538_v20, %v6452_v41  ;;  %v3729_v33 = vadd.f32 1.0, %v4385_v17 }
 0x2e9   : > { %v3557_v50 = vadd.f32 %v3491_v47, %v3293_v32  ;;  %4400 = vpow2.f32 %v3762_v22  ;;  %v3684_v53 = vadd.f32 %v3628_v27, %v3556_v37  ;;  %v4387_v30 = vpop.eup %4386  ;;  %v3766_v29 = vmul.f32 1.442695, %v3754_v13 }
 0x2ea   : > { %v3243_v11 = vpop.f32.mrf.mxu1  ;;  %v3495_v60 = vpop.f32.mrf.mxu0  ;;  %4402 = vpow2.f32 %v3764_v14  ;;  %v3755_v35 = vsub.f32 0.0, %v3683_v23  ;;  %v3296_v36 = vadd.f32 %v3237_v43, %v6521_v51  ;;  %v3730_v25 = vadd.f32 1.0, %v4387_v30 }
 0x2eb   : > { %v3558_v24 = vadd.f32 %v3495_v60, %v3294_v62  ;;  %v3685_v6 = vadd.f32 %v3628_v27, %v3557_v50  ;;  %v4389_v9 = vpop.eup %4388  ;;  %4404 = vrcp.f32 %v3727_v54  ;;  %v3297_v26 = vadd.f32 %v3239_v61, %v6524_v21  ;;  %v3638_v60 = vpop.permute.xlu0 %3637 }
 0x2ec   : > { %v3245_v18 = vpop.f32.mrf.mxu1  ;;  %v3497_v63 = vpop.f32.mrf.mxu0  ;;  %4406 = vrcp.f32 %v3728_v49  ;;  %v3756_v52 = vsub.f32 0.0, %v3684_v53  ;;  %v3731_v34 = vadd.f32 1.0, %v4389_v9  ;;  %v3298_v41 = vadd.f32 %v3243_v11, %v6528_v3 }
 0x2ed   : > { %v3559_v46 = vadd.f32 %v3497_v63, %v3295_v7  ;;  %v4391_v0 = vpop.eup %4390  ;;  %v3686_v42 = vadd.f32 %v3633_v8, %v3558_v24  ;;  %4408 = vpow2.f32 %v3766_v29  ;;  %v3757_v2 = vsub.f32 0.0, %v3685_v6  ;;  %v3643_v53 = vpop.permute.xlu1 %3642 }
 0x2ee   : > { %v6594_v40 = vpop.f32.mrf.mxu1  ;;  %v3501_v58 = vpop.f32.mrf.mxu0  ;;  %v3768_v31 = vmul.f32 1.442695, %v3755_v35  ;;  %v6607_v21 = vadd.f32 %v6542_v19, %v6454_v39  ;;  %v3038_v37 = vadd.f32 %v6544_v5, %v2774_v10  ;;  %4410 = vrcp.f32 %v3729_v33 }
 0x2ef   : > { %v4393_v20 = vpop.eup %4392  ;;  %v3687_v32 = vadd.f32 %v3633_v8, %v3559_v46  ;;  %v3560_v4 = vadd.f32 %v3501_v58, %v3296_v36  ;;  %v3732_v61 = vadd.f32 1.0, %v4391_v0  ;;  %4412 = vrcp.f32 %v3730_v25 }
 0x2f0   : > { %v6602_v16 = vpop.f32.mrf.mxu1  ;;  %v3503_v57 = vpop.f32.mrf.mxu0  ;;  %v3770_v14 = vmul.f32 1.442695, %v3756_v52  ;;  %v3798_v13 = vsub.f32 0.0, %v3686_v42  ;;  %4414 = vrcp.f32 %v3731_v34  ;;  %v3733_v62 = vadd.f32 1.0, %v4393_v20 }
 0x2f1   : > { %v3561_v51 = vadd.f32 %v3503_v57, %v3297_v26  ;;  %v4395_v47 = vpop.eup %4394  ;;  %v3772_v23 = vmul.f32 1.442695, %v3757_v2  ;;  %v3299_v11 = vadd.f32 %v3245_v18, %v6532_v44  ;;  %4416 = vpow2.f32 %v3768_v31  ;;  %v6724_v57 = vld [vmem:[#allocation3_spill] sm:$0xff] }
 0x2f2   : > { %v3255_v43 = vpop.f32.mrf.mxu1  ;;  %v3507_v22 = vpop.f32.mrf.mxu0  ;;  %v3799_v39 = vsub.f32 0.0, %v3687_v32  ;;  %v3688_v19 = vadd.f32 %v3638_v60, %v3560_v4  ;;  %v6613_v17 = vadd.f32 %v6546_v59, %v6457_v1  ;;  %4418 = vrcp.f32 %v3732_v61 }
 0x2f3   : > { %v3562_v3 = vadd.f32 %v3507_v22, %v3298_v41  ;;  %v4397_v49 = vpop.eup %4396  ;;  %v3689_v5 = vadd.f32 %v3638_v60, %v3561_v51  ;;  %v3774_v7 = vadd.f32 1.0, %v4395_v47  ;;  %v3039_v44 = vadd.f32 %v6548_v55, %v6588_v12  ;;  %v3648_v41 = vpop.permute.xlu0 %3647  ;;  %v6725_v47 = vld [vmem:[#allocation5_spill] sm:$0xff] }
 0x2f4   : > { %v3257_v50 = vpop.f32.mrf.mxu1  ;;  %v3509_v54 = vpop.f32.mrf.mxu0  ;;  %4420 = vpow2.f32 %v3770_v14  ;;  %v3806_v18 = vmul.f32 1.442695, %v3798_v13  ;;  %v6621_v35 = vadd.f32 %v6550_v56, %v6460_v28  ;;  %v3775_v1 = vadd.f32 1.0, %v4397_v49 }
 0x2f5   : > { %v3563_v24 = vadd.f32 %v3509_v54, %v3299_v11  ;;  %v6615_v63 = vpop.eup %4398  ;;  %v3690_v30 = vadd.f32 %v3643_v53, %v3562_v3  ;;  %4422 = vrcp.f32 %v3733_v62  ;;  %v3300_v59 = vadd.f32 %v6594_v40, %v6536_v48  ;;  %v6726_v54 = vld [vmem:[#allocation2_spill] sm:$0xff]  ;;  %v6727_v62 = vld [vmem:[#allocation4_spill] sm:$0xff]  ;;  %v3653_v60 = vpop.permute.xlu1 %3652 }
 0x2f6   : > { %v3261_v10 = vpop.f32.mrf.mxu1  ;;  %v3513_v27 = vpop.f32.mrf.mxu0  ;;  %4424 = vpow2.f32 %v3772_v23  ;;  %v3808_v58 = vmul.f32 1.442695, %v3799_v39  ;;  %v3800_v33 = vsub.f32 0.0, %v3688_v19  ;;  %v3801_v55 = vsub.f32 0.0, %v3689_v5  ;;  %v6728_v19 = vld [vmem:[#allocation6_spill] sm:$0xff] }
 0x2f7   : > { %v4401_v9 = vpop.eup %4400  ;;  %v3040_v0 = vadd.f32 %v6552_v38, %v6592_v15  ;;  %4426 = vrcp.f32 %v3774_v7  ;;  %v3691_v28 = vadd.f32 %v3643_v53, %v3563_v24  ;;  %v3564_v56 = vadd.f32 %v3513_v27, %v3300_v59 }
 0x2f8   : > { %v3263_v29 = vpop.f32.mrf.mxu1  ;;  %v3515_v6 = vpop.f32.mrf.mxu0  ;;  %v3776_v26 = vadd.f32 1.0, %v4401_v9  ;;  %4428 = vpow2.f32 %v3806_v18  ;;  %v3302_v48 = vadd.f32 %v3255_v43, %v3038_v37  ;;  %v3802_v40 = vsub.f32 0.0, %v3690_v30 }
 0x2f9   : > { %v4403_v46 = vpop.eup %4402  ;;  %4430 = vrcp.f32 %v3775_v1  ;;  %v3301_v34 = vadd.f32 %v6602_v16, %v6724_v57  ;;  %v3303_v2 = vadd.f32 %v3257_v50, %v3039_v44  ;;  %v3810_v38 = vmul.f32 1.442695, %v3800_v33 }
 0x2fa   : > { %v3267_v12 = vpop.f32.mrf.mxu1  ;;  %v3519_v36 = vpop.f32.mrf.mxu0  ;;  %v3777_v42 = vadd.f32 1.0, %v4403_v46  ;;  %4432 = vpow2.f32 %v3808_v58  ;;  %v3812_v15 = vmul.f32 1.442695, %v3801_v55  ;;  %v3803_v51 = vsub.f32 0.0, %v3691_v28 }
 0x2fb   : > { %v6625_v8 = vpop.eup %4404  ;;  %v3566_v31 = vadd.f32 %v3519_v36, %v3302_v48  ;;  %v3304_v22 = vadd.f32 %v3261_v10, %v3040_v0  ;;  %v3565_v61 = vadd.f32 %v3515_v6, %v3301_v34  ;;  %v3692_v43 = vadd.f32 %v3648_v41, %v3564_v56  ;;  %v6729_v6 = vld [vmem:[#allocation7_spill] sm:$0xff]  ;;  %v3658_v46 = vpop.permute.xlu0 %3657 }
 0x2fc   : > { %v6629_v25 = vpop.eup %4406  ;;  %v3521_v52 = vpop.f32.mrf.mxu0  ;;  %v3041_v14 = vadd.f32 %v6725_v47, %v6598_v45  ;;  %4434 = vrcp.f32 %v3776_v26  ;;  %v3814_v16 = vmul.f32 1.442695, %v3802_v40  ;;  %v2781_v23 = vadd.f32 %v6727_v62, %v6726_v54 }
 0x2fd   : > { %v4409_v20 = vpop.eup %4408  ;;  %v3269_v32 = vpop.f32.mrf.mxu1  ;;  %v3567_v13 = vadd.f32 %v3521_v52, %v3303_v2  ;;  %4436 = vrcp.f32 %v3777_v42  ;;  %v3042_v5 = vadd.f32 %v6728_v19, %v6607_v21  ;;  %v3694_v10 = vadd.f32 %v3653_v60, %v3566_v31  ;;  %v368_v19 = vld [vmem:[%s6658_s9] sm:$0xff] }
 0x2fe   : > { %v3525_v4 = vpop.f32.mrf.mxu0  ;;  %v6633_v37 = vpop.eup %4410  ;;  %v3778_v11 = vadd.f32 1.0, %v4409_v20  ;;  %4438 = vpow2.f32 %v3810_v38  ;;  %v3305_v45 = vadd.f32 %v3263_v29, %v3041_v14  ;;  %v3816_v24 = vmul.f32 1.442695, %v3803_v51  ;;  %v6730_v29 = vld [vmem:[#allocation8_spill] sm:$0xff] }
 0x2ff   : > { %v6637_v50 = vpop.eup %4412  ;;  %v3568_v49 = vadd.f32 %v3525_v4, %v3304_v22  ;;  %v3273_v27 = vpop.f32.mrf.mxu1  ;;  %4440 = vpow2.f32 %v3812_v15  ;;  %v3693_v44 = vadd.f32 %v3648_v41, %v3565_v61  ;;  %v3804_v18 = vsub.f32 0.0, %v3692_v43 }
 0x300   : > { %v3527_v3 = vpop.f32.mrf.mxu0  ;;  %v6641_v39 = vpop.eup %4414  ;;  %v3043_v9 = vadd.f32 %v6729_v6, %v6613_v17  ;;  %4442 = vpow2.f32 %v3814_v16  ;;  %v3306_v1 = vadd.f32 %v3267_v12, %v3042_v5  ;;  %v3695_v59 = vadd.f32 %v3653_v60, %v3567_v13  ;;  %v6731_v12 = vld [vmem:[#allocation9_spill] sm:$0xff] }
 0x301   : > { %v4417_v53 = vpop.eup %4416  ;;  %v3044_v33 = vadd.f32 %v6730_v29, %v6621_v35  ;;  %4444 = vrcp.f32 %v3778_v11  ;;  %v3569_v55 = vadd.f32 %v3527_v3, %v3305_v45  ;;  %v3696_v36 = vadd.f32 %v3658_v46, %v3568_v49  ;;  %v3275_v26 = vpop.f32.mrf.mxu1 }
 0x302   : > { %v3531_v7 = vpop.f32.mrf.mxu0  ;;  %v6645_v30 = vpop.eup %4418  ;;  %v3779_v28 = vadd.f32 1.0, %v4417_v53  ;;  %4446 = vtanh.f32 %v3694_v10  ;;  %v3307_v56 = vadd.f32 %v3269_v32, %v3043_v9  ;;  %v3045_v52 = vadd.f32 %v6731_v12, %v2781_v23 }
 0x303   : > { %v4421_v58 = vpop.eup %4420  ;;  %v3570_v48 = vadd.f32 %v3531_v7, %v3306_v1  ;;  %4448 = vpow2.f32 %v3816_v24  ;;  %v3805_v42 = vsub.f32 0.0, %v3693_v44  ;;  %v3818_v57 = vmul.f32 1.442695, %v3804_v18  ;;  %v3663_v32 = vpop.permute.xlu1 %3662  ;;  %v369_v7 = vld [vmem:[%s6658_s9 + $0x8] sm:$0xff]  ;;  %v370_v18 = vld [vmem:[%s6658_s9 + $0x10] sm:$0xff] }
 0x304   : > { %v3533_v21 = vpop.f32.mrf.mxu0  ;;  %v6651_v0 = vpop.eup %4422  ;;  %v3780_v2 = vadd.f32 1.0, %v4421_v58  ;;  %4450 = vtanh.f32 %v3695_v59  ;;  %v3308_v35 = vadd.f32 %v3273_v27, %v3044_v33  ;;  %v3309_v15 = vadd.f32 %v3275_v26, %v3045_v52 }
 0x305   : > { %v4425_v40 = vpop.eup %4424  ;;  %v3571_v41 = vadd.f32 %v3533_v21, %v3307_v56  ;;  %v3697_v31 = vadd.f32 %v3658_v46, %v3569_v55  ;;  %4452 = vtanh.f32 %v3696_v36  ;;  %v3698_v51 = vadd.f32 %v3663_v32, %v3570_v48  ;;  %v3668_v3 = vpop.permute.xlu0 %3667 }
 0x306   : > { %v3537_v17 = vpop.f32.mrf.mxu0  ;;  %v4427_v34 = vpop.eup %4426  ;;  %4454 = vrcp.f32 %v3779_v28  ;;  %v3820_v43 = vmul.f32 1.442695, %v3805_v42  ;;  %v3781_v13 = vadd.f32 1.0, %v4425_v40  ;;  %v371_v28 = vld [vmem:[%s6658_s9 + $0x18] sm:$0xff]  ;;  %v373_v42 = vld [vmem:[%s6658_s9 + $0x28] sm:$0xff] }
 0x307   : > { %v4429_v38 = vpop.eup %4428  ;;  %v3572_v22 = vadd.f32 %v3537_v17, %v3308_v35  ;;  %4456 = vpow2.f32 %v3818_v57  ;;  %v3699_v14 = vadd.f32 %v3663_v32, %v3571_v41  ;;  %v3854_v24 = vmul.f32 %v4427_v34, %v368_v19  ;;  %v372_v17 = vld [vmem:[%s6658_s9 + $0x20] sm:$0xff] }
 0x308   : > { %v3539_v20 = vpop.f32.mrf.mxu0  ;;  %v4431_v4 = vpop.eup %4430  ;;  %4458 = vrcp.f32 %v3780_v2  ;;  %v3822_v45 = vadd.f32 1.0, %v4429_v38  ;;  %v374_v38 = vld [vmem:[%s6658_s9 + $0x30] sm:$0xff] }
 0x309   : > { %v4433_v61 = vpop.eup %4432  ;;  %v3573_v47 = vadd.f32 %v3539_v20, %v3309_v15  ;;  %4460 = vtanh.f32 %v3697_v31  ;;  %v3700_v62 = vadd.f32 %v3668_v3, %v3572_v22  ;;  %v3855_v46 = vmul.f32 %v4431_v4, %v369_v7  ;;  %v375_v4 = vld [vmem:[%s6658_s9 + $0x38] sm:$0xff] }
 0x30a   : > { %v4435_v16 = vpop.eup %4434  ;;  %4462 = vtanh.f32 %v3698_v51  ;;  %v3823_v27 = vadd.f32 1.0, %v4433_v61 }
 0x30b   : > { %v4437_v54 = vpop.eup %4436  ;;  %4464 = vpow2.f32 %v3820_v43  ;;  %v3701_v11 = vadd.f32 %v3668_v3, %v3573_v47 }
 0x30c   : > { %v4439_v23 = vpop.eup %4438  ;;  %4466 = vtanh.f32 %v3699_v14 }
 0x30d   : > { %v4441_v60 = vpop.eup %4440  ;;  %4468 = vrcp.f32 %v3781_v13  ;;  %v3824_v9 = vadd.f32 1.0, %v4439_v23 }
 0x30e   : > { %v4443_v49 = vpop.eup %4442  ;;  %4470 = vtanh.f32 %v3700_v62  ;;  %v3825_v55 = vadd.f32 1.0, %v4441_v60 }
 0x30f   : > { %v4445_v5 = vpop.eup %4444  ;;  %4472 = vtanh.f32 %v3701_v11  ;;  %v3826_v26 = vadd.f32 1.0, %v4443_v49 }
 0x310   : > { %v4447_v10 = vpop.eup %4446  ;;  %4474 = vrcp.f32 %v3822_v45  ;;  %v3858_v34 = vmul.f32 %v4445_v5, %v372_v17 }
 0x311   : > { %v4449_v53 = vpop.eup %4448  ;;  %v3862_v44 = vmul.f32 %v4447_v10, %v6615_v63  ;;  %4476 = vrcp.f32 %v3823_v27  ;;  %v3856_v63 = vmul.f32 %v4435_v16, %v370_v18 }
 0x312   : > { %v4451_v6 = vpop.eup %4450  ;;  %v3827_v40 = vadd.f32 1.0, %v4449_v53 }
 0x313   : > { %v4453_v1 = vpop.eup %4452  ;;  %v3870_v59 = vadd.f32 %v3862_v44, %v3854_v24  ;;  %v3863_v21 = vmul.f32 %v4451_v6, %v6625_v8 }
 0x314   : > { %v4455_v58 = vpop.eup %4454  ;;  %v3864_v29 = vmul.f32 %v4453_v1, %v6629_v25  ;;  %v3857_v25 = vmul.f32 %v4437_v54, %v371_v28 }
 0x315   : > { %v4457_v33 = vpop.eup %4456  ;;  %4478 = vtanh.f32 %v3870_v59  ;;  %3902 = vst [vmem:[%s6668_s20] sm:$0xff] %v3870_v59  ;;  %v3871_v36 = vadd.f32 %v3863_v21, %v3855_v46 }
 0x316   : > { %v4459_v56 = vpop.eup %4458  ;;  %4480 = vrcp.f32 %v3824_v9  ;;  %v3872_v48 = vadd.f32 %v3864_v29, %v3856_v63  ;;  %v3828_v41 = vadd.f32 1.0, %v4457_v33 }
 0x317   : > { %v4461_v8 = vpop.eup %4460  ;;  %4482 = vtanh.f32 %v3871_v36  ;;  %3903 = vst [vmem:[%s6668_s20 + $0x8] sm:$0xff] %v3871_v36  ;;  %v3860_v43 = vmul.f32 %v4459_v56, %v374_v38 }
 0x318   : > { %v4463_v12 = vpop.eup %4462  ;;  %v3865_v52 = vmul.f32 %v4461_v8, %v6633_v37  ;;  %4484 = vtanh.f32 %v3872_v48  ;;  %3904 = vst [vmem:[%s6668_s20 + $0x10] sm:$0xff] %v3872_v48  ;;  %v3859_v37 = vmul.f32 %v4455_v58, %v373_v42 }
 0x319   : > { %v4465_v57 = vpop.eup %4464  ;;  %4486 = vrcp.f32 %v3825_v55  ;;  %v3866_v2 = vmul.f32 %v4463_v12, %v6637_v50 }
 0x31a   : > { %v4467_v35 = vpop.eup %4466  ;;  %4488 = vrcp.f32 %v3826_v26  ;;  %v3873_v20 = vadd.f32 %v3865_v52, %v3857_v25  ;;  %v3829_v22 = vadd.f32 1.0, %v4465_v57 }
 0x31b   : > { %v4469_v15 = vpop.eup %4468  ;;  %4490 = vrcp.f32 %v3827_v40  ;;  %v3874_v31 = vadd.f32 %v3866_v2, %v3858_v34  ;;  %v3867_v32 = vmul.f32 %v4467_v35, %v6641_v39 }
 0x31c   : > { %v4471_v51 = vpop.eup %4470  ;;  %4492 = vtanh.f32 %v3873_v20  ;;  %3905 = vst [vmem:[%s6668_s20 + $0x18] sm:$0xff] %v3873_v20  ;;  %v3861_v14 = vmul.f32 %v4469_v15, %v375_v4 }
 0x31d   : > { %v4473_v61 = vpop.eup %4472  ;;  %4494 = vtanh.f32 %v3874_v31  ;;  %3906 = vst [vmem:[%s6668_s20 + $0x20] sm:$0xff] %v3874_v31  ;;  %v3875_v50 = vadd.f32 %v3867_v32, %v3859_v37  ;;  %v3868_v47 = vmul.f32 %v4471_v51, %v6645_v30 }
 0x31e   : > { %4496 = vrcp.f32 %v3828_v41  ;;  %v3869_v39 = vmul.f32 %v4473_v61, %v6651_v0  ;;  %v4475_v13 = vpop.eup %4474 }
 0x31f   : > { %4498 = vtanh.f32 %v3875_v50  ;;  %3907 = vst [vmem:[%s6668_s20 + $0x28] sm:$0xff] %v3875_v50  ;;  %v3876_v16 = vadd.f32 %v3868_v47, %v3860_v43  ;;  %v4477_v54 = vpop.eup %4476 }
 0x320   : > { %4500 = vrcp.f32 %v3829_v22  ;;  %v3877_v3 = vadd.f32 %v3869_v39, %v3861_v14 }
 0x321   : > { %4502 = vtanh.f32 %v3876_v16  ;;  %3908 = vst [vmem:[%s6668_s20 + $0x30] sm:$0xff] %v3876_v16 }
 0x322   : > { %v4479_v62 = vpop.eup %4478  ;;  %4504 = vtanh.f32 %v3877_v3  ;;  %3909 = vst [vmem:[%s6668_s20 + $0x38] sm:$0xff] %v3877_v3 }
 0x323   : > { %v4481_v30 = vpop.eup %4480  ;;  %v3886_v0 = vmul.f32 %v4479_v62, %v4475_v13 }
 0x324   : > { %v4483_v23 = vpop.eup %4482 }
 0x325   : > { %v4485_v11 = vpop.eup %4484  ;;  %3894 = vst [vmem:[%s6693_s14] sm:$0xff] %v3886_v0  ;;  %v3887_v60 = vmul.f32 %v4483_v23, %v4477_v54 }
 0x326   : > { %v4487_v49 = vpop.eup %4486  ;;  %v3888_v19 = vmul.f32 %v4485_v11, %v4481_v30 }
 0x327   : > { %v4489_v5 = vpop.eup %4488  ;;  %3895 = vst [vmem:[%s6693_s14 + $0x8] sm:$0xff] %v3887_v60 }
 0x328   : > { %v4491_v45 = vpop.eup %4490  ;;  %3896 = vst [vmem:[%s6693_s14 + $0x10] sm:$0xff] %v3888_v19 }
 0x329   : > { %v4493_v10 = vpop.eup %4492 }
 0x32a   : > { %v4495_v27 = vpop.eup %4494  ;;  %v3889_v7 = vmul.f32 %v4493_v10, %v4487_v49 }
 0x32b   : > { %v4497_v53 = vpop.eup %4496  ;;  %v3890_v24 = vmul.f32 %v4495_v27, %v4489_v5 }
 0x32c   : > { %v4499_v44 = vpop.eup %4498  ;;  %3897 = vst [vmem:[%s6693_s14 + $0x18] sm:$0xff] %v3889_v7 }
 0x32d   : > { %v4501_v18 = vpop.eup %4500  ;;  %3898 = vst [vmem:[%s6693_s14 + $0x20] sm:$0xff] %v3890_v24  ;;  %v3891_v6 = vmul.f32 %v4499_v44, %v4491_v45 }
 0x32e   : > { %v4503_v9 = vpop.eup %4502 }
 0x32f   : > { %v4505_v1 = vpop.eup %4504  ;;  %3899 = vst [vmem:[%s6693_s14 + $0x28] sm:$0xff] %v3891_v6  ;;  %v3892_v59 = vmul.f32 %v4503_v9, %v4497_v53 }
 0x330   : > { %v3893_v46 = vmul.f32 %v4505_v1, %v4501_v18 }
 0x331   : > { %3900 = vst [vmem:[%s6693_s14 + $0x30] sm:$0xff] %v3892_v59 }
 0x332   : > { %3901 = vst [vmem:[%s6693_s14 + $0x38] sm:$0xff] %v3893_v46 }
 0x333 PF: > { %s19_s27 = sadd.s32 1, %s4513_s27  }
 0x334   : > { %p16_p4 = scmp.ge.s32.totalorder %s19_s27, 4  }
 0x336   :  { %18 = sbr.rel (!%p16_p4) target bundleno = 1 (0x1), region = 111 }

</bundles_post_ra>
